<compile_context>
chip_gen: v7x
topology: tpu7x:2x2x1
jax: 0.10.0
libtpu: 0.0.40
codegen_flags: <defaults>
</compile_context>

<pallas_src>
import functools

import jax
import jax.numpy as jnp
from jax.experimental import pallas as pl
from jax.experimental.pallas import tpu as pltpu

LEAKY_SLOPE = 0.2
BN_EPS = 1e-5

# MXU operand dtype.  jnp.bfloat16 feeds the v6e/v7x MXU at full rate and
# halves operand traffic, but loosens accuracy to ~1e-2; keep f32 so the 1e-3
# check against the f32 reference holds (BN stats / accumulation stay f32).
_MXU_DTYPE = jnp.float32


def _div_const(a, m):
    # Integer divide a vector by a compile-time constant (shift when pow2).
    if m & (m - 1) == 0:
        return a >> (m.bit_length() - 1)
    return a // m


def _mod_const(a, m):
    if m & (m - 1) == 0:
        return a & (m - 1)
    return a % m


def _unetconv2_kernel(x_ref,
                      w1_ref, b1_ref, g1_ref, be1_ref,
                      w2_ref, b2_ref, g2_ref, be2_ref,
                      out_ref, *, N, H, W):
    P = N * H * W
    inv_p = 1.0 / float(P)

    # Spatial coordinates of every flattened position p = n*H*W + h*W + w.
    p_idx = jax.lax.broadcasted_iota(jnp.int32, (1, P), 1)
    h_idx = _mod_const(_div_const(p_idx, W), H)
    w_idx = _mod_const(p_idx, W)

    # Static zero-padding masks + flat shifts for the 9 taps (shared by both
    # convs; computed once).
    taps = []
    for dh in range(3):
        for dw in range(3):
            oh, ow = dh - 1, dw - 1
            valid = ((h_idx + oh >= 0) & (h_idx + oh < H) &
                     (w_idx + ow >= 0) & (w_idx + ow < W))
            taps.append((oh * W + ow, valid.astype(jnp.float32)))

    def conv_bn_act(x_cp, w_ref, b_ref, g_ref, be_ref):
        # im2col: the 9 shifted + masked copies of x stacked along the
        # contraction (sublane) axis, then a single MXU matmul.
        pieces = []
        for shift, mask in taps:
            if shift == 0:                      # center tap: no shift, always valid
                pieces.append(x_cp)
            else:
                rolled = pltpu.roll(x_cp, shift=(-shift) % P, axis=1)
                pieces.append(rolled * mask)
        patches = jnp.concatenate(pieces, axis=0)                     # (9*Ci, P)

        y = jnp.dot(w_ref[...].astype(_MXU_DTYPE),
                    patches.astype(_MXU_DTYPE),
                    preferred_element_type=jnp.float32) + b_ref[...]  # (Co, P)

        # Training-mode BatchNorm, single-pass stats over the lane axis (N*H*W),
        # gamma*rsqrt folded into one scale.
        mean = jnp.sum(y, axis=1, keepdims=True) * inv_p
        ex2 = jnp.sum(y * y, axis=1, keepdims=True) * inv_p
        var = jnp.maximum(ex2 - mean * mean, 0.0)
        scale = g_ref[...] * jax.lax.rsqrt(var + BN_EPS)
        bias = be_ref[...] - mean * scale
        z = y * scale + bias

        # LeakyReLU(0.2)
        return jnp.where(z >= 0.0, z, LEAKY_SLOPE * z)

    y1 = conv_bn_act(x_ref[...], w1_ref, b1_ref, g1_ref, be1_ref)
    out_ref[...] = conv_bn_act(y1, w2_ref, b2_ref, g2_ref, be2_ref)


def _im2col_weight(w_oihw):
    # (Co, Ci, 3, 3) -> (Co, 9*Ci); column order = [tap(dh,dw) major, ci minor],
    # matching the kernel's patch stacking order.
    co, ci, kh, kw = w_oihw.shape
    return jnp.transpose(w_oihw, (0, 2, 3, 1)).reshape(co, kh * kw * ci).astype(jnp.float32)


def unet_conv2(x_nchw, params):
    """x_nchw: (N, Cin, H, W) float32 (PyTorch layout). Returns (N, Cout, H, W)."""
    N, Cin, H, W = x_nchw.shape
    Cout = params["w1"].shape[0]
    P = N * H * W

    # Channel-major, lane-dense layout; only major-axis permutes at the boundary.
    x_cp = jnp.transpose(x_nchw, (1, 0, 2, 3)).reshape(Cin, P).astype(jnp.float32)

    def col(v):
        return v.reshape(-1, 1).astype(jnp.float32)

    args = (
        x_cp,
        _im2col_weight(params["w1"]), col(params["b1"]), col(params["g1"]), col(params["be1"]),
        _im2col_weight(params["w2"]), col(params["b2"]), col(params["g2"]), col(params["be2"]),
    )

    vmem = pl.BlockSpec(memory_space=pltpu.MemorySpace.VMEM)
    # NOTE: at these shapes the whole problem is <1 MiB of VMEM, so a single
    # gridless invocation is best.  For real UNet resolutions one would add a
    # grid over spatial bands (with two-pass BN statistics) and set
    # pltpu.CompilerParams(vmem_limit_bytes=...).
    out_cp = pl.pallas_call(
        functools.partial(_unetconv2_kernel, N=N, H=H, W=W),
        out_shape=jax.ShapeDtypeStruct((Cout, P), jnp.float32),
        in_specs=[vmem] * len(args),
        out_specs=vmem,
    )(*args)

    return jnp.transpose(out_cp.reshape(Cout, N, H, W), (1, 0, 2, 3))


def init_params(key, cin, cout):
    """Parameters mimicking PyTorch Conv2d/BatchNorm2d init (affine randomized
    so the BN path is exercised)."""
    ks = iter(jax.random.split(key, 8))

    def conv_w(ci, co):
        bound = 1.0 / float((ci * 9) ** 0.5)
        return jax.random.uniform(next(ks), (co, ci, 3, 3), jnp.float32, -bound, bound)

    def conv_b(ci, co):
        bound = 1.0 / float((ci * 9) ** 0.5)
        return jax.random.uniform(next(ks), (co,), jnp.float32, -bound, bound)

    def gamma(co):
        return 1.0 + 0.1 * jax.random.normal(next(ks), (co,), jnp.float32)

    def beta(co):
        return 0.1 * jax.random.normal(next(ks), (co,), jnp.float32)

    return dict(
        w1=conv_w(cin, cout), b1=conv_b(cin, cout), g1=gamma(cout), be1=beta(cout),
        w2=conv_w(cout, cout), b2=conv_b(cout, cout), g2=gamma(cout), be2=beta(cout),
    )


def unet_conv2_reference(x_nchw, p):
    """Pure-JAX reference matching the PyTorch forward semantics:
    (Conv2d 3x3, pad=1, bias -> BatchNorm2d(train) -> LeakyReLU(0.2)) x 2."""
    hi = jax.lax.Precision.HIGHEST

    def conv3(x, w, b):
        y = jax.lax.conv_general_dilated(
            x, w, (1, 1), ((1, 1), (1, 1)),
            dimension_numbers=("NCHW", "OIHW", "NCHW"), precision=hi)
        return y + b.reshape(1, -1, 1, 1)

    def bn(y, g, be):
        m = jnp.mean(y, axis=(0, 2, 3), keepdims=True)
        v = jnp.mean(jnp.square(y - m), axis=(0, 2, 3), keepdims=True)
        return (y - m) * jax.lax.rsqrt(v + BN_EPS) * g.reshape(1, -1, 1, 1) \
            + be.reshape(1, -1, 1, 1)

    def lk(y):
        return jnp.where(y >= 0.0, y, LEAKY_SLOPE * y)

    y1 = lk(bn(conv3(x_nchw.astype(jnp.float32), p["w1"], p["b1"]), p["g1"], p["be1"]))
    y2 = lk(bn(conv3(y1, p["w2"], p["b2"]), p["g2"], p["be2"]))
    return y2


if __name__ == "__main__":
    key = jax.random.PRNGKey(0)
    kx, kp = jax.random.split(key)

    N, Cin, H, W = 2, 4, 16, 16     # small NCHW input, as the PyTorch module expects
    Cout = 32
    x = jax.random.normal(kx, (N, Cin, H, W), jnp.float32)
    params = init_params(kp, Cin, Cout)

    out = jax.block_until_ready(unet_conv2(x, params))
    assert out.shape == (N, Cout, H, W), out.shape

    ref = jax.block_until_ready(unet_conv2_reference(x, params))
    max_err = float(jnp.max(jnp.abs(out - ref)))
    assert max_err < 1e-3, f"max abs error {max_err}"

    print("KERNEL_OK")
</pallas_src>

<mosaic_0001>
module attributes {stable_mosaic.version = 11 : i64} {
  func.func @_unetconv2_kernel(%arg0: memref<4x512xf32, #tpu.memory_space<vmem>>, %arg1: memref<32x36xf32, #tpu.memory_space<vmem>>, %arg2: memref<32x1xf32, #tpu.memory_space<vmem>>, %arg3: memref<32x1xf32, #tpu.memory_space<vmem>>, %arg4: memref<32x1xf32, #tpu.memory_space<vmem>>, %arg5: memref<32x288xf32, #tpu.memory_space<vmem>>, %arg6: memref<32x1xf32, #tpu.memory_space<vmem>>, %arg7: memref<32x1xf32, #tpu.memory_space<vmem>>, %arg8: memref<32x1xf32, #tpu.memory_space<vmem>>, %arg9: memref<32x512xf32, #tpu.memory_space<vmem>>) attributes {dimension_semantics = [], scalar_prefetch = 0 : i64, scratch_operands = 0 : i64, tpu.core_type = #tpu.core_type<tc>} {
    %0 = tpu.iota {dimensions = array<i32: 1>} : vector<1x512xi32>
    %c4_i32 = arith.constant 4 : i32
    %1 = vector.broadcast %c4_i32 : i32 to vector<1x512xi32>
    %2 = arith.shrsi %0, %1 : vector<1x512xi32>
    %c15_i32 = arith.constant 15 : i32
    %3 = vector.broadcast %c15_i32 : i32 to vector<1x512xi32>
    %4 = arith.andi %2, %3 : vector<1x512xi32>
    %c15_i32_0 = arith.constant 15 : i32
    %5 = vector.broadcast %c15_i32_0 : i32 to vector<1x512xi32>
    %6 = arith.andi %0, %5 : vector<1x512xi32>
    %c-1_i32 = arith.constant -1 : i32
    %7 = vector.broadcast %c-1_i32 : i32 to vector<1x512xi32>
    %8 = arith.addi %4, %7 : vector<1x512xi32>
    %c0_i32 = arith.constant 0 : i32
    %9 = vector.broadcast %c0_i32 : i32 to vector<1x512xi32>
    %10 = arith.cmpi sge, %8, %9 : vector<1x512xi32>
    %c-1_i32_1 = arith.constant -1 : i32
    %11 = vector.broadcast %c-1_i32_1 : i32 to vector<1x512xi32>
    %12 = arith.addi %4, %11 : vector<1x512xi32>
    %c16_i32 = arith.constant 16 : i32
    %13 = vector.broadcast %c16_i32 : i32 to vector<1x512xi32>
    %14 = arith.cmpi slt, %12, %13 : vector<1x512xi32>
    %15 = arith.andi %10, %14 : vector<1x512xi1>
    %c-1_i32_2 = arith.constant -1 : i32
    %16 = vector.broadcast %c-1_i32_2 : i32 to vector<1x512xi32>
    %17 = arith.addi %6, %16 : vector<1x512xi32>
    %c0_i32_3 = arith.constant 0 : i32
    %18 = vector.broadcast %c0_i32_3 : i32 to vector<1x512xi32>
    %19 = arith.cmpi sge, %17, %18 : vector<1x512xi32>
    %20 = arith.andi %15, %19 : vector<1x512xi1>
    %c-1_i32_4 = arith.constant -1 : i32
    %21 = vector.broadcast %c-1_i32_4 : i32 to vector<1x512xi32>
    %22 = arith.addi %6, %21 : vector<1x512xi32>
    %c16_i32_5 = arith.constant 16 : i32
    %23 = vector.broadcast %c16_i32_5 : i32 to vector<1x512xi32>
    %24 = arith.cmpi slt, %22, %23 : vector<1x512xi32>
    %25 = arith.andi %20, %24 : vector<1x512xi1>
    %26 = arith.extui %25 : vector<1x512xi1> to vector<1x512xi32>
    %27 = arith.sitofp %26 : vector<1x512xi32> to vector<1x512xf32>
    %c-1_i32_6 = arith.constant -1 : i32
    %28 = vector.broadcast %c-1_i32_6 : i32 to vector<1x512xi32>
    %29 = arith.addi %4, %28 : vector<1x512xi32>
    %c0_i32_7 = arith.constant 0 : i32
    %30 = vector.broadcast %c0_i32_7 : i32 to vector<1x512xi32>
    %31 = arith.cmpi sge, %29, %30 : vector<1x512xi32>
    %c-1_i32_8 = arith.constant -1 : i32
    %32 = vector.broadcast %c-1_i32_8 : i32 to vector<1x512xi32>
    %33 = arith.addi %4, %32 : vector<1x512xi32>
    %c16_i32_9 = arith.constant 16 : i32
    %34 = vector.broadcast %c16_i32_9 : i32 to vector<1x512xi32>
    %35 = arith.cmpi slt, %33, %34 : vector<1x512xi32>
    %36 = arith.andi %31, %35 : vector<1x512xi1>
    %c0_i32_10 = arith.constant 0 : i32
    %37 = vector.broadcast %c0_i32_10 : i32 to vector<1x512xi32>
    %38 = arith.addi %6, %37 : vector<1x512xi32>
    %c0_i32_11 = arith.constant 0 : i32
    %39 = vector.broadcast %c0_i32_11 : i32 to vector<1x512xi32>
    %40 = arith.cmpi sge, %38, %39 : vector<1x512xi32>
    %41 = arith.andi %36, %40 : vector<1x512xi1>
    %c0_i32_12 = arith.constant 0 : i32
    %42 = vector.broadcast %c0_i32_12 : i32 to vector<1x512xi32>
    %43 = arith.addi %6, %42 : vector<1x512xi32>
    %c16_i32_13 = arith.constant 16 : i32
    %44 = vector.broadcast %c16_i32_13 : i32 to vector<1x512xi32>
    %45 = arith.cmpi slt, %43, %44 : vector<1x512xi32>
    %46 = arith.andi %41, %45 : vector<1x512xi1>
    %47 = arith.extui %46 : vector<1x512xi1> to vector<1x512xi32>
    %48 = arith.sitofp %47 : vector<1x512xi32> to vector<1x512xf32>
    %c-1_i32_14 = arith.constant -1 : i32
    %49 = vector.broadcast %c-1_i32_14 : i32 to vector<1x512xi32>
    %50 = arith.addi %4, %49 : vector<1x512xi32>
    %c0_i32_15 = arith.constant 0 : i32
    %51 = vector.broadcast %c0_i32_15 : i32 to vector<1x512xi32>
    %52 = arith.cmpi sge, %50, %51 : vector<1x512xi32>
    %c-1_i32_16 = arith.constant -1 : i32
    %53 = vector.broadcast %c-1_i32_16 : i32 to vector<1x512xi32>
    %54 = arith.addi %4, %53 : vector<1x512xi32>
    %c16_i32_17 = arith.constant 16 : i32
    %55 = vector.broadcast %c16_i32_17 : i32 to vector<1x512xi32>
    %56 = arith.cmpi slt, %54, %55 : vector<1x512xi32>
    %57 = arith.andi %52, %56 : vector<1x512xi1>
    %c1_i32 = arith.constant 1 : i32
    %58 = vector.broadcast %c1_i32 : i32 to vector<1x512xi32>
    %59 = arith.addi %6, %58 : vector<1x512xi32>
    %c0_i32_18 = arith.constant 0 : i32
    %60 = vector.broadcast %c0_i32_18 : i32 to vector<1x512xi32>
    %61 = arith.cmpi sge, %59, %60 : vector<1x512xi32>
    %62 = arith.andi %57, %61 : vector<1x512xi1>
    %c1_i32_19 = arith.constant 1 : i32
    %63 = vector.broadcast %c1_i32_19 : i32 to vector<1x512xi32>
    %64 = arith.addi %6, %63 : vector<1x512xi32>
    %c16_i32_20 = arith.constant 16 : i32
    %65 = vector.broadcast %c16_i32_20 : i32 to vector<1x512xi32>
    %66 = arith.cmpi slt, %64, %65 : vector<1x512xi32>
    %67 = arith.andi %62, %66 : vector<1x512xi1>
    %68 = arith.extui %67 : vector<1x512xi1> to vector<1x512xi32>
    %69 = arith.sitofp %68 : vector<1x512xi32> to vector<1x512xf32>
    %c0_i32_21 = arith.constant 0 : i32
    %70 = vector.broadcast %c0_i32_21 : i32 to vector<1x512xi32>
    %71 = arith.addi %4, %70 : vector<1x512xi32>
    %c0_i32_22 = arith.constant 0 : i32
    %72 = vector.broadcast %c0_i32_22 : i32 to vector<1x512xi32>
    %73 = arith.cmpi sge, %71, %72 : vector<1x512xi32>
    %c0_i32_23 = arith.constant 0 : i32
    %74 = vector.broadcast %c0_i32_23 : i32 to vector<1x512xi32>
    %75 = arith.addi %4, %74 : vector<1x512xi32>
    %c16_i32_24 = arith.constant 16 : i32
    %76 = vector.broadcast %c16_i32_24 : i32 to vector<1x512xi32>
    %77 = arith.cmpi slt, %75, %76 : vector<1x512xi32>
    %78 = arith.andi %73, %77 : vector<1x512xi1>
    %c-1_i32_25 = arith.constant -1 : i32
    %79 = vector.broadcast %c-1_i32_25 : i32 to vector<1x512xi32>
    %80 = arith.addi %6, %79 : vector<1x512xi32>
    %c0_i32_26 = arith.constant 0 : i32
    %81 = vector.broadcast %c0_i32_26 : i32 to vector<1x512xi32>
    %82 = arith.cmpi sge, %80, %81 : vector<1x512xi32>
    %83 = arith.andi %78, %82 : vector<1x512xi1>
    %c-1_i32_27 = arith.constant -1 : i32
    %84 = vector.broadcast %c-1_i32_27 : i32 to vector<1x512xi32>
    %85 = arith.addi %6, %84 : vector<1x512xi32>
    %c16_i32_28 = arith.constant 16 : i32
    %86 = vector.broadcast %c16_i32_28 : i32 to vector<1x512xi32>
    %87 = arith.cmpi slt, %85, %86 : vector<1x512xi32>
    %88 = arith.andi %83, %87 : vector<1x512xi1>
    %89 = arith.extui %88 : vector<1x512xi1> to vector<1x512xi32>
    %90 = arith.sitofp %89 : vector<1x512xi32> to vector<1x512xf32>
    %c0_i32_29 = arith.constant 0 : i32
    %91 = vector.broadcast %c0_i32_29 : i32 to vector<1x512xi32>
    %92 = arith.addi %4, %91 : vector<1x512xi32>
    %c0_i32_30 = arith.constant 0 : i32
    %93 = vector.broadcast %c0_i32_30 : i32 to vector<1x512xi32>
    %94 = arith.cmpi sge, %92, %93 : vector<1x512xi32>
    %c0_i32_31 = arith.constant 0 : i32
    %95 = vector.broadcast %c0_i32_31 : i32 to vector<1x512xi32>
    %96 = arith.addi %4, %95 : vector<1x512xi32>
    %c16_i32_32 = arith.constant 16 : i32
    %97 = vector.broadcast %c16_i32_32 : i32 to vector<1x512xi32>
    %98 = arith.cmpi slt, %96, %97 : vector<1x512xi32>
    %99 = arith.andi %94, %98 : vector<1x512xi1>
    %c1_i32_33 = arith.constant 1 : i32
    %100 = vector.broadcast %c1_i32_33 : i32 to vector<1x512xi32>
    %101 = arith.addi %6, %100 : vector<1x512xi32>
    %c0_i32_34 = arith.constant 0 : i32
    %102 = vector.broadcast %c0_i32_34 : i32 to vector<1x512xi32>
    %103 = arith.cmpi sge, %101, %102 : vector<1x512xi32>
    %104 = arith.andi %99, %103 : vector<1x512xi1>
    %c1_i32_35 = arith.constant 1 : i32
    %105 = vector.broadcast %c1_i32_35 : i32 to vector<1x512xi32>
    %106 = arith.addi %6, %105 : vector<1x512xi32>
    %c16_i32_36 = arith.constant 16 : i32
    %107 = vector.broadcast %c16_i32_36 : i32 to vector<1x512xi32>
    %108 = arith.cmpi slt, %106, %107 : vector<1x512xi32>
    %109 = arith.andi %104, %108 : vector<1x512xi1>
    %110 = arith.extui %109 : vector<1x512xi1> to vector<1x512xi32>
    %111 = arith.sitofp %110 : vector<1x512xi32> to vector<1x512xf32>
    %c1_i32_37 = arith.constant 1 : i32
    %112 = vector.broadcast %c1_i32_37 : i32 to vector<1x512xi32>
    %113 = arith.addi %4, %112 : vector<1x512xi32>
    %c0_i32_38 = arith.constant 0 : i32
    %114 = vector.broadcast %c0_i32_38 : i32 to vector<1x512xi32>
    %115 = arith.cmpi sge, %113, %114 : vector<1x512xi32>
    %c1_i32_39 = arith.constant 1 : i32
    %116 = vector.broadcast %c1_i32_39 : i32 to vector<1x512xi32>
    %117 = arith.addi %4, %116 : vector<1x512xi32>
    %c16_i32_40 = arith.constant 16 : i32
    %118 = vector.broadcast %c16_i32_40 : i32 to vector<1x512xi32>
    %119 = arith.cmpi slt, %117, %118 : vector<1x512xi32>
    %120 = arith.andi %115, %119 : vector<1x512xi1>
    %c-1_i32_41 = arith.constant -1 : i32
    %121 = vector.broadcast %c-1_i32_41 : i32 to vector<1x512xi32>
    %122 = arith.addi %6, %121 : vector<1x512xi32>
    %c0_i32_42 = arith.constant 0 : i32
    %123 = vector.broadcast %c0_i32_42 : i32 to vector<1x512xi32>
    %124 = arith.cmpi sge, %122, %123 : vector<1x512xi32>
    %125 = arith.andi %120, %124 : vector<1x512xi1>
    %c-1_i32_43 = arith.constant -1 : i32
    %126 = vector.broadcast %c-1_i32_43 : i32 to vector<1x512xi32>
    %127 = arith.addi %6, %126 : vector<1x512xi32>
    %c16_i32_44 = arith.constant 16 : i32
    %128 = vector.broadcast %c16_i32_44 : i32 to vector<1x512xi32>
    %129 = arith.cmpi slt, %127, %128 : vector<1x512xi32>
    %130 = arith.andi %125, %129 : vector<1x512xi1>
    %131 = arith.extui %130 : vector<1x512xi1> to vector<1x512xi32>
    %132 = arith.sitofp %131 : vector<1x512xi32> to vector<1x512xf32>
    %c1_i32_45 = arith.constant 1 : i32
    %133 = vector.broadcast %c1_i32_45 : i32 to vector<1x512xi32>
    %134 = arith.addi %4, %133 : vector<1x512xi32>
    %c0_i32_46 = arith.constant 0 : i32
    %135 = vector.broadcast %c0_i32_46 : i32 to vector<1x512xi32>
    %136 = arith.cmpi sge, %134, %135 : vector<1x512xi32>
    %c1_i32_47 = arith.constant 1 : i32
    %137 = vector.broadcast %c1_i32_47 : i32 to vector<1x512xi32>
    %138 = arith.addi %4, %137 : vector<1x512xi32>
    %c16_i32_48 = arith.constant 16 : i32
    %139 = vector.broadcast %c16_i32_48 : i32 to vector<1x512xi32>
    %140 = arith.cmpi slt, %138, %139 : vector<1x512xi32>
    %141 = arith.andi %136, %140 : vector<1x512xi1>
    %c0_i32_49 = arith.constant 0 : i32
    %142 = vector.broadcast %c0_i32_49 : i32 to vector<1x512xi32>
    %143 = arith.addi %6, %142 : vector<1x512xi32>
    %c0_i32_50 = arith.constant 0 : i32
    %144 = vector.broadcast %c0_i32_50 : i32 to vector<1x512xi32>
    %145 = arith.cmpi sge, %143, %144 : vector<1x512xi32>
    %146 = arith.andi %141, %145 : vector<1x512xi1>
    %c0_i32_51 = arith.constant 0 : i32
    %147 = vector.broadcast %c0_i32_51 : i32 to vector<1x512xi32>
    %148 = arith.addi %6, %147 : vector<1x512xi32>
    %c16_i32_52 = arith.constant 16 : i32
    %149 = vector.broadcast %c16_i32_52 : i32 to vector<1x512xi32>
    %150 = arith.cmpi slt, %148, %149 : vector<1x512xi32>
    %151 = arith.andi %146, %150 : vector<1x512xi1>
    %152 = arith.extui %151 : vector<1x512xi1> to vector<1x512xi32>
    %153 = arith.sitofp %152 : vector<1x512xi32> to vector<1x512xf32>
    %c1_i32_53 = arith.constant 1 : i32
    %154 = vector.broadcast %c1_i32_53 : i32 to vector<1x512xi32>
    %155 = arith.addi %4, %154 : vector<1x512xi32>
    %c0_i32_54 = arith.constant 0 : i32
    %156 = vector.broadcast %c0_i32_54 : i32 to vector<1x512xi32>
    %157 = arith.cmpi sge, %155, %156 : vector<1x512xi32>
    %c1_i32_55 = arith.constant 1 : i32
    %158 = vector.broadcast %c1_i32_55 : i32 to vector<1x512xi32>
    %159 = arith.addi %4, %158 : vector<1x512xi32>
    %c16_i32_56 = arith.constant 16 : i32
    %160 = vector.broadcast %c16_i32_56 : i32 to vector<1x512xi32>
    %161 = arith.cmpi slt, %159, %160 : vector<1x512xi32>
    %162 = arith.andi %157, %161 : vector<1x512xi1>
    %c1_i32_57 = arith.constant 1 : i32
    %163 = vector.broadcast %c1_i32_57 : i32 to vector<1x512xi32>
    %164 = arith.addi %6, %163 : vector<1x512xi32>
    %c0_i32_58 = arith.constant 0 : i32
    %165 = vector.broadcast %c0_i32_58 : i32 to vector<1x512xi32>
    %166 = arith.cmpi sge, %164, %165 : vector<1x512xi32>
    %167 = arith.andi %162, %166 : vector<1x512xi1>
    %c1_i32_59 = arith.constant 1 : i32
    %168 = vector.broadcast %c1_i32_59 : i32 to vector<1x512xi32>
    %169 = arith.addi %6, %168 : vector<1x512xi32>
    %c16_i32_60 = arith.constant 16 : i32
    %170 = vector.broadcast %c16_i32_60 : i32 to vector<1x512xi32>
    %171 = arith.cmpi slt, %169, %170 : vector<1x512xi32>
    %172 = arith.andi %167, %171 : vector<1x512xi1>
    %173 = arith.extui %172 : vector<1x512xi1> to vector<1x512xi32>
    %174 = arith.sitofp %173 : vector<1x512xi32> to vector<1x512xf32>
    %c0 = arith.constant 0 : index
    %c0_61 = arith.constant 0 : index
    %175 = vector.load %arg0[%c0, %c0_61] : memref<4x512xf32, #tpu.memory_space<vmem>>, vector<4x512xf32>
    %c17_i32 = arith.constant 17 : i32
    %176 = tpu.dynamic_rotate %175 by %c17_i32 dim 1 : vector<4x512xf32>, i32 -> vector<4x512xf32>
    %177 = vector.broadcast %27 : vector<1x512xf32> to vector<4x512xf32>
    %178 = arith.mulf %176, %177 : vector<4x512xf32>
    %c16_i32_62 = arith.constant 16 : i32
    %179 = tpu.dynamic_rotate %175 by %c16_i32_62 dim 1 : vector<4x512xf32>, i32 -> vector<4x512xf32>
    %180 = vector.broadcast %48 : vector<1x512xf32> to vector<4x512xf32>
    %181 = arith.mulf %179, %180 : vector<4x512xf32>
    %c15_i32_63 = arith.constant 15 : i32
    %182 = tpu.dynamic_rotate %175 by %c15_i32_63 dim 1 : vector<4x512xf32>, i32 -> vector<4x512xf32>
    %183 = vector.broadcast %69 : vector<1x512xf32> to vector<4x512xf32>
    %184 = arith.mulf %182, %183 : vector<4x512xf32>
    %c1_i32_64 = arith.constant 1 : i32
    %185 = tpu.dynamic_rotate %175 by %c1_i32_64 dim 1 : vector<4x512xf32>, i32 -> vector<4x512xf32>
    %186 = vector.broadcast %90 : vector<1x512xf32> to vector<4x512xf32>
    %187 = arith.mulf %185, %186 : vector<4x512xf32>
    %c511_i32 = arith.constant 511 : i32
    %188 = tpu.dynamic_rotate %175 by %c511_i32 dim 1 : vector<4x512xf32>, i32 -> vector<4x512xf32>
    %189 = vector.broadcast %111 : vector<1x512xf32> to vector<4x512xf32>
    %190 = arith.mulf %188, %189 : vector<4x512xf32>
    %c497_i32 = arith.constant 497 : i32
    %191 = tpu.dynamic_rotate %175 by %c497_i32 dim 1 : vector<4x512xf32>, i32 -> vector<4x512xf32>
    %192 = vector.broadcast %132 : vector<1x512xf32> to vector<4x512xf32>
    %193 = arith.mulf %191, %192 : vector<4x512xf32>
    %c496_i32 = arith.constant 496 : i32
    %194 = tpu.dynamic_rotate %175 by %c496_i32 dim 1 : vector<4x512xf32>, i32 -> vector<4x512xf32>
    %195 = vector.broadcast %153 : vector<1x512xf32> to vector<4x512xf32>
    %196 = arith.mulf %194, %195 : vector<4x512xf32>
    %c495_i32 = arith.constant 495 : i32
    %197 = tpu.dynamic_rotate %175 by %c495_i32 dim 1 : vector<4x512xf32>, i32 -> vector<4x512xf32>
    %198 = vector.broadcast %174 : vector<1x512xf32> to vector<4x512xf32>
    %199 = arith.mulf %197, %198 : vector<4x512xf32>
    %200 = tpu.concatenate %178, %181, %184, %187, %175, %190, %193, %196, %199 in 0 : vector<4x512xf32>, vector<4x512xf32>, vector<4x512xf32>, vector<4x512xf32>, vector<4x512xf32>, vector<4x512xf32>, vector<4x512xf32>, vector<4x512xf32>, vector<4x512xf32> -> vector<36x512xf32>
    %c0_65 = arith.constant 0 : index
    %c0_66 = arith.constant 0 : index
    %201 = vector.load %arg1[%c0_65, %c0_66] : memref<32x36xf32, #tpu.memory_space<vmem>>, vector<32x36xf32>
    %cst = arith.constant dense<0.000000e+00> : vector<32x512xf32>
    %202 = tpu.matmul %201, %200, %cst {dimension_numbers = #tpu.dot_dimension_numbers<[1], [0], [0], [1], [0, 0, 1, 1], [], []>} : vector<32x36xf32>, vector<36x512xf32>, vector<32x512xf32> -> vector<32x512xf32>
    %c0_67 = arith.constant 0 : index
    %c0_68 = arith.constant 0 : index
    %203 = vector.load %arg2[%c0_67, %c0_68] : memref<32x1xf32, #tpu.memory_space<vmem>>, vector<32x1xf32>
    %204 = vector.broadcast %203 : vector<32x1xf32> to vector<32x512xf32>
    %205 = arith.addf %202, %204 : vector<32x512xf32>
    %cst_69 = arith.constant dense<0.000000e+00> : vector<32xf32>
    %206 = vector.multi_reduction <add>, %205, %cst_69 [1] : vector<32x512xf32> to vector<32xf32>
    %207 = vector.shape_cast %206 : vector<32xf32> to vector<32x1xf32>
    %cst_70 = arith.constant 0.001953125 : f32
    %208 = vector.broadcast %cst_70 : f32 to vector<32x1xf32>
    %209 = arith.mulf %207, %208 : vector<32x1xf32>
    %210 = arith.mulf %205, %205 : vector<32x512xf32>
    %cst_71 = arith.constant dense<0.000000e+00> : vector<32xf32>
    %211 = vector.multi_reduction <add>, %210, %cst_71 [1] : vector<32x512xf32> to vector<32xf32>
    %212 = vector.shape_cast %211 : vector<32xf32> to vector<32x1xf32>
    %cst_72 = arith.constant 0.001953125 : f32
    %213 = vector.broadcast %cst_72 : f32 to vector<32x1xf32>
    %214 = arith.mulf %212, %213 : vector<32x1xf32>
    %215 = arith.mulf %209, %209 : vector<32x1xf32>
    %216 = arith.subf %214, %215 : vector<32x1xf32>
    %cst_73 = arith.constant 0.000000e+00 : f32
    %217 = vector.broadcast %cst_73 : f32 to vector<32x1xf32>
    %218 = arith.maximumf %216, %217 : vector<32x1xf32>
    %c0_74 = arith.constant 0 : index
    %c0_75 = arith.constant 0 : index
    %219 = vector.load %arg3[%c0_74, %c0_75] : memref<32x1xf32, #tpu.memory_space<vmem>>, vector<32x1xf32>
    %cst_76 = arith.constant 9.99999974E-6 : f32
    %220 = vector.broadcast %cst_76 : f32 to vector<32x1xf32>
    %221 = arith.addf %218, %220 : vector<32x1xf32>
    %222 = math.rsqrt %221 : vector<32x1xf32>
    %223 = arith.mulf %219, %222 : vector<32x1xf32>
    %c0_77 = arith.constant 0 : index
    %c0_78 = arith.constant 0 : index
    %224 = vector.load %arg4[%c0_77, %c0_78] : memref<32x1xf32, #tpu.memory_space<vmem>>, vector<32x1xf32>
    %225 = arith.mulf %209, %223 : vector<32x1xf32>
    %226 = arith.subf %224, %225 : vector<32x1xf32>
    %227 = vector.broadcast %223 : vector<32x1xf32> to vector<32x512xf32>
    %228 = arith.mulf %205, %227 : vector<32x512xf32>
    %229 = vector.broadcast %226 : vector<32x1xf32> to vector<32x512xf32>
    %230 = arith.addf %228, %229 : vector<32x512xf32>
    %cst_79 = arith.constant 0.000000e+00 : f32
    %231 = vector.broadcast %cst_79 : f32 to vector<32x512xf32>
    %232 = arith.cmpf oge, %230, %231 : vector<32x512xf32>
    %cst_80 = arith.constant 2.000000e-01 : f32
    %233 = vector.broadcast %cst_80 : f32 to vector<32x512xf32>
    %234 = arith.mulf %233, %230 : vector<32x512xf32>
    %235 = arith.select %232, %230, %234 : vector<32x512xi1>, vector<32x512xf32>
    %c17_i32_81 = arith.constant 17 : i32
    %236 = tpu.dynamic_rotate %235 by %c17_i32_81 dim 1 : vector<32x512xf32>, i32 -> vector<32x512xf32>
    %237 = vector.broadcast %27 : vector<1x512xf32> to vector<32x512xf32>
    %238 = arith.mulf %236, %237 : vector<32x512xf32>
    %c16_i32_82 = arith.constant 16 : i32
    %239 = tpu.dynamic_rotate %235 by %c16_i32_82 dim 1 : vector<32x512xf32>, i32 -> vector<32x512xf32>
    %240 = vector.broadcast %48 : vector<1x512xf32> to vector<32x512xf32>
    %241 = arith.mulf %239, %240 : vector<32x512xf32>
    %c15_i32_83 = arith.constant 15 : i32
    %242 = tpu.dynamic_rotate %235 by %c15_i32_83 dim 1 : vector<32x512xf32>, i32 -> vector<32x512xf32>
    %243 = vector.broadcast %69 : vector<1x512xf32> to vector<32x512xf32>
    %244 = arith.mulf %242, %243 : vector<32x512xf32>
    %c1_i32_84 = arith.constant 1 : i32
    %245 = tpu.dynamic_rotate %235 by %c1_i32_84 dim 1 : vector<32x512xf32>, i32 -> vector<32x512xf32>
    %246 = vector.broadcast %90 : vector<1x512xf32> to vector<32x512xf32>
    %247 = arith.mulf %245, %246 : vector<32x512xf32>
    %c511_i32_85 = arith.constant 511 : i32
    %248 = tpu.dynamic_rotate %235 by %c511_i32_85 dim 1 : vector<32x512xf32>, i32 -> vector<32x512xf32>
    %249 = vector.broadcast %111 : vector<1x512xf32> to vector<32x512xf32>
    %250 = arith.mulf %248, %249 : vector<32x512xf32>
    %c497_i32_86 = arith.constant 497 : i32
    %251 = tpu.dynamic_rotate %235 by %c497_i32_86 dim 1 : vector<32x512xf32>, i32 -> vector<32x512xf32>
    %252 = vector.broadcast %132 : vector<1x512xf32> to vector<32x512xf32>
    %253 = arith.mulf %251, %252 : vector<32x512xf32>
    %c496_i32_87 = arith.constant 496 : i32
    %254 = tpu.dynamic_rotate %235 by %c496_i32_87 dim 1 : vector<32x512xf32>, i32 -> vector<32x512xf32>
    %255 = vector.broadcast %153 : vector<1x512xf32> to vector<32x512xf32>
    %256 = arith.mulf %254, %255 : vector<32x512xf32>
    %c495_i32_88 = arith.constant 495 : i32
    %257 = tpu.dynamic_rotate %235 by %c495_i32_88 dim 1 : vector<32x512xf32>, i32 -> vector<32x512xf32>
    %258 = vector.broadcast %174 : vector<1x512xf32> to vector<32x512xf32>
    %259 = arith.mulf %257, %258 : vector<32x512xf32>
    %260 = tpu.concatenate %238, %241, %244, %247, %235, %250, %253, %256, %259 in 0 : vector<32x512xf32>, vector<32x512xf32>, vector<32x512xf32>, vector<32x512xf32>, vector<32x512xf32>, vector<32x512xf32>, vector<32x512xf32>, vector<32x512xf32>, vector<32x512xf32> -> vector<288x512xf32>
    %c0_89 = arith.constant 0 : index
    %c0_90 = arith.constant 0 : index
    %261 = vector.load %arg5[%c0_89, %c0_90] : memref<32x288xf32, #tpu.memory_space<vmem>>, vector<32x288xf32>
    %cst_91 = arith.constant dense<0.000000e+00> : vector<32x512xf32>
    %262 = tpu.matmul %261, %260, %cst_91 {dimension_numbers = #tpu.dot_dimension_numbers<[1], [0], [0], [1], [0, 0, 1, 1], [], []>} : vector<32x288xf32>, vector<288x512xf32>, vector<32x512xf32> -> vector<32x512xf32>
    %c0_92 = arith.constant 0 : index
    %c0_93 = arith.constant 0 : index
    %263 = vector.load %arg6[%c0_92, %c0_93] : memref<32x1xf32, #tpu.memory_space<vmem>>, vector<32x1xf32>
    %264 = vector.broadcast %263 : vector<32x1xf32> to vector<32x512xf32>
    %265 = arith.addf %262, %264 : vector<32x512xf32>
    %cst_94 = arith.constant dense<0.000000e+00> : vector<32xf32>
    %266 = vector.multi_reduction <add>, %265, %cst_94 [1] : vector<32x512xf32> to vector<32xf32>
    %267 = vector.shape_cast %266 : vector<32xf32> to vector<32x1xf32>
    %cst_95 = arith.constant 0.001953125 : f32
    %268 = vector.broadcast %cst_95 : f32 to vector<32x1xf32>
    %269 = arith.mulf %267, %268 : vector<32x1xf32>
    %270 = arith.mulf %265, %265 : vector<32x512xf32>
    %cst_96 = arith.constant dense<0.000000e+00> : vector<32xf32>
    %271 = vector.multi_reduction <add>, %270, %cst_96 [1] : vector<32x512xf32> to vector<32xf32>
    %272 = vector.shape_cast %271 : vector<32xf32> to vector<32x1xf32>
    %cst_97 = arith.constant 0.001953125 : f32
    %273 = vector.broadcast %cst_97 : f32 to vector<32x1xf32>
    %274 = arith.mulf %272, %273 : vector<32x1xf32>
    %275 = arith.mulf %269, %269 : vector<32x1xf32>
    %276 = arith.subf %274, %275 : vector<32x1xf32>
    %cst_98 = arith.constant 0.000000e+00 : f32
    %277 = vector.broadcast %cst_98 : f32 to vector<32x1xf32>
    %278 = arith.maximumf %276, %277 : vector<32x1xf32>
    %c0_99 = arith.constant 0 : index
    %c0_100 = arith.constant 0 : index
    %279 = vector.load %arg7[%c0_99, %c0_100] : memref<32x1xf32, #tpu.memory_space<vmem>>, vector<32x1xf32>
    %cst_101 = arith.constant 9.99999974E-6 : f32
    %280 = vector.broadcast %cst_101 : f32 to vector<32x1xf32>
    %281 = arith.addf %278, %280 : vector<32x1xf32>
    %282 = math.rsqrt %281 : vector<32x1xf32>
    %283 = arith.mulf %279, %282 : vector<32x1xf32>
    %c0_102 = arith.constant 0 : index
    %c0_103 = arith.constant 0 : index
    %284 = vector.load %arg8[%c0_102, %c0_103] : memref<32x1xf32, #tpu.memory_space<vmem>>, vector<32x1xf32>
    %285 = arith.mulf %269, %283 : vector<32x1xf32>
    %286 = arith.subf %284, %285 : vector<32x1xf32>
    %287 = vector.broadcast %283 : vector<32x1xf32> to vector<32x512xf32>
    %288 = arith.mulf %265, %287 : vector<32x512xf32>
    %289 = vector.broadcast %286 : vector<32x1xf32> to vector<32x512xf32>
    %290 = arith.addf %288, %289 : vector<32x512xf32>
    %cst_104 = arith.constant 0.000000e+00 : f32
    %291 = vector.broadcast %cst_104 : f32 to vector<32x512xf32>
    %292 = arith.cmpf oge, %290, %291 : vector<32x512xf32>
    %cst_105 = arith.constant 2.000000e-01 : f32
    %293 = vector.broadcast %cst_105 : f32 to vector<32x512xf32>
    %294 = arith.mulf %293, %290 : vector<32x512xf32>
    %295 = arith.select %292, %290, %294 : vector<32x512xi1>, vector<32x512xf32>
    %c0_106 = arith.constant 0 : index
    %c0_107 = arith.constant 0 : index
    %296 = vector.load %arg9[%c0_106, %c0_107] : memref<32x512xf32, #tpu.memory_space<vmem>>, vector<32x512xf32>
    tpu.vector_store %arg9[%c0_106, %c0_107], %295 {strides = array<i32>} : memref<32x512xf32, #tpu.memory_space<vmem>>, vector<32x512xf32>,
    return
  }
}

</mosaic_0001>

<bundles_post_ra>
// kernel: tpu_custom_call.1
= control target key start
LH: loop header
LB: loop body
LE: loop exit
PB: predicated region body
PF: predicated region fallthrough
CT: control target
= control target key end

     0   :  { %s2392_s11 = smov 1   ;;  %s2393_s12 = smov 16   ;;  %s4398_s0 = inlined_call_operand.vmem [shape: f32[4,512], index: 0, kind: input, shape index: {}]   ;;  %s4399_s1 = inlined_call_operand.vmem [shape: f32[32,36], index: 1, kind: input, shape index: {}]   ;;  %s4400_s2 = inlined_call_operand.vmem [shape: f32[32,1], index: 2, kind: input, shape index: {}]   ;;  %s4401_s3 = inlined_call_operand.vmem [shape: f32[32,1], index: 3, kind: input, shape index: {}]   ;;  %s4402_s4 = inlined_call_operand.vmem [shape: f32[32,1], index: 4, kind: input, shape index: {}]   ;;  %s4403_s5 = inlined_call_operand.vmem [shape: f32[32,288], index: 5, kind: input, shape index: {}]   ;;  %s4404_s6 = inlined_call_operand.vmem [shape: f32[32,1], index: 6, kind: input, shape index: {}]   ;;  %s4405_s7 = inlined_call_operand.vmem [shape: f32[32,1], index: 7, kind: input, shape index: {}]   ;;  %s4406_s8 = inlined_call_operand.vmem [shape: f32[32,1], index: 8, kind: input, shape index: {}]   ;;  %s4407_s9 = inlined_call_operand.hbm [shape: f32[32,512], index: 9, kind: output, shape index: {}]  }
   0x1   :  { %v2458_v0 = vld [vmem:[%s4398_s0] sm:$0xff] }
   0x2   :  { %313 = vrot.lane.b32.xlu1 %v2458_v0, %s2392_s11  ;;  %279 = vrot.lane.b32.xlu0 %v2458_v0, %s2393_s12  ;;  %v2466_v1 = vcombine.high %v2458_v0, %v2458_v0 }
   0x3   :  { %14 = vsyncpa [#allocation3], 0  ;;  %v2471_v2 = vld [vmem:[%s4398_s0 + $0x8] sm:$0xff]  ;;  %v4420_v3 = vmov 0.0   ;;  %s2395_s0 = smov 17   ;;  %s2396_s15 = smov 15   ;;  %v33_v10 = vlaneseq }
   0x4   :  { %580 = vmatprep.mubr.f32.mxu0 %v4420_v3  ;;  %669 = vmatprep.mubr.f32.mxu1 %v4420_v3  ;;  %v2481_v4 = vcombine.high %v2471_v2, %v2471_v2  ;;  %s2397_s16 = smov 127   ;;  %s2398_s17 = smov 112   ;;  %v467_v5 = vld [vmem:[%s4400_s2] sm:$0xff]  ;;  %v468_v6 = vld [vmem:[%s4400_s2 + $0x8] sm:$0xff]  ;;  %v2401_v7 = vmov 0   ;;  %v470_v8 = vld [vmem:[%s4400_s2 + $0x18] sm:$0xff] }
   0x5   :  { %s2399_s18 = smov 113   ;;  %s2400_s19 = smov 111   ;;  %2348 = vset.pattern.permute.xlu0 %v2401_v7  ;;  %2349 = vset.pattern.permute.xlu1 %v2401_v7  ;;  %v469_v9 = vld [vmem:[%s4400_s2 + $0x10] sm:$0xff]  ;;  %v2551_v11 = vand.u32 127, %v33_v10 }
   0x6   :  { %315 = vrot.lane.b32.xlu1 %v2466_v1, %s2392_s11  ;;  %281 = vrot.lane.b32.xlu0 %v2466_v1, %s2393_s12 }
   0x7   :  { %v35_v12 = vadd.s32 128, %v2551_v11  ;;  %v38_v14 = vshra.s32 %v2551_v11, 4  ;;  %v2558_v17 = vadd.s32 256, %v2551_v11  ;;  %v46_v22 = vand.u32 15, %v2551_v11 }
   0x8   :  { %v2573_v24 = vadd.s32 384, %v2551_v11  ;;  %vm4413_vm10 = vcmp.lt.s32.totalorder %v2551_v11, 1  ;;  %vm4414_vm12 = vcmp.lt.s32.totalorder %v2551_v11, 16  ;;  %vm4410_vm14 = vcmp.lt.s32.totalorder %v2551_v11, 17 }
   0x9   :  { %v39_v13 = vshra.s32 %v35_v12, 4  ;;  %v47_v15 = vand.u32 15, %v35_v12  ;;  %v2560_v18 = vand.u32 15, %v38_v14  ;;  %v40_v25 = vshra.s32 %v2558_v17, 4 }
   0xa   :  { %319 = vrot.lane.b32.xlu1 %v2481_v4, %s2392_s11  ;;  %285 = vrot.lane.b32.xlu0 %v2481_v4, %s2393_s12  ;;  %v2587_v29 = vadd.s32 4294967295, %v46_v22  ;;  %v41_v33 = vshra.s32 %v2573_v24, 4  ;;  %v48_v38 = vand.u32 15, %v2558_v17  ;;  %v49_v47 = vand.u32 15, %v2573_v24 }
   0xb   :  { %v2555_v16 = vand.u32 15, %v39_v13  ;;  %v2566_v21 = vadd.s32 4294967295, %v47_v15  ;;  %vm146_vm2 = vcmp.ge.s32.totalorder %v2560_v18, 0  ;;  %vm150_vm3 = vcmp.lt.s32.totalorder %v2560_v18, 16 }
   0xc   :  { %v2589_v30 = vadd.s32 1, %v47_v15  ;;  %vm2591_vm8 = vmand %vm146_vm2, %vm150_vm3  ;;  %v50_v32 = vadd.s32 4294967295, %v2560_v18  ;;  %v2597_v34 = vand.u32 15, %v40_v25  ;;  %vm4412_vm13 = vcmp.ge.s32.totalorder %v2587_v29, 0 }
   0xd   :  { %vm147_vm0 = vcmp.ge.s32.totalorder %v2555_v16, 0  ;;  %vm151_vm1 = vcmp.lt.s32.totalorder %v2555_v16, 16  ;;  %v51_v23 = vadd.s32 4294967295, %v2555_v16  ;;  %vm4408_vm4 = vcmp.ge.s32.totalorder %v2566_v21, 0  ;;  %vm158_vm3 = vmand %vm2591_vm8, %vm4412_vm13 }
   0xe   :  { %264 = vrot.lane.b32.xlu1 %v2466_v1, %s2395_s0  ;;  %262 = vrot.lane.b32.xlu0 %v2458_v0, %s2395_s0  ;;  %vm2581_vm5 = vmand %vm147_vm0, %vm151_vm1  ;;  %vm4409_vm15 = vcmp.lt.s32.totalorder %v2589_v30, 16  ;;  %vm54_vm0 = vcmp.ge.s32.totalorder %v50_v32, 0  ;;  %vm58_vm1 = vcmp.lt.s32.totalorder %v50_v32, 16  ;;  %v2621_v39 = vand.u32 15, %v41_v33 }
   0xf   :  { %vm55_vm6 = vcmp.ge.s32.totalorder %v51_v23, 0  ;;  %vm59_vm7 = vcmp.lt.s32.totalorder %v51_v23, 16  ;;  %vm159_vm9 = vmand %vm2581_vm5, %vm4408_vm4  ;;  %v52_v40 = vadd.s32 4294967295, %v2597_v34  ;;  %v2658_v50 = vadd.s32 1, %v46_v22 }
  0x10   :  { %vm2604_vm11 = vmand %vm55_vm6, %vm59_vm7  ;;  %v2625_v41 = vsel %vm159_vm9, 1.0, %v4420_v3  ;;  %vm4411_vm9 = vcmp.lt.s32.totalorder %v2551_v11, 15  ;;  %v2669_v54 = vsel %vm158_vm3, 1.0, %v4420_v3  ;;  %v53_v56 = vadd.s32 4294967295, %v2621_v39 }
  0x11   :  { %vm75_vm2 = vmand %vm2604_vm11, %vm4408_vm4  ;;  %v2634_v43 = vsel %vm2604_vm11, 1.0, %v4420_v3  ;;  %vm60_vm4 = vcmp.lt.s32.totalorder %v52_v40, 16  ;;  %4508 = vst [vmem:[#allocation5_spill] sm:$0xff] %v2669_v54  ;;  %v2677_v57 = vadd.s32 4294967295, %v48_v38  ;;  %v2682_v61 = vadd.s32 4294967295, %v49_v47 }
  0x12   :  { %298 = vrot.lane.b32.xlu1 %v2466_v1, %s2396_s15  ;;  %296 = vrot.lane.b32.xlu0 %v2458_v0, %s2396_s15  ;;  %vm135_vm6 = vmand %vm2604_vm11, %vm4409_vm15  ;;  %v2652_v48 = vsel %vm75_vm2, 1.0, %v4420_v3  ;;  %vm56_vm2 = vcmp.ge.s32.totalorder %v52_v40, 0  ;;  %vm4415_vm15 = vcmp.lt.s32.totalorder %v2658_v50, 16  ;;  %vm153_vm7 = vcmp.lt.s32.totalorder %v2621_v39, 16 }
  0x13   :  { %vm2664_vm11 = vmand %vm54_vm0, %vm58_vm1  ;;  %v2672_v55 = vsel %vm135_vm6, 1.0, %v4420_v3  ;;  %vm148_vm0 = vcmp.ge.s32.totalorder %v2597_v34, 0  ;;  %vm152_vm1 = vcmp.lt.s32.totalorder %v2597_v34, 16  ;;  %vm4417_vm6 = vcmp.ge.s32.totalorder %v2677_v57, 0 }
  0x14   :  { %v2689_v62 = vsel %vm2664_vm11, 1.0, %v4420_v3  ;;  %vm2694_vm3 = vmand %vm56_vm2, %vm60_vm4  ;;  %vm61_vm2 = vcmp.lt.s32.totalorder %v53_v56, 16  ;;  %v191_v25 = vadd.s32 1, %v2555_v16  ;;  %v2757_v40 = vadd.s32 1, %v48_v38 }
  0x15   :  { %vm134_vm4 = vmand %vm2664_vm11, %vm4415_vm15  ;;  %v2780_v38 = vsel %vm2694_vm3, 1.0, %v4420_v3 }
  0x16   :  { %283 = vrot.lane.b32.xlu1 %v2471_v2, %s2393_s12  ;;  %268 = vrot.lane.b32.xlu0 %v2481_v4, %s2395_s0 }
  0x1a   :  { %317 = vrot.lane.b32.xlu1 %v2471_v2, %s2392_s11  ;;  %302 = vrot.lane.b32.xlu0 %v2481_v4, %s2396_s15 }
  0x1e   :  { %334 = vrot.lane.b32.xlu1 %v2471_v2, %s2397_s16  ;;  %332 = vrot.lane.b32.xlu0 %v2466_v1, %s2397_s16 }
  0x22   :  { %368 = vrot.lane.b32.xlu1 %v2471_v2, %s2398_s17  ;;  %366 = vrot.lane.b32.xlu0 %v2466_v1, %s2398_s17 }
  0x26   :  { %300 = vrot.lane.b32.xlu1 %v2471_v2, %s2396_s15  ;;  %266 = vrot.lane.b32.xlu0 %v2471_v2, %s2395_s0 }
  0x2a   :  { %364 = vrot.lane.b32.xlu1 %v2458_v0, %s2398_s17  ;;  %330 = vrot.lane.b32.xlu0 %v2458_v0, %s2397_s16 }
  0x2e   :  { %351 = vrot.lane.b32.xlu1 %v2471_v2, %s2399_s18  ;;  %349 = vrot.lane.b32.xlu0 %v2466_v1, %s2399_s18 }
  0x32   :  { %347 = vrot.lane.b32.xlu1 %v2458_v0, %s2399_s18  ;;  %336 = vrot.lane.b32.xlu0 %v2481_v4, %s2397_s16 }
  0x36   :  { %353 = vrot.lane.b32.xlu1 %v2481_v4, %s2399_s18  ;;  %370 = vrot.lane.b32.xlu0 %v2481_v4, %s2398_s17 }
  0x3a   :  { %385 = vrot.lane.b32.xlu1 %v2471_v2, %s2400_s19  ;;  %383 = vrot.lane.b32.xlu0 %v2466_v1, %s2400_s19 }
  0x3e   :  { %387 = vrot.lane.b32.xlu1 %v2481_v4, %s2400_s19  ;;  %381 = vrot.lane.b32.xlu0 %v2458_v0, %s2400_s19 }
  0x42   :  { %473 = vperm.xlu0 %2348, %v467_v5   ;;  %478 = vperm.xlu1 %2349, %v468_v6  }
  0x46   :  { %488 = vperm.xlu0 %2348, %v470_v8   ;;  %483 = vperm.xlu1 %2349, %v469_v9  }
  0x74   :  { %v2562_v19 = vpop.permute.xlu1 %313  ;;  %v2564_v20 = vpop.permute.xlu0 %279 }
  0x78   :  { %v2578_v26 = vpop.permute.xlu1 %315  ;;  %v2585_v28 = vpop.permute.xlu0 %281 }
  0x79   :  { %v324_v42 = vsel %vm4413_vm10, %v2562_v19, %v2578_v26  ;;  %v290_v44 = vsel %vm4414_vm12, %v2564_v20, %v2585_v28 }
  0x7a   :  { %v327_v51 = vmul.f32 %v2625_v41, %v324_v42  ;;  %v293_v52 = vmul.f32 %v2634_v43, %v290_v44  ;;  %v2768_v42 = vsel %vm134_vm4, 1.0, %v4420_v3  ;;  %v2770_v44 = vadd.s32 1, %v49_v47 }
  0x7b   :  { %vm195_vm4 = vcmp.ge.s32.totalorder %v191_v25, 0 }
  0x7c   :  { %v2609_v36 = vpop.permute.xlu1 %319  ;;  %v2612_v37 = vpop.permute.xlu0 %285  ;;  %v415_v6 = vrot.slane %v327_v51, 4  ;;  %v403_v7 = vrot.slane %v293_v52, 4  ;;  %vm4418_vm15 = vcmp.lt.s32.totalorder %v2770_v44, 16 }
  0x7d   :  { %v325_v9 = vsel %vm4413_vm10, %v2609_v36, %v2562_v19  ;;  %v291_v10 = vsel %vm4414_vm12, %v2612_v37, %v2564_v20  ;;  %vm4416_vm12 = vcmp.ge.s32.totalorder %v2682_v61, 0 }
  0x7e   :  { %v326_v32 = vmul.f32 %v2669_v54, %v325_v9  ;;  %v292_v33 = vmul.f32 %v2689_v62, %v291_v10 }
  0x80   :  { %v2644_v45 = vpop.permute.xlu1 %264  ;;  %v263_v46 = vpop.permute.xlu0 %262  ;;  %v414_v47 = vrot.slane %v326_v32, 4  ;;  %v402_v52 = vrot.slane %v292_v33, 4 }
  0x81   :  { %v273_v49 = vsel %vm4410_vm14, %v263_v46, %v2644_v45  ;;  %vm74_vm14 = vmand %vm2664_vm11, %vm4412_vm13  ;;  %vm4513_vm13 = vcmask 1043456  }
  0x82   :  { %v276_v58 = vmul.f32 %v2652_v48, %v273_v49  ;;  %vm4514_vm10 = vmmov %vm4513_vm13  ;;  %v2733_v20 = vsel %vm74_vm14, 1.0, %v4420_v3  ;;  %vm4519_vm14 = vcmp.ge.s32.totalorder %v53_v56, 0 }
  0x83   :  { %vm2751_vm11 = vmand %vm4519_vm14, %vm61_vm2  ;;  %vm4524_vm2 = vcmp.lt.s32.totalorder %v2551_v11, 15  ;;  %vm4527_vm14 = vcmp.lt.s32.totalorder %v2589_v30, 16 }
  0x84   :  { %v2680_v59 = vpop.permute.xlu1 %298  ;;  %v297_v60 = vpop.permute.xlu0 %296  ;;  %v448_v15 = vsel %vm4513_vm13, %v276_v58, %v403_v7  ;;  %v2789_v56 = vsel %vm2751_vm11, 1.0, %v4420_v3 }
  0x85   :  { %v307_v63 = vsel %vm4411_vm9, %v297_v60, %v2680_v59  ;;  %vm2718_vm9 = vmand %vm148_vm0, %vm152_vm1  ;;  %vm4515_vm0 = vcmp.lt.s32.totalorder %v2551_v11, 17 }
  0x86   :  { %v310_v8 = vmul.f32 %v2672_v55, %v307_v63 }
  0x88   :  { %v284_v13 = vpop.permute.xlu1 %283  ;;  %v2722_v14 = vpop.permute.xlu0 %268  ;;  %v452_v19 = vsel %vm4514_vm10, %v310_v8, %v415_v6  ;;  %vm4516_vm10 = vcmp.ge.s32.totalorder %v2621_v39, 0 }
  0x89   :  { %v274_v22 = vsel %vm4515_vm0, %v2722_v14, %v263_v46  ;;  %v2143_v23 = vpack.c.bf16 %v452_v19, %v448_v15  ;;  %vm2742_vm13 = vmand %vm4516_vm10, %vm153_vm7  ;;  %vm199_vm0 = vcmp.lt.s32.totalorder %v191_v25, 16  ;;  %vm4419_vm10 = vcmp.lt.s32.totalorder %v2757_v40, 16 }
  0x8a   :  { %vm2763_vm7 = vmand %vm2718_vm9, %vm4417_vm6  ;;  %v275_v46 = vmul.f32 %v2733_v20, %v274_v22  ;;  %v190_v15 = vadd.s32 1, %v2560_v18 }
  0x8b   :  { %2144 = vmatprep.subr.bf16.mxu0 %v2143_v23  ;;  %vm161_vm1 = vmand %vm2742_vm13, %vm4416_vm12  ;;  %v2794_v58 = vsel %vm2763_vm7, 1.0, %v4420_v3  ;;  %vm4530_vm12 = vcmp.lt.s32.totalorder %v2551_v11, 16  ;;  %vm4531_vm7 = vcmask 1043456  }
  0x8c   :  { %v318_v49 = vpop.permute.xlu1 %317  ;;  %v303_v17 = vpop.permute.xlu0 %302  ;;  %4525 = vst [vmem:[#allocation6_spill] sm:$0xff] %v2794_v58  ;;  %v289_v6 = vsel %vm4530_vm12, %v2585_v28, %v284_v13  ;;  %v447_v9 = vsel %vm4531_vm7, %v275_v46, %v402_v52 }
  0x8d   :  { %v308_v51 = vsel %vm4524_vm2, %v303_v17, %v297_v60  ;;  %v2797_v60 = vsel %vm161_vm1, 1.0, %v4420_v3  ;;  %vm2803_vm2 = vmand %vm2581_vm5, %vm4527_vm14 }
  0x8e   :  { %v309_v53 = vmul.f32 %v2768_v42, %v308_v51  ;;  %4526 = vst [vmem:[#allocation7_spill] sm:$0xff] %v2797_v60  ;;  %vm4532_vm1 = vmmov %vm4531_vm7  ;;  %v2870_v5 = vsel %vm2803_vm2, 1.0, %v4420_v3  ;;  %vm4547_vm2 = vcmp.lt.s32.totalorder %v2551_v11, 15 }
  0x8f   :  { %vm2819_vm5 = vmand %vm195_vm4, %vm199_vm0  ;;  %4545 = vst [vmem:[#allocation8_spill] sm:$0xff] %v2870_v5 }
  0x90   :  { %v2811_v7 = vpop.permute.xlu1 %334  ;;  %v2813_v8 = vpop.permute.xlu0 %332  ;;  %v451_v10 = vsel %vm4532_vm1, %v309_v53, %v414_v47  ;;  %vm4535_vm14 = vmmov %vm4530_vm12  ;;  %vm4536_vm12 = vcmp.lt.s32.totalorder %v2551_v11, 1  ;;  %v2877_v46 = vsel %vm2819_vm5, 1.0, %v4420_v3  ;;  %v192_v53 = vadd.s32 1, %v2597_v34 }
  0x91   :  { %v288_v28 = vsel %vm4535_vm14, %v284_v13, %v2612_v37  ;;  %v322_v19 = vsel %vm4536_vm12, %v318_v49, %v2609_v36  ;;  %vm4537_vm7 = vmmov %vm4536_vm12  ;;  %v2145_v23 = vpack.c.bf16 %v451_v10, %v447_v9  ;;  %v294_v36 = vmul.f32 %v2780_v38, %v289_v6  ;;  %4546 = vst [vmem:[#allocation9_spill] sm:$0xff] %v2877_v46 }
  0x92   :  { %v323_v22 = vsel %vm4537_vm7, %v2578_v26, %v318_v49  ;;  %vm2837_vm4 = vmand %vm2694_vm3, %vm4419_vm10  ;;  %v295_v37 = vmul.f32 %v2789_v56, %v288_v28  ;;  %v329_v32 = vmul.f32 %v2797_v60, %v322_v19  ;;  %vm4544_vm14 = vcmp.ge.s32.totalorder %v2682_v61, 0 }
  0x93   :  { %vm2845_vm0 = vmand %vm2751_vm11, %vm4418_vm15  ;;  %2146 = vmatpush1.bf16.msra.mxu0 %v2145_v23  ;;  %v328_v13 = vmul.f32 %v2794_v58, %v323_v22  ;;  %vm372_vm7 = vcmp.lt.s32.totalorder %v2551_v11, 112  ;;  %v2882_v35 = vsel %vm2837_vm4, 1.0, %v4420_v3  ;;  %v404_v51 = vrot.slane %v294_v36, 4 }
  0x94   :  { %vm2854_vm1 = vmand %vm2694_vm3, %vm4417_vm6  ;;  %v2861_v33 = vpop.permute.xlu1 %368  ;;  %v367_v16 = vpop.permute.xlu0 %366  ;;  %vm338_vm3 = vcmp.lt.s32.totalorder %v2551_v11, 127  ;;  %vm194_vm6 = vcmp.ge.s32.totalorder %v190_v15, 0  ;;  %v2887_v49 = vsel %vm2845_vm0, 1.0, %v4420_v3  ;;  %v405_v63 = vrot.slane %v295_v37, 4 }
  0x95   :  { %vm77_vm12 = vmand %vm2751_vm11, %vm4544_vm14  ;;  %vm198_vm11 = vcmp.lt.s32.totalorder %v190_v15, 16  ;;  %v2892_v47 = vsel %vm2854_vm1, 1.0, %v4420_v3  ;;  %v416_v6 = vrot.slane %v328_v13, 4  ;;  %v417_v9 = vrot.slane %v329_v32, 4 }
  0x96   :  { %v2895_v52 = vsel %vm77_vm12, 1.0, %v4420_v3  ;;  %v340_v10 = vsel %vm338_vm3, %v2813_v8, %v2811_v7  ;;  %vm4548_vm4 = vmmov %vm4547_vm2  ;;  %vm4549_vm0 = vcmp.lt.s32.totalorder %v2551_v11, 17  ;;  %vm4553_vm12 = vcmp.lt.s32.totalorder %v2658_v50, 16 }
  0x97   :  { %vm4550_vm1 = vmmov %vm4549_vm0  ;;  %v193_v37 = vadd.s32 1, %v2621_v39 }
  0x98   :  { %v301_v28 = vpop.permute.xlu1 %300  ;;  %v267_v19 = vpop.permute.xlu0 %266  ;;  %vm2919_vm14 = vmand %vm194_vm6, %vm198_vm11  ;;  %vm4554_vm6 = vcmask 1043456  }
  0x99   :  { %v305_v22 = vsel %vm4547_vm2, %v301_v28, %v303_v17  ;;  %v306_v23 = vsel %vm4548_vm4, %v2680_v59, %v301_v28  ;;  %v271_v34 = vsel %vm4549_vm0, %v267_v19, %v2722_v14  ;;  %v272_v25 = vsel %vm4550_vm1, %v2644_v45, %v267_v19  ;;  %vm178_vm2 = vmand %vm2591_vm8, %vm4553_vm12 }
  0x9a   :  { %v311_v18 = vmul.f32 %v2882_v35, %v306_v23  ;;  %v312_v36 = vmul.f32 %v2887_v49, %v305_v22  ;;  %v277_v26 = vmul.f32 %v2892_v47, %v272_v25  ;;  %v278_v17 = vmul.f32 %v2895_v52, %v271_v34  ;;  %vm4555_vm11 = vmmov %vm4554_vm6 }
  0x9b   :  { %v344_v14 = vmul.f32 %v2870_v5, %v340_v10  ;;  %v374_v45 = vsel %vm372_vm7, %v367_v16, %v2861_v33  ;;  %vm355_vm4 = vcmp.lt.s32.totalorder %v2551_v11, 113  ;;  %vm4556_vm0 = vcmp.ge.s32.totalorder %v2566_v21, 0  ;;  %vm4557_vm15 = vmmov %vm4554_vm6 }
  0x9c   :  { %v2933_v15 = vpop.permute.xlu1 %364  ;;  %v331_v13 = vpop.permute.xlu0 %330  ;;  %v450_v32 = vsel %vm4554_vm6, %v278_v17, %v405_v63  ;;  %v454_v10 = vsel %vm4555_vm11, %v312_v36, %v417_v9  ;;  %vm207_vm1 = vmand %vm2819_vm5, %vm4556_vm0  ;;  %v449_v28 = vsel %vm4557_vm15, %v277_v26, %v404_v51  ;;  %v2946_v39 = vsel %vm2919_vm14, 1.0, %v4420_v3 }
  0x9d   :  { %vm4558_vm10 = vmmov %vm4554_vm6  ;;  %4559 = vst [vmem:[#allocation10_spill] sm:$0xff] %v2946_v39  ;;  %v375_v63 = vsel %vm372_vm7, %v2933_v15, %v367_v16  ;;  %v2151_v19 = vpack.c.bf16 %v454_v10, %v450_v32  ;;  %v378_v21 = vmul.f32 %v2877_v46, %v374_v45  ;;  %v2953_v22 = vsel %vm178_vm2, 1.0, %v4420_v3 }
  0x9e   :  { %v453_v31 = vsel %vm4558_vm10, %v311_v18, %v416_v6  ;;  %4560 = vst [vmem:[#allocation11_spill] sm:$0xff] %v2953_v22  ;;  %vm4561_vm8 = vcmp.ge.s32.totalorder %v2587_v29, 0  ;;  %vm196_vm10 = vcmp.ge.s32.totalorder %v192_v53, 0  ;;  %vm200_vm12 = vcmp.lt.s32.totalorder %v192_v53, 16 }
  0x9f   :  { %v2153_v9 = vpack.c.bf16 %v453_v31, %v449_v28  ;;  %vm2959_vm15 = vmand %vm2919_vm14, %vm4561_vm8  ;;  %v341_v16 = vsel %vm338_vm3, %v331_v13, %v2813_v8  ;;  %2152 = vmatprep.subr.bf16.mxu1 %v2151_v19  ;;  %v2967_v6 = vsel %vm207_vm1, 1.0, %v4420_v3  ;;  %vm4565_vm2 = vcmp.lt.s32.totalorder %v2757_v40, 16 }
  0xa0   :  { %4564 = vst [vmem:[#allocation12_spill] sm:$0xff] %v2967_v6  ;;  %vm2973_vm6 = vmand %vm2718_vm9, %vm4565_vm2  ;;  %vm197_vm11 = vcmp.ge.s32.totalorder %v193_v37, 0  ;;  %vm201_vm0 = vcmp.lt.s32.totalorder %v193_v37, 16  ;;  %v427_v23 = vrot.slane %v344_v14, 4  ;;  %v377_v34 = vmul.f32 %v2946_v39, %v375_v63  ;;  %v352_v25 = vpop.permute.xlu1 %351  ;;  %v350_v18 = vpop.permute.xlu0 %349 }
  0xa1   :  { %2154 = vmatpush1.bf16.msra.mxu1 %v2153_v9  ;;  %vm4568_vm8 = vcmp.lt.s32.totalorder %v2770_v44, 16  ;;  %v357_v12 = vsel %vm355_vm4, %v350_v18, %v352_v25  ;;  %vm2985_vm9 = vmand %vm196_vm10, %vm200_vm12  ;;  %v439_v36 = vrot.slane %v378_v21, 4  ;;  %v343_v26 = vmul.f32 %v2953_v22, %v341_v16 }
  0xa2   :  { %vm181_vm1 = vmand %vm2742_vm13, %vm4568_vm8  ;;  %v361_v17 = vmul.f32 %v2967_v6, %v357_v12  ;;  %v2998_v24 = vsel %vm2959_vm15, 1.0, %v4420_v3  ;;  %v3003_v53 = vsel %vm2973_vm6, 1.0, %v4420_v3  ;;  %v438_v37 = vrot.slane %v377_v34, 4 }
  0xa3   :  { %vm2991_vm2 = vmand %vm197_vm11, %vm201_vm0  ;;  %4573 = vst [vmem:[#allocation13_spill] sm:$0xff] %v2998_v24  ;;  %v3006_v45 = vsel %vm181_vm1, 1.0, %v4420_v3  ;;  %vm4576_vm13 = vcmask 1043456   ;;  %vm4578_vm12 = vcmp.ge.s32.totalorder %v2677_v57, 0  ;;  %vm4579_vm6 = vcmp.ge.s32.totalorder %v2682_v61, 0 }
  0xa4   :  { %4574 = vst [vmem:[#allocation14_spill] sm:$0xff] %v3003_v53  ;;  %4575 = vst [vmem:[#allocation15_spill] sm:$0xff] %v3006_v45  ;;  %v348_v32 = vpop.permute.xlu1 %347  ;;  %v337_v10 = vpop.permute.xlu0 %336  ;;  %v456_v28 = vsel %vm4576_vm13, %v2466_v1, %v427_v23  ;;  %v426_v1 = vrot.slane %v343_v26, 4  ;;  %v3040_v61 = vsel %vm2991_vm2, 1.0, %v4420_v3  ;;  %vm4585_vm8 = vcmp.lt.s32.totalorder %v2589_v30, 16 }
  0xa5   :  { %vm4577_vm10 = vmmov %vm4576_vm13  ;;  %v358_v63 = vsel %vm355_vm4, %v348_v32, %v350_v18  ;;  %v339_v19 = vsel %vm338_vm3, %v2811_v7, %v337_v10  ;;  %v342_v9 = vsel %vm338_vm3, %v337_v10, %v331_v13  ;;  %v3035_v7 = vsel %vm2985_vm9, 1.0, %v4420_v3  ;;  %4582 = vst [vmem:[#allocation18_spill] sm:$0xff] %v3040_v61 }
  0xa6   :  { %v460_v31 = vsel %vm4577_vm10, %v361_v17, %v439_v36  ;;  %vm208_vm15 = vmand %vm2985_vm9, %vm4578_vm12  ;;  %v360_v57 = vmul.f32 %v2998_v24, %v358_v63  ;;  %v345_v51 = vmul.f32 %v3003_v53, %v339_v19  ;;  %v346_v16 = vmul.f32 %v3006_v45, %v342_v9  ;;  %4581 = vst [vmem:[#allocation17_spill] sm:$0xff] %v3035_v7 }
  0xa7   :  { %v2147_v21 = vpack.c.bf16 %v460_v31, %v456_v28  ;;  %vm209_vm11 = vmand %vm2991_vm2, %vm4579_vm6  ;;  %v3030_v29 = vsel %vm208_vm15, 1.0, %v4420_v3  ;;  %vm389_vm13 = vcmp.lt.s32.totalorder %v2551_v11, 111  ;;  %vm4591_vm15 = vcmp.lt.s32.totalorder %v2770_v44, 16 }
  0xa8   :  { %4580 = vst [vmem:[#allocation16_spill] sm:$0xff] %v3030_v29  ;;  %v429_v13 = vrot.slane %v346_v16, 4  ;;  %v354_v23 = vpop.permute.xlu1 %353  ;;  %v3043_v34 = vsel %vm209_vm11, 1.0, %v4420_v3  ;;  %v371_v18 = vpop.permute.xlu0 %370  ;;  %vm4584_vm0 = vmmov %vm4577_vm10  ;;  %v428_v30 = vrot.slane %v345_v51, 4  ;;  %vm4588_vm10 = vcmp.lt.s32.totalorder %v2658_v50, 16 }
  0xa9   :  { %2148 = vmatprep.subr.bf16.mxu0 %v2147_v21  ;;  %4583 = vst [vmem:[#allocation19_spill] sm:$0xff] %v3043_v34  ;;  %v459_v12 = vsel %vm4584_vm0, %v360_v57, %v438_v37  ;;  %vm243_vm1 = vmand %vm2819_vm5, %vm4585_vm8  ;;  %v356_v36 = vsel %vm355_vm4, %v352_v25, %v354_v23  ;;  %v359_v26 = vsel %vm355_vm4, %v354_v23, %v348_v32  ;;  %vm4593_vm11 = vcmp.lt.s32.totalorder %v2757_v40, 16 }
  0xaa   :  { %v373_v17 = vsel %vm372_vm7, %v2861_v33, %v371_v18  ;;  %v376_v37 = vsel %vm372_vm7, %v371_v18, %v2933_v15  ;;  %vm4586_vm5 = vmmov %vm4584_vm0  ;;  %v3066_v31 = vsel %vm243_vm1, 1.0, %v4420_v3  ;;  %v362_v15 = vmul.f32 %v3030_v29, %v356_v36 }
  0xab   :  { %v379_v27 = vmul.f32 %v3035_v7, %v373_v17  ;;  %v380_v10 = vmul.f32 %v3040_v61, %v376_v37  ;;  %v455_v28 = vsel %vm4586_vm5, %v2458_v0, %v426_v1  ;;  %4587 = vst [vmem:[#allocation20_spill] sm:$0xff] %v3066_v31  ;;  %vm3072_vm12 = vmand %vm2919_vm14, %vm4588_vm10  ;;  %v363_v32 = vmul.f32 %v3043_v34, %v359_v26  ;;  %v463_v26 = vld [vmem:[%s4399_s1] sm:$0xff]  ;;  %v464_v37 = vld [vmem:[%s4399_s1 + $0x8] sm:$0xff] }
  0xac   :  { %v2149_v25 = vpack.c.bf16 %v459_v12, %v455_v28  ;;  %v386_v9 = vpop.permute.xlu1 %385  ;;  %v384_v0 = vpop.permute.xlu0 %383  ;;  %vm245_vm6 = vmand %vm2991_vm2, %vm4591_vm15  ;;  %v3098_v57 = vsel %vm3072_vm12, 1.0, %v4420_v3 }
  0xad   :  { %v440_v63 = vrot.slane %v379_v27, 4  ;;  %v441_v19 = vrot.slane %v380_v10, 4  ;;  %v391_v50 = vsel %vm389_vm13, %v384_v0, %v386_v9  ;;  %vm4592_vm14 = vmmov %vm4584_vm0  ;;  %4597 = vst [vmem:[#allocation21_spill] sm:$0xff] %v3098_v57  ;;  %v466_v27 = vld [vmem:[%s4399_s1 + $0x18] sm:$0xff] }
  0xae   :  { %2150 = vmatpush1.bf16.msra.mxu0 %v2149_v25  ;;  %v458_v59 = vsel %vm4592_vm14, %v2481_v4, %v429_v13  ;;  %v395_v21 = vmul.f32 %v3066_v31, %v391_v50  ;;  %vm244_vm0 = vmand %vm2985_vm9, %vm4593_vm11  ;;  %v3101_v4 = vsel %vm245_vm6, 1.0, %v4420_v3 }
  0xaf   :  { %vm4594_vm8 = vmmov %vm4586_vm5  ;;  %4598 = vst [vmem:[#allocation22_spill] sm:$0xff] %v3101_v4  ;;  %v3105_v13 = vsel %vm244_vm0, 1.0, %v4420_v3 }
  0xb0   :  { %v462_v1 = vsel %vm4594_vm8, %v363_v32, %v441_v19  ;;  %vm4595_vm1 = vmmov %vm4586_vm5  ;;  %v388_v16 = vpop.permute.xlu1 %387  ;;  %v382_v8 = vpop.permute.xlu0 %381  ;;  %4600 = vst [vmem:[#allocation23_spill] sm:$0xff] %v3105_v13  ;;  %vm491_vm5 = vcmask 293888  }
  0xb1   :  { %v457_v44 = vsel %vm4595_vm1, %v2471_v2, %v428_v30  ;;  %vm4596_vm2 = vmmov %vm4595_vm1  ;;  %v2155_v51 = vpack.c.bf16 %v462_v1, %v458_v59  ;;  %v390_v2 = vsel %vm389_vm13, %v386_v9, %v388_v16  ;;  %v392_v23 = vsel %vm389_vm13, %v382_v8, %v384_v0  ;;  %v465_v30 = vld [vmem:[%s4399_s1 + $0x10] sm:$0xff] }
  0xb2   :  { %v461_v14 = vsel %vm4596_vm2, %v362_v15, %v440_v63  ;;  %vm4599_vm9 = vmmov %vm4595_vm1  ;;  %v393_v18 = vsel %vm389_vm13, %v388_v16, %v382_v8  ;;  %v394_v12 = vmul.f32 %v3098_v57, %v392_v23  ;;  %v396_v17 = vmul.f32 %v3105_v13, %v390_v2 }
  0xb3   :  { %v2157_v40 = vpack.c.bf16 %v461_v14, %v457_v44  ;;  %2123 = vmatprep.subr.msk.mxu0 %vm4599_vm9, %v395_v21  ;;  %2156 = vmatprep.subr.bf16.mxu1 %v2155_v51  ;;  %v397_v36 = vmul.f32 %v3101_v4, %v393_v18  ;;  %vm4601_vm10 = vmmov %vm4595_vm1 }
  0xb4   :  { %2124 = vmatpush1.msk.msra.mxu0 %vm4601_vm10, %v394_v12  ;;  %vm4602_vm12 = vmmov %vm4595_vm1 }
  0xb5   :  { %2158 = vmatpush1.bf16.msra.mxu1 %v2157_v40  ;;  %2125 = vmatmul.mubr.msk.f32.vlgmr.msra.gmra.mrb[0].mxu0 %vm491_vm5, %v463_v26  ;;  %vm4603_vm15 = vmmov %vm4595_vm1 }
  0xb6   :  { %2129 = vmatprep.subr.msk.mxu1 %vm4602_vm12, %v397_v36  ;;  %586 = vmatprep.mubr.f32.mxu0 %v4420_v3 }
  0xb9   :  { %2130 = vmatpush1.msk.msra.mxu1 %vm4603_vm15, %v396_v17  ;;  %2126 = vmatmul.mubr.msk.f32.gmra.mrb[2].mxu0 %vm491_vm5, %v464_v37 }
  0xba   :  { %2131 = vmatmul.mubr.msk.f32.vlgmr.msra.gmra.mrb[0].mxu1 %vm491_vm5, %v463_v26  ;;  %592 = vmatprep.mubr.f32.mxu0 %v4420_v3 }
  0xbb   :  { %675 = vmatprep.mubr.f32.mxu1 %v4420_v3 }
  0xbd   :  { %2127 = vmatmul.mubr.msk.f32.gmra.mrb[4].mxu0 %vm491_vm5, %v465_v30 }
  0xbe   :  { %2132 = vmatmul.mubr.msk.f32.gmra.mrb[2].mxu1 %vm491_vm5, %v464_v37  ;;  %598 = vmatprep.mubr.f32.mxu0 %v4420_v3 }
  0xbf   :  { %681 = vmatprep.mubr.f32.mxu1 %v4420_v3 }
  0xc1   :  { %2128 = vmatmul.mubr.msk.f32.gmra.mrb[6].mxu0 %vm491_vm5, %v466_v27  ;;  %v474_v10 = vpop.permute.xlu0 %473  ;;  %v479_v25 = vpop.permute.xlu1 %478 }
  0xc2   :  { %2133 = vmatmul.mubr.msk.f32.gmra.mrb[4].mxu1 %vm491_vm5, %v465_v30 }
  0xc3   :  { %687 = vmatprep.mubr.f32.mxu1 %v4420_v3 }
  0xc5   :  { %v484_v8 = vpop.permute.xlu1 %483 }
  0xc6   :  { %2134 = vmatmul.mubr.msk.f32.gmra.mrb[6].mxu1 %vm491_vm5, %v466_v27  ;;  %vm4612_vm5 = vcmp.lt.s32.totalorder %v2551_v11, 17 }
  0xc7   :  { %vm4613_vm10 = vmmov %vm4612_vm5 }
  0xc8   :  { %vm4614_vm15 = vmmov %vm4612_vm5 }
 0x188   :  { %v582_v28 = vpop.f32.mrb[0].mxu0 }
 0x189   :  { %v3145_v33 = vadd.f32 %v582_v28, %v474_v10  ;;  %v584_v15 = vpop.f32.mrb[1].mxu0 }
 0x18a   :  { %v3147_v32 = vadd.f32 %v584_v15, %v474_v10 }
 0x18b   :  { %v718_v19 = vmul.f32 %v3145_v33, %v3145_v33 }
 0x18c   :  { %v694_v50 = vadd.f32 %v3147_v32, %v3145_v33  ;;  %v719_v59 = vmul.f32 %v3147_v32, %v3147_v32  ;;  %v588_v1 = vpop.f32.mrb[2].mxu0 }
 0x18d   :  { %v671_v63 = vpop.f32.mrb[0].mxu1  ;;  %v3161_v14 = vadd.f32 %v588_v1, %v479_v25  ;;  %v590_v51 = vpop.f32.mrb[3].mxu0 }
 0x18e   :  { %v3151_v9 = vadd.f32 %v671_v63, %v474_v10  ;;  %v673_v0 = vpop.f32.mrb[1].mxu1  ;;  %v3163_v40 = vadd.f32 %v590_v51, %v479_v25  ;;  %v734_v23 = vadd.f32 %v719_v59, %v718_v19 }
 0x18f   :  { %v3157_v21 = vadd.f32 %v673_v0, %v474_v10  ;;  %v722_v18 = vmul.f32 %v3161_v14, %v3161_v14 }
 0x190   :  { %v720_v44 = vmul.f32 %v3151_v9, %v3151_v9  ;;  %v695_v2 = vadd.f32 %v694_v50, %v3151_v9  ;;  %v699_v26 = vadd.f32 %v3163_v40, %v3161_v14  ;;  %v723_v17 = vmul.f32 %v3163_v40, %v3163_v40  ;;  %v594_v37 = vpop.f32.mrb[4].mxu0 }
 0x191   :  { %v677_v16 = vpop.f32.mrb[2].mxu1  ;;  %v721_v27 = vmul.f32 %v3157_v21, %v3157_v21  ;;  %v3181_v15 = vadd.f32 %v594_v37, %v484_v8  ;;  %v596_v63 = vpop.f32.mrb[5].mxu0 }
 0x192   :  { %v3168_v12 = vadd.f32 %v677_v16, %v479_v25  ;;  %v679_v36 = vpop.f32.mrb[3].mxu1  ;;  %v696_v30 = vadd.f32 %v695_v2, %v3157_v21  ;;  %v735_v19 = vadd.f32 %v734_v23, %v720_v44  ;;  %v3183_v0 = vadd.f32 %v596_v63, %v484_v8 }
 0x193   :  { %v3179_v28 = vadd.f32 %v679_v36, %v479_v25  ;;  %v739_v1 = vadd.f32 %v723_v17, %v722_v18  ;;  %v726_v51 = vmul.f32 %v3181_v15, %v3181_v15  ;;  %v489_v25 = vpop.permute.xlu0 %488 }
 0x194   :  { %v724_v10 = vmul.f32 %v3168_v12, %v3168_v12  ;;  %697 = vadd.xlane.f32.xlu1 %v696_v30  ;;  %v700_v59 = vadd.f32 %v699_v26, %v3168_v12  ;;  %v736_v3 = vadd.f32 %v735_v19, %v721_v27  ;;  %v704_v36 = vadd.f32 %v3183_v0, %v3181_v15  ;;  %v600_v23 = vpop.f32.mrb[6].mxu0 }
 0x195   :  { %v683_v50 = vpop.f32.mrb[4].mxu1  ;;  %v727_v44 = vmul.f32 %v3183_v0, %v3183_v0  ;;  %v3194_v37 = vadd.f32 %v600_v23, %v489_v25  ;;  %v602_v26 = vpop.f32.mrb[7].mxu0  ;;  %v725_v18 = vmul.f32 %v3179_v28, %v3179_v28 }
 0x196   :  { %v3188_v16 = vadd.f32 %v683_v50, %v484_v8  ;;  %v685_v2 = vpop.f32.mrb[5].mxu1  ;;  %737 = vadd.xlane.f32.xlu0 %v736_v3  ;;  %v740_v17 = vadd.f32 %v739_v1, %v724_v10  ;;  %v3200_v27 = vadd.f32 %v602_v26, %v489_v25  ;;  %v701_v19 = vadd.f32 %v700_v59, %v3179_v28 }
 0x197   :  { %v730_v23 = vmul.f32 %v3194_v37, %v3194_v37  ;;  %v744_v24 = vadd.f32 %v727_v44, %v726_v51  ;;  %v3212_v26 = vadd.f32 %v685_v2, %v484_v8 }
 0x198   :  { %v728_v30 = vmul.f32 %v3188_v16, %v3188_v16  ;;  %v705_v50 = vadd.f32 %v704_v36, %v3188_v16  ;;  %v741_v34 = vadd.f32 %v740_v17, %v725_v18  ;;  %v709_v10 = vadd.f32 %v3200_v27, %v3194_v37 }
 0x199   :  { %v689_v63 = vpop.f32.mrb[6].mxu1  ;;  %v731_v1 = vmul.f32 %v3200_v27, %v3200_v27  ;;  %v729_v8 = vmul.f32 %v3212_v26, %v3212_v26 }
 0x19a   :  { %v3206_v29 = vadd.f32 %v689_v63, %v489_v25  ;;  %v691_v3 = vpop.f32.mrb[7].mxu1  ;;  %702 = vadd.xlane.f32.xlu0 %v701_v19  ;;  %742 = vadd.xlane.f32.xlu1 %v741_v34  ;;  %v706_v51 = vadd.f32 %v705_v50, %v3212_v26  ;;  %v745_v44 = vadd.f32 %v744_v24, %v728_v30 }
 0x19b   :  { %v3216_v36 = vadd.f32 %v691_v3, %v489_v25  ;;  %v749_v6 = vadd.f32 %v731_v1, %v730_v23 }
 0x19c   :  { %v732_v59 = vmul.f32 %v3206_v29, %v3206_v29  ;;  %v710_v63 = vadd.f32 %v709_v10, %v3206_v29  ;;  %v746_v34 = vadd.f32 %v745_v44, %v729_v8 }
 0x19d   :  { %v733_v2 = vmul.f32 %v3216_v36, %v3216_v36 }
 0x19e   :  { %v711_v18 = vadd.f32 %v710_v63, %v3216_v36  ;;  %v750_v17 = vadd.f32 %v749_v6, %v732_v59  ;;  %707 = vadd.xlane.f32.xlu0 %v706_v51 }
 0x1a0   :  { %712 = vadd.xlane.f32.xlu1 %v711_v18  ;;  %v751_v25 = vadd.f32 %v750_v17, %v733_v2 }
 0x1a2   :  { %747 = vadd.xlane.f32.xlu0 %v746_v34 }
 0x1a4   :  { %752 = vadd.xlane.f32.xlu1 %v751_v25 }
 0x221   :  { %v698_v19 = vpop.xlane.xlu1 %697 }
 0x222   :  { %v714_v23 = vmul.f32 0.001953125, %v698_v19 }
 0x223   :  { %v738_v50 = vpop.xlane.xlu0 %737 }
 0x224   :  { %v758_v3 = vmul.f32 %v714_v23, %v714_v23  ;;  %v754_v24 = vmul.f32 0.001953125, %v738_v50 }
 0x226   :  { %v762_v30 = vsub.f32 %v754_v24, %v758_v3 }
 0x227   :  { %v703_v10 = vpop.xlane.xlu0 %702  ;;  %v743_v6 = vpop.xlane.xlu1 %742 }
 0x228   :  { %v766_v1 = vmax.f32 %v762_v30, 0.0  ;;  %v715_v59 = vmul.f32 0.001953125, %v703_v10  ;;  %v755_v18 = vmul.f32 0.001953125, %v743_v6  ;;  %v770_v6 = vld [vmem:[%s4401_s3] sm:$0xff] }
 0x22a   :  { %v774_v63 = vadd.f32 1e-05, %v766_v1  ;;  %v759_v51 = vmul.f32 %v715_v59, %v715_v59 }
 0x22b   :  { %v708_v45 = vpop.xlane.xlu0 %707 }
 0x22c   :  { %2352 = vrsqrt.f32 %v774_v63  ;;  %v763_v53 = vsub.f32 %v755_v18, %v759_v51  ;;  %v716_v44 = vmul.f32 0.001953125, %v708_v45 }
 0x22d   :  { %v713_v17 = vpop.xlane.xlu1 %712 }
 0x22e   :  { %v717_v8 = vmul.f32 0.001953125, %v713_v17  ;;  %v767_v2 = vmax.f32 %v763_v53, 0.0  ;;  %v760_v19 = vmul.f32 %v716_v44, %v716_v44  ;;  %v771_v17 = vld [vmem:[%s4401_s3 + $0x8] sm:$0xff] }
 0x22f   :  { %v748_v34 = vpop.xlane.xlu0 %747 }
 0x230   :  { %v775_v25 = vadd.f32 1e-05, %v767_v2  ;;  %v756_v22 = vmul.f32 0.001953125, %v748_v34  ;;  %v761_v3 = vmul.f32 %v717_v8, %v717_v8 }
 0x231   :  { %v753_v50 = vpop.xlane.xlu1 %752 }
 0x232   :  { %v757_v24 = vmul.f32 0.001953125, %v753_v50  ;;  %2354 = vrsqrt.f32 %v775_v25  ;;  %v764_v30 = vsub.f32 %v756_v22, %v760_v19  ;;  %v786_v25 = vld [vmem:[%s4402_s4] sm:$0xff]  ;;  %v787_v19 = vld [vmem:[%s4402_s4 + $0x8] sm:$0xff] }
 0x234   :  { %v765_v10 = vsub.f32 %v757_v24, %v761_v3  ;;  %v768_v1 = vmax.f32 %v764_v30, 0.0  ;;  %v772_v3 = vld [vmem:[%s4401_s3 + $0x10] sm:$0xff] }
 0x236   :  { %v769_v63 = vmax.f32 %v765_v10, 0.0  ;;  %v2353_v45 = vpop.eup %2352  ;;  %v776_v51 = vadd.f32 1e-05, %v768_v1 }
 0x237   :  { %v782_v53 = vmul.f32 %v2353_v45, %v770_v6 }
 0x238   :  { %v777_v18 = vadd.f32 1e-05, %v769_v63  ;;  %2356 = vrsqrt.f32 %v776_v51  ;;  %v788_v51 = vld [vmem:[%s4402_s4 + $0x10] sm:$0xff] }
 0x239   :  { %800 = vperm.xlu0 %2348, %v782_v53   ;;  %v790_v34 = vmul.f32 %v782_v53, %v714_v23  ;;  %v773_v23 = vld [vmem:[%s4401_s3 + $0x18] sm:$0xff] }
 0x23a   :  { %2358 = vrsqrt.f32 %v777_v18 }
 0x23b   :  { %v794_v24 = vsub.f32 %v786_v25, %v790_v34 }
 0x23c   :  { %v2355_v2 = vpop.eup %2354 }
 0x23d   :  { %v783_v22 = vmul.f32 %v2355_v2, %v771_v17 }
 0x23f   :  { %805 = vperm.xlu1 %2349, %v783_v22   ;;  %v791_v50 = vmul.f32 %v783_v22, %v715_v59  ;;  %v789_v59 = vld [vmem:[%s4402_s4 + $0x18] sm:$0xff] }
 0x241   :  { %v795_v30 = vsub.f32 %v787_v19, %v791_v50 }
 0x242   :  { %v2357_v10 = vpop.eup %2356 }
 0x243   :  { %836 = vperm.xlu1 %2349, %v794_v24   ;;  %841 = vperm.xlu0 %2348, %v795_v30   ;;  %v784_v6 = vmul.f32 %v2357_v10, %v772_v3 }
 0x244   :  { %v2359_v1 = vpop.eup %2358 }
 0x245   :  { %v785_v63 = vmul.f32 %v2359_v1, %v773_v23  ;;  %v792_v45 = vmul.f32 %v784_v6, %v716_v44 }
 0x247   :  { %v793_v18 = vmul.f32 %v785_v63, %v717_v8  ;;  %810 = vperm.xlu1 %2349, %v784_v6   ;;  %815 = vperm.xlu0 %2348, %v785_v63   ;;  %v796_v17 = vsub.f32 %v788_v51, %v792_v45 }
 0x249   :  { %v797_v53 = vsub.f32 %v789_v59, %v793_v18 }
 0x24b   :  { %846 = vperm.xlu1 %2349, %v796_v17   ;;  %851 = vperm.xlu0 %2348, %v797_v53  }
 0x2b8   :  { %v801_v2 = vpop.permute.xlu0 %800 }
 0x2b9   :  { %v818_v44 = vmul.f32 %v801_v2, %v3145_v33  ;;  %v819_v8 = vmul.f32 %v801_v2, %v3147_v32  ;;  %v821_v33 = vmul.f32 %v801_v2, %v3157_v21  ;;  %v820_v21 = vmul.f32 %v801_v2, %v3151_v9 }
 0x2be   :  { %v806_v22 = vpop.permute.xlu1 %805 }
 0x2bf   :  { %v822_v34 = vmul.f32 %v806_v22, %v3161_v14  ;;  %v823_v25 = vmul.f32 %v806_v22, %v3163_v40  ;;  %v825_v23 = vmul.f32 %v806_v22, %v3179_v28  ;;  %v824_v40 = vmul.f32 %v806_v22, %v3168_v12 }
 0x2c2   :  { %v842_v19 = vpop.permute.xlu0 %841  ;;  %v837_v50 = vpop.permute.xlu1 %836 }
 0x2c3   :  { %v858_v3 = vadd.f32 %v842_v19, %v822_v34  ;;  %v859_v24 = vadd.f32 %v842_v19, %v823_v25  ;;  %v854_v30 = vadd.f32 %v837_v50, %v818_v44  ;;  %v855_v1 = vadd.f32 %v837_v50, %v819_v8 }
 0x2c4   :  { %v861_v6 = vadd.f32 %v842_v19, %v825_v23  ;;  %v857_v32 = vadd.f32 %v837_v50, %v821_v33  ;;  %v860_v28 = vadd.f32 %v842_v19, %v824_v40  ;;  %v856_v17 = vadd.f32 %v837_v50, %v820_v21 }
 0x2c5   :  { %vm874_vm6 = vcmp.ge.f32.partialorder %v858_v3, 0.0  ;;  %v890_v10 = vmul.f32 0.2, %v858_v3  ;;  %v891_v63 = vmul.f32 0.2, %v859_v24  ;;  %vm870_vm14 = vcmp.ge.f32.partialorder %v854_v30, 0.0 }
 0x2c6   :  { %vm875_vm11 = vcmp.ge.f32.partialorder %v859_v24, 0.0  ;;  %v886_v14 = vmul.f32 0.2, %v854_v30  ;;  %v887_v59 = vmul.f32 0.2, %v855_v1  ;;  %vm871_vm0 = vcmp.ge.f32.partialorder %v855_v1, 0.0  ;;  %v816_v50 = vpop.permute.xlu0 %815 }
 0x2c7   :  { %v3254_v45 = vsel %vm874_vm6, %v858_v3, %v890_v10  ;;  %v893_v18 = vmul.f32 0.2, %v861_v6  ;;  %v3262_v53 = vsel %vm875_vm11, %v859_v24, %v891_v63  ;;  %vm877_vm8 = vcmp.ge.f32.partialorder %v861_v6, 0.0  ;;  %v3379_v3 = vpop.permute.xlu1 %810  ;;  %vm4615_vm6 = vmmov %vm4612_vm5 }
 0x2c8   :  { %4604 = vst [vmem:[#allocation24_spill] sm:$0xff] %v3254_v45  ;;  %920 = vrot.lane.b32.xlu0 %v3254_v45, %s2395_s0  ;;  %v3260_v51 = vsel %vm870_vm14, %v854_v30, %v886_v14  ;;  %4606 = vst [vmem:[#allocation26_spill] sm:$0xff] %v3262_v53  ;;  %v889_v12 = vmul.f32 0.2, %v857_v32  ;;  %v3269_v22 = vsel %vm871_vm0, %v855_v1, %v887_v59  ;;  %v892_v34 = vmul.f32 0.2, %v860_v28 }
 0x2c9   :  { %4605 = vst [vmem:[#allocation25_spill] sm:$0xff] %v3260_v51  ;;  %918 = vrot.lane.b32.xlu1 %v3260_v51, %s2395_s0  ;;  %4607 = vst [vmem:[#allocation27_spill] sm:$0xff] %v3269_v22  ;;  %v3271_v44 = vsel %vm877_vm8, %v861_v6, %v893_v18  ;;  %vm873_vm1 = vcmp.ge.f32.partialorder %v857_v32, 0.0  ;;  %vm876_vm2 = vcmp.ge.f32.partialorder %v860_v28, 0.0  ;;  %v888_v9 = vmul.f32 0.2, %v856_v17 }
 0x2ca   :  { %4608 = vst [vmem:[#allocation28_spill] sm:$0xff] %v3271_v44  ;;  %v3277_v2 = vsel %vm873_vm1, %v857_v32, %v889_v12  ;;  %v3279_v25 = vsel %vm876_vm2, %v860_v28, %v892_v34  ;;  %vm872_vm9 = vcmp.ge.f32.partialorder %v856_v17, 0.0  ;;  %v852_v24 = vpop.permute.xlu0 %851  ;;  %v830_v23 = vmul.f32 %v816_v50, %v3194_v37  ;;  %vm4616_vm11 = vmmov %vm4612_vm5 }
 0x2cb   :  { %4609 = vst [vmem:[#allocation29_spill] sm:$0xff] %v3277_v2  ;;  %4610 = vst [vmem:[#allocation30_spill] sm:$0xff] %v3279_v25  ;;  %v3285_v19 = vsel %vm872_vm9, %v856_v17, %v888_v9  ;;  %v3389_v30 = vpop.permute.xlu1 %846  ;;  %v831_v33 = vmul.f32 %v816_v50, %v3200_v27  ;;  %v826_v14 = vmul.f32 %v3379_v3, %v3181_v15 }
 0x2cc   :  { %928 = vrot.lane.b32.xlu0 %v3262_v53, %s2395_s0  ;;  %4611 = vst [vmem:[#allocation31_spill] sm:$0xff] %v3285_v19  ;;  %v866_v1 = vadd.f32 %v852_v24, %v830_v23  ;;  %v833_v37 = vmul.f32 %v816_v50, %v3216_v36  ;;  %v827_v27 = vmul.f32 %v3379_v3, %v3183_v0  ;;  %vm4617_vm0 = vmmov %vm4612_vm5 }
 0x2cd   :  { %926 = vrot.lane.b32.xlu1 %v3269_v22, %s2395_s0  ;;  %v867_v59 = vadd.f32 %v852_v24, %v831_v33  ;;  %v862_v18 = vadd.f32 %v3389_v30, %v826_v14  ;;  %v832_v12 = vmul.f32 %v816_v50, %v3206_v29  ;;  %v829_v34 = vmul.f32 %v3379_v3, %v3212_v26  ;;  %vm4618_vm1 = vmmov %vm4617_vm0 }
 0x2ce   :  { %v898_v28 = vmul.f32 0.2, %v866_v1  ;;  %vm882_vm12 = vcmp.ge.f32.partialorder %v866_v1, 0.0  ;;  %v869_v9 = vadd.f32 %v852_v24, %v833_v37  ;;  %v863_v0 = vadd.f32 %v3389_v30, %v827_v27  ;;  %vm4619_vm2 = vmmov %vm4617_vm0 }
 0x2cf   :  { %v899_v14 = vmul.f32 0.2, %v867_v59  ;;  %vm878_vm14 = vcmp.ge.f32.partialorder %v862_v18, 0.0  ;;  %vm883_vm8 = vcmp.ge.f32.partialorder %v867_v59, 0.0 }
 0x2d0   :  { %944 = vrot.lane.b32.xlu0 %v3271_v44, %s2395_s0  ;;  %vm879_vm9 = vcmp.ge.f32.partialorder %v863_v0, 0.0 }
 0x2d1   :  { %942 = vrot.lane.b32.xlu1 %v3277_v2, %s2395_s0 }
 0x2d4   :  { %936 = vrot.lane.b32.xlu0 %v3279_v25, %s2395_s0 }
 0x2d5   :  { %934 = vrot.lane.b32.xlu1 %v3285_v19, %s2395_s0 }
 0x2d8   :  { %984 = vrot.lane.b32.xlu0 %v3254_v45, %s2393_s12 }
 0x2d9   :  { %982 = vrot.lane.b32.xlu1 %v3260_v51, %s2393_s12 }
 0x2dc   :  { %992 = vrot.lane.b32.xlu0 %v3262_v53, %s2393_s12 }
 0x2dd   :  { %990 = vrot.lane.b32.xlu1 %v3269_v22, %s2393_s12 }
 0x2e0   :  { %1008 = vrot.lane.b32.xlu0 %v3271_v44, %s2393_s12 }
 0x2e1   :  { %1006 = vrot.lane.b32.xlu1 %v3277_v2, %s2393_s12 }
 0x2e4   :  { %1000 = vrot.lane.b32.xlu0 %v3279_v25, %s2393_s12 }
 0x2e5   :  { %998 = vrot.lane.b32.xlu1 %v3285_v19, %s2393_s12 }
 0x2e8   :  { %1048 = vrot.lane.b32.xlu0 %v3254_v45, %s2396_s15 }
 0x2e9   :  { %1046 = vrot.lane.b32.xlu1 %v3260_v51, %s2396_s15 }
 0x2ec   :  { %1056 = vrot.lane.b32.xlu0 %v3262_v53, %s2396_s15 }
 0x2ed   :  { %1054 = vrot.lane.b32.xlu1 %v3269_v22, %s2396_s15 }
 0x2f0   :  { %1072 = vrot.lane.b32.xlu0 %v3271_v44, %s2396_s15 }
 0x2f1   :  { %1070 = vrot.lane.b32.xlu1 %v3277_v2, %s2396_s15 }
 0x2f4   :  { %1064 = vrot.lane.b32.xlu0 %v3279_v25, %s2396_s15 }
 0x2f5   :  { %1062 = vrot.lane.b32.xlu1 %v3285_v19, %s2396_s15 }
 0x2f8   :  { %1112 = vrot.lane.b32.xlu0 %v3254_v45, %s2392_s11 }
 0x2f9   :  { %1110 = vrot.lane.b32.xlu1 %v3260_v51, %s2392_s11 }
 0x2fc   :  { %1120 = vrot.lane.b32.xlu0 %v3262_v53, %s2392_s11 }
 0x2fd   :  { %1118 = vrot.lane.b32.xlu1 %v3269_v22, %s2392_s11 }
 0x300   :  { %1136 = vrot.lane.b32.xlu0 %v3271_v44, %s2392_s11 }
 0x301   :  { %1134 = vrot.lane.b32.xlu1 %v3277_v2, %s2392_s11 }
 0x304   :  { %1128 = vrot.lane.b32.xlu0 %v3279_v25, %s2392_s11 }
 0x305   :  { %1126 = vrot.lane.b32.xlu1 %v3285_v19, %s2392_s11 }
 0x308   :  { %1184 = vrot.lane.b32.xlu0 %v3262_v53, %s2397_s16 }
 0x309   :  { %1182 = vrot.lane.b32.xlu1 %v3269_v22, %s2397_s16 }
 0x30c   :  { %1192 = vrot.lane.b32.xlu0 %v3279_v25, %s2397_s16 }
 0x30d   :  { %1190 = vrot.lane.b32.xlu1 %v3285_v19, %s2397_s16 }
 0x310   :  { %1176 = vrot.lane.b32.xlu0 %v3254_v45, %s2397_s16 }
 0x311   :  { %1174 = vrot.lane.b32.xlu1 %v3260_v51, %s2397_s16 }
 0x314   :  { %1200 = vrot.lane.b32.xlu0 %v3271_v44, %s2397_s16 }
 0x315   :  { %1198 = vrot.lane.b32.xlu1 %v3277_v2, %s2397_s16 }
 0x318   :  { %1248 = vrot.lane.b32.xlu0 %v3262_v53, %s2399_s18 }
 0x319   :  { %1246 = vrot.lane.b32.xlu1 %v3269_v22, %s2399_s18 }
 0x31c   :  { %1256 = vrot.lane.b32.xlu0 %v3279_v25, %s2399_s18 }
 0x31d   :  { %1254 = vrot.lane.b32.xlu1 %v3285_v19, %s2399_s18 }
 0x320   :  { %1240 = vrot.lane.b32.xlu0 %v3254_v45, %s2399_s18 }
 0x321   :  { %1238 = vrot.lane.b32.xlu1 %v3260_v51, %s2399_s18 }
 0x324   :  { %1264 = vrot.lane.b32.xlu0 %v3271_v44, %s2399_s18 }
 0x325   :  { %1262 = vrot.lane.b32.xlu1 %v3277_v2, %s2399_s18 }
 0x328   :  { %1312 = vrot.lane.b32.xlu0 %v3262_v53, %s2398_s17 }
 0x329   :  { %1310 = vrot.lane.b32.xlu1 %v3269_v22, %s2398_s17 }
 0x32c   :  { %1320 = vrot.lane.b32.xlu0 %v3279_v25, %s2398_s17 }
 0x32d   :  { %1318 = vrot.lane.b32.xlu1 %v3285_v19, %s2398_s17 }
 0x330   :  { %1304 = vrot.lane.b32.xlu0 %v3254_v45, %s2398_s17 }
 0x331   :  { %1302 = vrot.lane.b32.xlu1 %v3260_v51, %s2398_s17 }
 0x334   :  { %1328 = vrot.lane.b32.xlu0 %v3271_v44, %s2398_s17 }
 0x335   :  { %1326 = vrot.lane.b32.xlu1 %v3277_v2, %s2398_s17 }
 0x338   :  { %1376 = vrot.lane.b32.xlu0 %v3262_v53, %s2400_s19 }
 0x339   :  { %1374 = vrot.lane.b32.xlu1 %v3269_v22, %s2400_s19 }
 0x33a   :  { %v921_v8 = vpop.permute.xlu0 %920 }
 0x33b   :  { %v919_v10 = vpop.permute.xlu1 %918 }
 0x33c   :  { %1384 = vrot.lane.b32.xlu0 %v3279_v25, %s2400_s19  ;;  %v894_v25 = vmul.f32 0.2, %v862_v18 }
 0x33d   :  { %1382 = vrot.lane.b32.xlu1 %v3285_v19, %s2400_s19 }
 0x33e   :  { %v929_v6 = vpop.permute.xlu0 %928 }
 0x33f   :  { %v959_v63 = vsel %vm4612_vm5, %v921_v8, %v929_v6  ;;  %v927_v32 = vpop.permute.xlu1 %926  ;;  %vm885_vm5 = vcmp.ge.f32.partialorder %v869_v9, 0.0 }
 0x340   :  { %1368 = vrot.lane.b32.xlu0 %v3254_v45, %s2400_s19  ;;  %v971_v40 = vmul.f32 %v2652_v48, %v959_v63  ;;  %v958_v21 = vsel %vm4613_vm10, %v919_v10, %v927_v32 }
 0x341   :  { %v967_v15 = vmul.f32 %v2652_v48, %v958_v21  ;;  %1366 = vrot.lane.b32.xlu1 %v3260_v51, %s2400_s19  ;;  %v3424_v21 = vsel %vm882_vm12, %v866_v1, %v898_v28  ;;  %v868_v1 = vadd.f32 %v852_v24, %v832_v12 }
 0x342   :  { %v945_v17 = vpop.permute.xlu0 %944 }
 0x343   :  { %v963_v36 = vsel %vm4614_vm15, %v945_v17, %v921_v8  ;;  %v943_v63 = vpop.permute.xlu1 %942  ;;  %v2159_v33 = vpack.c.bf16 %v971_v40, %v967_v15  ;;  %v865_v40 = vadd.f32 %v3389_v30, %v829_v34  ;;  %v3449_v34 = vsel %vm883_vm8, %v867_v59, %v899_v14  ;;  %vm4656_vm8 = vmmov %vm4618_vm1 }
 0x344   :  { %1392 = vrot.lane.b32.xlu0 %v3271_v44, %s2400_s19  ;;  %v970_v23 = vmul.f32 %v2733_v20, %v963_v36  ;;  %v962_v29 = vsel %vm4615_vm6, %v943_v63, %v919_v10  ;;  %v901_v10 = vmul.f32 0.2, %v869_v9  ;;  %vm884_vm12 = vcmp.ge.f32.partialorder %v868_v1, 0.0  ;;  %vm4652_vm6 = vmmov %vm4617_vm0 }
 0x345   :  { %v966_v26 = vmul.f32 %v2733_v20, %v962_v29  ;;  %1390 = vrot.lane.b32.xlu1 %v3277_v2, %s2400_s19  ;;  %2160 = vmatprep.subr.bf16.mxu0 %v2159_v33  ;;  %v895_v33 = vmul.f32 0.2, %v863_v0  ;;  %v897_v14 = vmul.f32 0.2, %v865_v40  ;;  %vm881_vm10 = vcmp.ge.f32.partialorder %v865_v40, 0.0 }
 0x346   :  { %v937_v50 = vpop.permute.xlu0 %936 }
 0x347   :  { %v951_v8 = vsel %vm4616_vm11, %v937_v50, %v945_v17  ;;  %v955_v37 = vsel %vm4617_vm0, %v929_v6, %v937_v50  ;;  %v2161_v28 = vpack.c.bf16 %v970_v23, %v966_v26  ;;  %v935_v36 = vpop.permute.xlu1 %934  ;;  %v3441_v17 = vsel %vm878_vm14, %v862_v18, %v894_v25  ;;  %vm4653_vm14 = vmmov %vm4617_vm0 }
 0x348   :  { %924 = vrot.lane.b32.xlu0 %v3424_v21, %s2395_s0  ;;  %v972_v27 = vmul.f32 %v2892_v47, %v955_v37  ;;  %v973_v15 = vmul.f32 %v2895_v52, %v951_v8  ;;  %v950_v24 = vsel %vm4618_vm1, %v935_v36, %v943_v63  ;;  %v954_v6 = vsel %vm4619_vm2, %v927_v32, %v935_v36 }
 0x349   :  { %v968_v23 = vmul.f32 %v2892_v47, %v954_v6  ;;  %v969_v29 = vmul.f32 %v2895_v52, %v950_v24  ;;  %922 = vrot.lane.b32.xlu1 %v3441_v17, %s2395_s0  ;;  %2162 = vmatpush1.bf16.msra.mxu0 %v2161_v28  ;;  %v828_v25 = vmul.f32 %v3379_v3, %v3188_v16  ;;  %v900_v8 = vmul.f32 0.2, %v868_v1 }
 0x34a   :  { %v3447_v12 = vpop.permute.xlu0 %984  ;;  %v3462_v50 = vsel %vm879_vm9, %v863_v0, %v895_v33  ;;  %v3466_v37 = vsel %vm885_vm5, %v869_v9, %v901_v10  ;;  %vm4654_vm11 = vcmp.lt.s32.totalorder %v2551_v11, 16  ;;  %vm4659_vm9 = vmmov %vm4652_vm6 }
 0x34b   :  { %v2233_v32 = vpack.c.bf16 %v972_v27, %v968_v23  ;;  %v3459_v18 = vpop.permute.xlu1 %982  ;;  %v2231_v59 = vpack.c.bf16 %v973_v15, %v969_v29  ;;  %v864_v63 = vadd.f32 %v3389_v30, %v828_v25  ;;  %v3474_v30 = vsel %vm881_vm10, %v865_v40, %v897_v14  ;;  %vm4655_vm0 = vmmov %vm4654_vm11 }
 0x34c   :  { %932 = vrot.lane.b32.xlu0 %v3449_v34, %s2395_s0  ;;  %v3478_v28 = vsel %vm884_vm12, %v868_v1, %v900_v8  ;;  %vm4657_vm1 = vmmov %vm4655_vm0 }
 0x34d   :  { %930 = vrot.lane.b32.xlu1 %v3462_v50, %s2395_s0  ;;  %2232 = vmatprep.subr.bf16.mxu1 %v2231_v59  ;;  %v896_v3 = vmul.f32 0.2, %v864_v63  ;;  %vm880_vm15 = vcmp.ge.f32.partialorder %v864_v63, 0.0  ;;  %vm4658_vm2 = vmmov %vm4655_vm0 }
 0x34e   :  { %v3464_v26 = vpop.permute.xlu0 %992  ;;  %2234 = vmatpush1.bf16.msra.mxu1 %v2233_v32  ;;  %vm4660_vm5 = vmmov %vm4652_vm6 }
 0x34f   :  { %v3472_v16 = vpop.permute.xlu1 %990  ;;  %v3486_v10 = vsel %vm880_vm15, %v864_v63, %v896_v3  ;;  %vm4661_vm10 = vmmov %vm4660_vm5 }
 0x350   :  { %948 = vrot.lane.b32.xlu0 %v3466_v37, %s2395_s0  ;;  %vm4662_vm12 = vmmov %vm4655_vm0 }
 0x351   :  { %946 = vrot.lane.b32.xlu1 %v3474_v30, %s2395_s0  ;;  %vm4663_vm15 = vmmov %vm4655_vm0 }
 0x352   :  { %v3476_v0 = vpop.permute.xlu0 %1008 }
 0x353   :  { %v3484_v9 = vpop.permute.xlu1 %1006 }
 0x354   :  { %940 = vrot.lane.b32.xlu0 %v3478_v28, %s2395_s0 }
 0x355   :  { %938 = vrot.lane.b32.xlu1 %v3486_v10, %s2395_s0 }
 0x356   :  { %v3488_v27 = vpop.permute.xlu0 %1000 }
 0x357   :  { %v3494_v1 = vpop.permute.xlu1 %998 }
 0x358   :  { %988 = vrot.lane.b32.xlu0 %v3424_v21, %s2393_s12 }
 0x359   :  { %986 = vrot.lane.b32.xlu1 %v3441_v17, %s2393_s12 }
 0x35a   :  { %v3496_v40 = vpop.permute.xlu0 %1048 }
 0x35b   :  { %v3502_v15 = vpop.permute.xlu1 %1046 }
 0x35c   :  { %996 = vrot.lane.b32.xlu0 %v3449_v34, %s2393_s12 }
 0x35d   :  { %994 = vrot.lane.b32.xlu1 %v3462_v50, %s2393_s12 }
 0x35e   :  { %v3504_v36 = vpop.permute.xlu0 %1056 }
 0x35f   :  { %v3510_v33 = vpop.permute.xlu1 %1054 }
 0x360   :  { %1012 = vrot.lane.b32.xlu0 %v3466_v37, %s2393_s12 }
 0x361   :  { %1010 = vrot.lane.b32.xlu1 %v3474_v30, %s2393_s12 }
 0x362   :  { %v3512_v24 = vpop.permute.xlu0 %1072 }
 0x363   :  { %v3518_v6 = vpop.permute.xlu1 %1070 }
 0x364   :  { %1004 = vrot.lane.b32.xlu0 %v3478_v28, %s2393_s12 }
 0x365   :  { %1002 = vrot.lane.b32.xlu1 %v3486_v10, %s2393_s12 }
 0x366   :  { %v3520_v23 = vpop.permute.xlu0 %1064 }
 0x367   :  { %v3526_v29 = vpop.permute.xlu1 %1062 }
 0x368   :  { %1052 = vrot.lane.b32.xlu0 %v3424_v21, %s2396_s15 }
 0x369   :  { %1050 = vrot.lane.b32.xlu1 %v3441_v17, %s2396_s15 }
 0x36a   :  { %v3528_v25 = vpop.permute.xlu0 %1112 }
 0x36b   :  { %v3534_v32 = vpop.permute.xlu1 %1110 }
 0x36c   :  { %1060 = vrot.lane.b32.xlu0 %v3449_v34, %s2396_s15 }
 0x36d   :  { %1058 = vrot.lane.b32.xlu1 %v3462_v50, %s2396_s15 }
 0x36e   :  { %v3536_v59 = vpop.permute.xlu0 %1120 }
 0x36f   :  { %v3542_v63 = vpop.permute.xlu1 %1118 }
 0x370   :  { %1076 = vrot.lane.b32.xlu0 %v3466_v37, %s2396_s15 }
 0x371   :  { %1074 = vrot.lane.b32.xlu1 %v3474_v30, %s2396_s15 }
 0x372   :  { %v3544_v14 = vpop.permute.xlu0 %1136 }
 0x373   :  { %v3550_v8 = vpop.permute.xlu1 %1134 }
 0x374   :  { %1068 = vrot.lane.b32.xlu0 %v3478_v28, %s2396_s15  ;;  %4620 = vst [vmem:[#allocation32_spill] sm:$0xff] %v3550_v8 }
 0x375   :  { %1066 = vrot.lane.b32.xlu1 %v3486_v10, %s2396_s15 }
 0x376   :  { %v3552_v3 = vpop.permute.xlu0 %1128 }
 0x377   :  { %4621 = vst [vmem:[#allocation33_spill] sm:$0xff] %v3552_v3  ;;  %v3558_v19 = vpop.permute.xlu1 %1126 }
 0x378   :  { %1116 = vrot.lane.b32.xlu0 %v3424_v21, %s2392_s11  ;;  %4622 = vst [vmem:[#allocation34_spill] sm:$0xff] %v3558_v19 }
 0x379   :  { %1114 = vrot.lane.b32.xlu1 %v3441_v17, %s2392_s11 }
 0x37a   :  { %v3560_v44 = vpop.permute.xlu0 %1184 }
 0x37b   :  { %4623 = vst [vmem:[#allocation35_spill] sm:$0xff] %v3560_v44  ;;  %v3566_v2 = vpop.permute.xlu1 %1182 }
 0x37c   :  { %1124 = vrot.lane.b32.xlu0 %v3449_v34, %s2392_s11  ;;  %4624 = vst [vmem:[#allocation36_spill] sm:$0xff] %v3566_v2 }
 0x37d   :  { %1122 = vrot.lane.b32.xlu1 %v3462_v50, %s2392_s11 }
 0x37e   :  { %v3568_v5 = vpop.permute.xlu0 %1192 }
 0x37f   :  { %4625 = vst [vmem:[#allocation37_spill] sm:$0xff] %v3568_v5  ;;  %v3574_v45 = vpop.permute.xlu1 %1190 }
 0x380   :  { %1140 = vrot.lane.b32.xlu0 %v3466_v37, %s2392_s11  ;;  %4626 = vst [vmem:[#allocation38_spill] sm:$0xff] %v3574_v45 }
 0x381   :  { %1138 = vrot.lane.b32.xlu1 %v3474_v30, %s2392_s11 }
 0x382   :  { %v3576_v51 = vpop.permute.xlu0 %1176 }
 0x383   :  { %4627 = vst [vmem:[#allocation39_spill] sm:$0xff] %v3576_v51  ;;  %v3582_v53 = vpop.permute.xlu1 %1174 }
 0x384   :  { %1132 = vrot.lane.b32.xlu0 %v3478_v28, %s2392_s11  ;;  %4628 = vst [vmem:[#allocation40_spill] sm:$0xff] %v3582_v53 }
 0x385   :  { %1130 = vrot.lane.b32.xlu1 %v3486_v10, %s2392_s11 }
 0x386   :  { %v3584_v22 = vpop.permute.xlu0 %1200 }
 0x387   :  { %4629 = vst [vmem:[#allocation41_spill] sm:$0xff] %v3584_v22  ;;  %v3590_v2 = vpop.permute.xlu1 %1198 }
 0x388   :  { %1188 = vrot.lane.b32.xlu0 %v3449_v34, %s2397_s16  ;;  %4630 = vst [vmem:[#allocation42_spill] sm:$0xff] %v3590_v2 }
 0x389   :  { %1186 = vrot.lane.b32.xlu1 %v3462_v50, %s2397_s16 }
 0x38a   :  { %v3592_v45 = vpop.permute.xlu0 %1248 }
 0x38b   :  { %4631 = vst [vmem:[#allocation43_spill] sm:$0xff] %v3592_v45  ;;  %v3598_v51 = vpop.permute.xlu1 %1246 }
 0x38c   :  { %1196 = vrot.lane.b32.xlu0 %v3478_v28, %s2397_s16  ;;  %4632 = vst [vmem:[#allocation44_spill] sm:$0xff] %v3598_v51 }
 0x38d   :  { %1194 = vrot.lane.b32.xlu1 %v3486_v10, %s2397_s16 }
 0x38e   :  { %v3600_v53 = vpop.permute.xlu0 %1256 }
 0x38f   :  { %4633 = vst [vmem:[#allocation45_spill] sm:$0xff] %v3600_v53  ;;  %v3606_v22 = vpop.permute.xlu1 %1254 }
 0x390   :  { %1180 = vrot.lane.b32.xlu0 %v3424_v21, %s2397_s16  ;;  %4634 = vst [vmem:[#allocation46_spill] sm:$0xff] %v3606_v22 }
 0x391   :  { %1178 = vrot.lane.b32.xlu1 %v3441_v17, %s2397_s16 }
 0x392   :  { %v3608_v2 = vpop.permute.xlu0 %1240 }
 0x393   :  { %4635 = vst [vmem:[#allocation47_spill] sm:$0xff] %v3608_v2  ;;  %v3614_v45 = vpop.permute.xlu1 %1238 }
 0x394   :  { %1204 = vrot.lane.b32.xlu0 %v3466_v37, %s2397_s16  ;;  %4636 = vst [vmem:[#allocation48_spill] sm:$0xff] %v3614_v45 }
 0x395   :  { %1202 = vrot.lane.b32.xlu1 %v3474_v30, %s2397_s16 }
 0x396   :  { %v3616_v51 = vpop.permute.xlu0 %1264 }
 0x397   :  { %4637 = vst [vmem:[#allocation49_spill] sm:$0xff] %v3616_v51  ;;  %v3622_v53 = vpop.permute.xlu1 %1262 }
 0x398   :  { %1252 = vrot.lane.b32.xlu0 %v3449_v34, %s2399_s18  ;;  %4638 = vst [vmem:[#allocation50_spill] sm:$0xff] %v3622_v53 }
 0x399   :  { %1250 = vrot.lane.b32.xlu1 %v3462_v50, %s2399_s18 }
 0x39a   :  { %v1313_v22 = vpop.permute.xlu0 %1312 }
 0x39b   :  { %v1311_v2 = vpop.permute.xlu1 %1310 }
 0x39c   :  { %1260 = vrot.lane.b32.xlu0 %v3478_v28, %s2399_s18 }
 0x39d   :  { %1258 = vrot.lane.b32.xlu1 %v3486_v10, %s2399_s18 }
 0x39e   :  { %v1321_v44 = vpop.permute.xlu0 %1320 }
 0x39f   :  { %v1339_v51 = vsel %vm372_vm7, %v1313_v22, %v1321_v44  ;;  %v1319_v45 = vpop.permute.xlu1 %1318 }
 0x3a0   :  { %1244 = vrot.lane.b32.xlu0 %v3424_v21, %s2399_s18  ;;  %v3635_v53 = vmul.f32 %v2877_v46, %v1339_v51  ;;  %v1338_v5 = vsel %vm372_vm7, %v1311_v2, %v1319_v45 }
 0x3a1   :  { %v3640_v60 = vmul.f32 %v2877_v46, %v1338_v5  ;;  %1242 = vrot.lane.b32.xlu1 %v3441_v17, %s2399_s18 }
 0x3a2   :  { %4639 = vst [vmem:[#allocation51_spill] sm:$0xff] %v3635_v53  ;;  %v1305_v58 = vpop.permute.xlu0 %1304 }
 0x3a3   :  { %4640 = vst [vmem:[#allocation52_spill] sm:$0xff] %v3640_v60  ;;  %v1343_v19 = vsel %vm372_vm7, %v1305_v58, %v1313_v22  ;;  %v1303_v54 = vpop.permute.xlu1 %1302 }
 0x3a4   :  { %1268 = vrot.lane.b32.xlu0 %v3466_v37, %s2399_s18  ;;  %v3649_v51 = vmul.f32 %v2946_v39, %v1343_v19  ;;  %v1342_v5 = vsel %vm372_vm7, %v1303_v54, %v1311_v2 }
 0x3a5   :  { %v3656_v8 = vmul.f32 %v2946_v39, %v1342_v5  ;;  %1266 = vrot.lane.b32.xlu1 %v3474_v30, %s2399_s18 }
 0x3a6   :  { %v1329_v46 = vpop.permute.xlu0 %1328 }
 0x3a7   :  { %v1335_v22 = vsel %vm372_vm7, %v1321_v44, %v1329_v46  ;;  %v1347_v19 = vsel %vm372_vm7, %v1329_v46, %v1305_v58  ;;  %v1327_v39 = vpop.permute.xlu1 %1326 }
 0x3a8   :  { %1316 = vrot.lane.b32.xlu0 %v3449_v34, %s2398_s17  ;;  %v3669_v2 = vmul.f32 %v3035_v7, %v1335_v22  ;;  %v3672_v5 = vmul.f32 %v3040_v61, %v1347_v19  ;;  %v1334_v60 = vsel %vm372_vm7, %v1319_v45, %v1327_v39  ;;  %v1346_v44 = vsel %vm372_vm7, %v1327_v39, %v1303_v54 }
 0x3a9   :  { %v3679_v46 = vmul.f32 %v3035_v7, %v1334_v60  ;;  %v3682_v53 = vmul.f32 %v3040_v61, %v1346_v44  ;;  %1314 = vrot.lane.b32.xlu1 %v3462_v50, %s2398_s17  ;;  %v1431_v60 = vld [vmem:[%s4403_s5 + $0x8] sm:$0xff] }
 0x3aa   :  { %4641 = vst [vmem:[#allocation53_spill] sm:$0xff] %v3669_v2  ;;  %v1377_v58 = vpop.permute.xlu0 %1376  ;;  %1543 = vmatprep.mubr.f32.mxu0 %v1431_v60  ;;  %1721 = vmatprep.mubr.f32.mxu1 %v1431_v60 }
 0x3ab   :  { %4642 = vst [vmem:[#allocation54_spill] sm:$0xff] %v3679_v46  ;;  %4643 = vst [vmem:[#allocation55_spill] sm:$0xff] %v3682_v53  ;;  %v1375_v45 = vpop.permute.xlu1 %1374 }
 0x3ac   :  { %1324 = vrot.lane.b32.xlu0 %v3478_v28, %s2398_s17 }
 0x3ad   :  { %1322 = vrot.lane.b32.xlu1 %v3486_v10, %s2398_s17 }
 0x3ae   :  { %v1385_v39 = vpop.permute.xlu0 %1384 }
 0x3af   :  { %v1403_v19 = vsel %vm389_vm13, %v1377_v58, %v1385_v39  ;;  %v1383_v22 = vpop.permute.xlu1 %1382 }
 0x3b0   :  { %1308 = vrot.lane.b32.xlu0 %v3424_v21, %s2398_s17  ;;  %v3702_v44 = vmul.f32 %v3066_v31, %v1403_v19  ;;  %v1402_v54 = vsel %vm389_vm13, %v1375_v45, %v1383_v22 }
 0x3b1   :  { %v3707_v61 = vmul.f32 %v3066_v31, %v1402_v54  ;;  %1306 = vrot.lane.b32.xlu1 %v3441_v17, %s2398_s17 }
 0x3b2   :  { %4644 = vst [vmem:[#allocation56_spill] sm:$0xff] %v3702_v44  ;;  %v1369_v3 = vpop.permute.xlu0 %1368 }
 0x3b3   :  { %4645 = vst [vmem:[#allocation57_spill] sm:$0xff] %v3707_v61  ;;  %v1407_v60 = vsel %vm389_vm13, %v1369_v3, %v1377_v58  ;;  %v1367_v7 = vpop.permute.xlu1 %1366 }
 0x3b4   :  { %1332 = vrot.lane.b32.xlu0 %v3466_v37, %s2398_s17  ;;  %v3716_v19 = vmul.f32 %v3098_v57, %v1407_v60  ;;  %v1406_v54 = vsel %vm389_vm13, %v1367_v7, %v1375_v45 }
 0x3b5   :  { %v3723_v2 = vmul.f32 %v3098_v57, %v1406_v54  ;;  %1330 = vrot.lane.b32.xlu1 %v3474_v30, %s2398_s17 }
 0x3b6   :  { %4646 = vst [vmem:[#allocation58_spill] sm:$0xff] %v3716_v19  ;;  %v1393_v31 = vpop.permute.xlu0 %1392 }
 0x3b7   :  { %4647 = vst [vmem:[#allocation59_spill] sm:$0xff] %v3723_v2  ;;  %v1399_v58 = vsel %vm389_vm13, %v1385_v39, %v1393_v31  ;;  %v1411_v60 = vsel %vm389_vm13, %v1393_v31, %v1369_v3  ;;  %v1391_v57 = vpop.permute.xlu1 %1390 }
 0x3b8   :  { %1380 = vrot.lane.b32.xlu0 %v3449_v34, %s2400_s19  ;;  %v3736_v45 = vmul.f32 %v3105_v13, %v1399_v58  ;;  %v3739_v54 = vmul.f32 %v3101_v4, %v1411_v60  ;;  %v1398_v61 = vsel %vm389_vm13, %v1383_v22, %v1391_v57  ;;  %v1410_v39 = vsel %vm389_vm13, %v1391_v57, %v1367_v7 }
 0x3b9   :  { %v3746_v3 = vmul.f32 %v3105_v13, %v1398_v61  ;;  %v3749_v44 = vmul.f32 %v3101_v4, %v1410_v39  ;;  %1378 = vrot.lane.b32.xlu1 %v3462_v50, %s2400_s19  ;;  %v1023_v7 = vsel %vm4654_vm11, %v3447_v12, %v3464_v26  ;;  %v1022_v4 = vsel %vm4655_vm0, %v3459_v18, %v3472_v16  ;;  %vm4666_vm11 = vmmov %vm4655_vm0 }
 0x3ba   :  { %4648 = vst [vmem:[#allocation60_spill] sm:$0xff] %v3736_v45  ;;  %4649 = vst [vmem:[#allocation61_spill] sm:$0xff] %v3739_v54  ;;  %v925_v31 = vpop.permute.xlu0 %924  ;;  %v1026_v45 = vsel %vm4658_vm2, %v3484_v9, %v3459_v18  ;;  %v1035_v54 = vmul.f32 %v2634_v43, %v1023_v7  ;;  %v1031_v2 = vmul.f32 %v2634_v43, %v1022_v4 }
 0x3bb   :  { %4650 = vst [vmem:[#allocation62_spill] sm:$0xff] %v3746_v3  ;;  %4651 = vst [vmem:[#allocation63_spill] sm:$0xff] %v3749_v44  ;;  %v923_v22 = vpop.permute.xlu1 %922  ;;  %v1027_v3 = vsel %vm4657_vm1, %v3476_v0, %v3447_v12  ;;  %v1030_v4 = vmul.f32 %v2689_v62, %v1026_v45  ;;  %vm4668_vm1 = vcmp.lt.s32.totalorder %v2551_v11, 15 }
 0x3bc   :  { %1388 = vrot.lane.b32.xlu0 %v3478_v28, %s2400_s19  ;;  %v1034_v7 = vmul.f32 %v2689_v62, %v1027_v3  ;;  %vm4669_vm2 = vmmov %vm4668_vm1 }
 0x3bd   :  { %1386 = vrot.lane.b32.xlu1 %v3486_v10, %s2400_s19 }
 0x3be   :  { %v933_v57 = vpop.permute.xlu0 %932 }
 0x3bf   :  { %v961_v61 = vsel %vm4652_vm6, %v925_v31, %v933_v57  ;;  %v931_v39 = vpop.permute.xlu1 %930  ;;  %vm4664_vm6 = vmmov %vm4660_vm5 }
 0x3c0   :  { %1372 = vrot.lane.b32.xlu0 %v3424_v21, %s2400_s19  ;;  %v979_v60 = vmul.f32 %v2652_v48, %v961_v61  ;;  %v960_v58 = vsel %vm4653_vm14, %v923_v22, %v931_v39  ;;  %vm4665_vm14 = vmmov %vm4660_vm5 }
 0x3c1   :  { %v975_v13 = vmul.f32 %v2652_v48, %v960_v58  ;;  %1370 = vrot.lane.b32.xlu1 %v3441_v17, %s2400_s19 }
 0x3c2   :  { %v949_v46 = vpop.permute.xlu0 %948 }
 0x3c3   :  { %v965_v61 = vsel %vm4656_vm8, %v949_v46, %v925_v31  ;;  %v947_v58 = vpop.permute.xlu1 %946  ;;  %v2163_v44 = vpack.c.bf16 %v979_v60, %v975_v13  ;;  %v1443_v31 = vld [vmem:[%s4404_s6 + $0x8] sm:$0xff]  ;;  %vm4667_vm8 = vmmov %vm4655_vm0 }
 0x3c4   :  { %1396 = vrot.lane.b32.xlu0 %v3466_v37, %s2400_s19  ;;  %v978_v48 = vmul.f32 %v2733_v20, %v965_v61  ;;  %v964_v12 = vsel %vm4659_vm9, %v947_v58, %v923_v22  ;;  %v1015_v22 = vsel %vm4662_vm12, %v3488_v27, %v3476_v0  ;;  %v1445_v0 = vld [vmem:[%s4404_s6 + $0x18] sm:$0xff]  ;;  %v2167_v61 = vpack.c.bf16 %v1035_v54, %v1031_v2  ;;  %vm4670_vm9 = vmmov %vm4655_vm0 }
 0x3c5   :  { %v974_v53 = vmul.f32 %v2733_v20, %v964_v12  ;;  %1394 = vrot.lane.b32.xlu1 %v3474_v30, %s2400_s19  ;;  %2164 = vmatprep.subr.bf16.mxu0 %v2163_v44  ;;  %v1442_v20 = vld [vmem:[%s4404_s6] sm:$0xff]  ;;  %v1037_v12 = vmul.f32 %v2789_v56, %v1015_v22  ;;  %vm4673_vm12 = vmmov %vm4668_vm1 }
 0x3c6   :  { %v941_v19 = vpop.permute.xlu0 %940 }
 0x3c7   :  { %v953_v13 = vsel %vm4660_vm5, %v941_v19, %v949_v46  ;;  %v957_v18 = vsel %vm4661_vm10, %v933_v57, %v941_v19  ;;  %v1014_v46 = vsel %vm4663_vm15, %v3494_v1, %v3484_v9  ;;  %v2165_v44 = vpack.c.bf16 %v978_v48, %v974_v53  ;;  %v939_v3 = vpop.permute.xlu1 %938  ;;  %vm4671_vm5 = vmmov %vm4655_vm0 }
 0x3c8   :  { %1453 = vperm.xlu0 %2348, %v1443_v31   ;;  %v980_v19 = vmul.f32 %v2892_v47, %v957_v18  ;;  %v981_v45 = vmul.f32 %v2895_v52, %v953_v13  ;;  %v952_v57 = vsel %vm4664_vm6, %v939_v3, %v947_v58  ;;  %v956_v60 = vsel %vm4665_vm14, %v931_v39, %v939_v3  ;;  %vm4672_vm10 = vmmov %vm4668_vm1 }
 0x3c9   :  { %v1019_v53 = vsel %vm4666_vm11, %v3464_v26, %v3488_v27  ;;  %v976_v9 = vmul.f32 %v2892_v47, %v956_v60  ;;  %v977_v48 = vmul.f32 %v2895_v52, %v952_v57  ;;  %1448 = vperm.xlu1 %2349, %v1442_v20   ;;  %2166 = vmatpush1.bf16.msra.mxu0 %v2165_v44  ;;  %v1444_v26 = vld [vmem:[%s4404_s6 + $0x10] sm:$0xff]  ;;  %vm4674_vm15 = vmmov %vm4655_vm0 }
 0x3ca   :  { %v989_v31 = vpop.permute.xlu0 %988  ;;  %v1018_v39 = vsel %vm4655_vm0, %v3472_v16, %v3494_v1  ;;  %v1033_v2 = vmul.f32 %v2789_v56, %v1014_v46  ;;  %2168 = vmatprep.subr.bf16.mxu0 %v2167_v61  ;;  %v2169_v47 = vpack.c.bf16 %v1034_v7, %v1030_v4  ;;  %v1036_v13 = vmul.f32 %v2780_v38, %v1019_v53  ;;  %vm4675_vm6 = vmmov %vm4668_vm1 }
 0x3cb   :  { %v2237_v27 = vpack.c.bf16 %v980_v19, %v976_v9  ;;  %v987_v52 = vpop.permute.xlu1 %986  ;;  %v2235_v54 = vpack.c.bf16 %v981_v45, %v977_v48  ;;  %v1032_v18 = vmul.f32 %v2780_v38, %v1018_v39  ;;  %v1087_v7 = vsel %vm4668_vm1, %v3496_v40, %v3504_v36  ;;  %vm4676_vm14 = vmmov %vm4655_vm0 }
 0x3cc   :  { %1463 = vperm.xlu0 %2348, %v1445_v0   ;;  %v2239_v1 = vpack.c.bf16 %v1037_v12, %v1033_v2  ;;  %v1086_v4 = vsel %vm4669_vm2, %v3502_v15, %v3510_v33  ;;  %v1099_v0 = vmul.f32 %v2672_v55, %v1087_v7  ;;  %v1091_v60 = vsel %vm4672_vm10, %v3512_v24, %v3496_v40  ;;  %vm4677_vm11 = vmmov %vm4655_vm0 }
 0x3cd   :  { %1458 = vperm.xlu1 %2349, %v1444_v26   ;;  %2170 = vmatpush1.bf16.msra.mxu0 %v2169_v47  ;;  %v2241_v19 = vpack.c.bf16 %v1036_v13, %v1032_v18  ;;  %v1095_v57 = vmul.f32 %v2672_v55, %v1086_v4  ;;  %v1079_v12 = vsel %vm4675_vm6, %v3520_v23, %v3512_v24  ;;  %vm4678_vm0 = vmmov %vm4668_vm1  ;;  %vm4684_vm10 = vcmp.lt.s32.totalorder %v2551_v11, 1  ;;  %v1435_v11 = vld [vmem:[%s4403_s5 + $0x28] sm:$0xff] }
 0x3ce   :  { %v997_v58 = vpop.permute.xlu0 %996  ;;  %2236 = vmatprep.subr.bf16.mxu1 %v2235_v54  ;;  %v1078_v26 = vsel %vm4678_vm0, %v3526_v29, %v3518_v6  ;;  %v1101_v13 = vmul.f32 %v2887_v49, %v1079_v12  ;;  %vm4680_vm1 = vmmov %vm4671_vm5 }
 0x3cf   :  { %v1025_v16 = vsel %vm4667_vm8, %v989_v31, %v997_v58  ;;  %2238 = vmatpush1.bf16.msra.mxu1 %v2237_v27  ;;  %v995_v20 = vpop.permute.xlu1 %994  ;;  %v2175_v47 = vpack.c.bf16 %v1099_v0, %v1095_v57  ;;  %vm4679_vm8 = vmmov %vm4678_vm0  ;;  %v1097_v7 = vmul.f32 %v2887_v49, %v1078_v26 }
 0x3d0   :  { %v1043_v22 = vmul.f32 %v2634_v43, %v1025_v16  ;;  %2240 = vmatprep.subr.bf16.mxu1 %v2239_v1  ;;  %v1024_v46 = vsel %vm4670_vm9, %v987_v52, %v995_v20  ;;  %vm4681_vm2 = vmmov %vm4680_vm1 }
 0x3d1   :  { %v1039_v45 = vmul.f32 %v2634_v43, %v1024_v46  ;;  %v1090_v43 = vsel %vm4673_vm12, %v3518_v6, %v3502_v15  ;;  %v1098_v15 = vmul.f32 %v2768_v42, %v1091_v60  ;;  %vm4682_vm9 = vmmov %vm4678_vm0 }
 0x3d2   :  { %v1013_v44 = vpop.permute.xlu0 %1012  ;;  %v1094_v27 = vmul.f32 %v2768_v42, %v1090_v43  ;;  %v1082_v1 = vsel %vm4682_vm9, %v3510_v33, %v3526_v29  ;;  %v2247_v29 = vpack.c.bf16 %v1101_v13, %v1097_v7  ;;  %vm4685_vm12 = vmmov %vm4684_vm10  ;;  %v4699_v7 = vld [vmem:[#allocation7_spill] sm:$0xff] }
 0x3d3   :  { %v1029_v3 = vsel %vm4671_vm5, %v1013_v44, %v989_v31  ;;  %2242 = vmatpush1.bf16.msra.mxu1 %v2241_v19  ;;  %v1011_v53 = vpop.permute.xlu1 %1010  ;;  %v2171_v9 = vpack.c.bf16 %v1043_v22, %v1039_v45  ;;  %v1096_v19 = vmul.f32 %v2882_v35, %v1082_v1  ;;  %vm4683_vm5 = vmmov %vm4678_vm0 }
 0x3d4   :  { %v1042_v61 = vmul.f32 %v2689_v62, %v1029_v3  ;;  %v1028_v31 = vsel %vm4674_vm15, %v1011_v53, %v987_v52  ;;  %vm4686_vm15 = vmmov %vm4678_vm0 }
 0x3d5   :  { %v1038_v40 = vmul.f32 %v2689_v62, %v1028_v31  ;;  %2172 = vmatprep.subr.bf16.mxu0 %v2171_v9  ;;  %vm4687_vm6 = vmmov %vm4678_vm0 }
 0x3d6   :  { %v1005_v48 = vpop.permute.xlu0 %1004 }
 0x3d7   :  { %v1017_v39 = vsel %vm4676_vm14, %v1005_v48, %v1013_v44  ;;  %v1021_v2 = vsel %vm4677_vm11, %v997_v58, %v1005_v48  ;;  %v2173_v24 = vpack.c.bf16 %v1042_v61, %v1038_v40  ;;  %v1003_v54 = vpop.permute.xlu1 %1002  ;;  %v1083_v58 = vsel %vm4679_vm8, %v3504_v36, %v3520_v23  ;;  %vm4688_vm14 = vmmov %vm4684_vm10 }
 0x3d8   :  { %v1044_v62 = vmul.f32 %v2780_v38, %v1021_v2  ;;  %v1045_v52 = vmul.f32 %v2789_v56, %v1017_v39  ;;  %v1016_v18 = vsel %vm4680_vm1, %v1003_v54, %v1011_v53  ;;  %v1020_v6 = vsel %vm4681_vm2, %v995_v20, %v1003_v54  ;;  %v4689_v2 = vld [vmem:[#allocation32_spill] sm:$0xff]  ;;  %vm4690_vm11 = vmmov %vm4684_vm10  ;;  %v4696_v54 = vld [vmem:[#allocation34_spill] sm:$0xff] }
 0x3d9   :  { %v1040_v4 = vmul.f32 %v2780_v38, %v1020_v6  ;;  %v1041_v36 = vmul.f32 %v2789_v56, %v1016_v18  ;;  %2174 = vmatpush1.bf16.msra.mxu0 %v2173_v24  ;;  %v2177_v23 = vpack.c.bf16 %v1098_v15, %v1094_v27  ;;  %v1100_v20 = vmul.f32 %v2882_v35, %v1083_v58  ;;  %vm4692_vm8 = vmmov %vm4684_vm10 }
 0x3da   :  { %v1053_v16 = vpop.permute.xlu0 %1052  ;;  %2176 = vmatprep.subr.bf16.mxu0 %v2175_v47  ;;  %v1151_v38 = vsel %vm4684_vm10, %v3528_v25, %v3536_v59  ;;  %v1150_v56 = vsel %vm4685_vm12, %v3534_v32, %v3542_v63  ;;  %v1155_v48 = vsel %vm4688_vm14, %v3544_v14, %v3528_v25  ;;  %v4691_v47 = vld [vmem:[#allocation33_spill] sm:$0xff]  ;;  %vm4693_vm1 = vmmov %vm4678_vm0 }
 0x3db   :  { %v2245_v22 = vpack.c.bf16 %v1044_v62, %v1040_v4  ;;  %v1051_v46 = vpop.permute.xlu1 %1050  ;;  %v2243_v44 = vpack.c.bf16 %v1045_v52, %v1041_v36  ;;  %v2249_v57 = vpack.c.bf16 %v1100_v20, %v1096_v19  ;;  %v1163_v43 = vmul.f32 %v2625_v41, %v1151_v38  ;;  %vm4694_vm2 = vmmov %vm4678_vm0  ;;  %v4695_v52 = vld [vmem:[#allocation5_spill] sm:$0xff]  ;;  %v4703_v38 = vld [vmem:[#allocation6_spill] sm:$0xff] }
 0x3dc   :  { %v1159_v31 = vmul.f32 %v2625_v41, %v1150_v56  ;;  %v1143_v27 = vsel %vm4692_vm8, %v4691_v47, %v3544_v14  ;;  %vm4697_vm9 = vmmov %vm4692_vm8 }
 0x3dd   :  { %2178 = vmatpush1.bf16.msra.mxu0 %v2177_v23  ;;  %2244 = vmatprep.subr.bf16.mxu1 %v2243_v44  ;;  %v1142_v58 = vsel %vm4697_vm9, %v4696_v54, %v4689_v2  ;;  %v1165_v4 = vmul.f32 %v4699_v7, %v1143_v27  ;;  %vm4700_vm10 = vmmov %vm4678_vm0  ;;  %v4712_v27 = vld [vmem:[#allocation38_spill] sm:$0xff] }
 0x3de   :  { %v1061_v45 = vpop.permute.xlu0 %1060  ;;  %2246 = vmatpush1.bf16.msra.mxu1 %v2245_v22  ;;  %v2183_v13 = vpack.c.bf16 %v1163_v43, %v1159_v31  ;;  %vm4701_vm12 = vmmov %vm4678_vm0  ;;  %v1161_v44 = vmul.f32 %v4699_v7, %v1142_v58 }
 0x3df   :  { %v1089_v33 = vsel %vm4683_vm5, %v1053_v16, %v1061_v45  ;;  %2248 = vmatprep.subr.bf16.mxu1 %v2247_v29  ;;  %v1059_v0 = vpop.permute.xlu1 %1058  ;;  %vm4698_vm5 = vmmov %vm4692_vm8 }
 0x3e0   :  { %v1107_v3 = vmul.f32 %v2672_v55, %v1089_v33  ;;  %v1088_v60 = vsel %vm4686_vm15, %v1051_v46, %v1059_v0  ;;  %v1147_v1 = vsel %vm4698_vm5, %v3536_v59, %v4691_v47  ;;  %vm4702_vm15 = vmmov %vm4698_vm5 }
 0x3e1   :  { %v1103_v53 = vmul.f32 %v2672_v55, %v1088_v60  ;;  %v1154_v55 = vsel %vm4690_vm11, %v4689_v2, %v3534_v32  ;;  %v1162_v32 = vmul.f32 %v4695_v52, %v1155_v48  ;;  %v1164_v56 = vmul.f32 %v4703_v38, %v1147_v1  ;;  %vm4705_vm14 = vmmov %vm4698_vm5 }
 0x3e2   :  { %v1077_v61 = vpop.permute.xlu0 %1076  ;;  %2250 = vmatpush1.bf16.msra.mxu1 %v2249_v57  ;;  %v1158_v18 = vmul.f32 %v4695_v52, %v1154_v55  ;;  %v2255_v57 = vpack.c.bf16 %v1165_v4, %v1161_v44  ;;  %vm4706_vm11 = vmmov %vm4698_vm5  ;;  %v4718_v4 = vld [vmem:[#allocation25_spill] sm:$0xff] }
 0x3e3   :  { %v1093_v9 = vsel %vm4687_vm6, %v1077_v61, %v1053_v16  ;;  %v1075_v40 = vpop.permute.xlu1 %1074  ;;  %v2179_v39 = vpack.c.bf16 %v1107_v3, %v1103_v53  ;;  %vm4704_vm6 = vmmov %vm4698_vm5 }
 0x3e4   :  { %v1106_v12 = vmul.f32 %v2768_v42, %v1093_v9  ;;  %v1092_v15 = vsel %vm4678_vm0, %v1075_v40, %v1051_v46  ;;  %v1146_v46 = vsel %vm4702_vm15, %v3542_v63, %v4696_v54  ;;  %v2185_v19 = vpack.c.bf16 %v1162_v32, %v1158_v18  ;;  %vm4707_vm0 = vmmov %vm4698_vm5  ;;  %v4716_v18 = vld [vmem:[#allocation27_spill] sm:$0xff] }
 0x3e5   :  { %v1102_v25 = vmul.f32 %v2768_v42, %v1092_v15  ;;  %2180 = vmatprep.subr.bf16.mxu0 %v2179_v39  ;;  %v1160_v3 = vmul.f32 %v4703_v38, %v1146_v46  ;;  %vm4708_vm8 = vmmov %vm4707_vm0  ;;  %v4710_v15 = vld [vmem:[#allocation37_spill] sm:$0xff] }
 0x3e6   :  { %v1069_v26 = vpop.permute.xlu0 %1068  ;;  %vm4715_vm9 = vmmov %vm4707_vm0 }
 0x3e7   :  { %v1081_v24 = vsel %vm4693_vm1, %v1069_v26, %v1077_v61  ;;  %v1085_v62 = vsel %vm4694_vm2, %v1061_v45, %v1069_v26  ;;  %v2181_v14 = vpack.c.bf16 %v1106_v12, %v1102_v25  ;;  %v1067_v16 = vpop.permute.xlu1 %1066  ;;  %v2257_v60 = vpack.c.bf16 %v1164_v56, %v1160_v3  ;;  %vm4709_vm1 = vmmov %vm4707_vm0  ;;  %v4711_v26 = vld [vmem:[#allocation35_spill] sm:$0xff]  ;;  %v4713_v25 = vld [vmem:[#allocation36_spill] sm:$0xff] }
 0x3e8   :  { %v1108_v42 = vmul.f32 %v2882_v35, %v1085_v62  ;;  %v1109_v6 = vmul.f32 %v2887_v49, %v1081_v24  ;;  %v1080_v36 = vsel %vm4700_vm10, %v1067_v16, %v1075_v40  ;;  %v1084_v23 = vsel %vm4701_vm12, %v1059_v0, %v1067_v16  ;;  %vm4714_vm2 = vmmov %vm4707_vm0  ;;  %v4725_v56 = vld [vmem:[#allocation39_spill] sm:$0xff] }
 0x3e9   :  { %v1104_v20 = vmul.f32 %v2882_v35, %v1084_v23  ;;  %v1105_v59 = vmul.f32 %v2887_v49, %v1080_v36  ;;  %2182 = vmatpush1.bf16.msra.mxu0 %v2181_v14  ;;  %v1211_v47 = vsel %vm338_vm3, %v4711_v26, %v4710_v15  ;;  %v1210_v24 = vsel %vm338_vm3, %v4713_v25, %v4712_v27  ;;  %v4717_v14 = vld [vmem:[#allocation26_spill] sm:$0xff]  ;;  %v4719_v36 = vld [vmem:[#allocation24_spill] sm:$0xff] }
 0x3ea   :  { %v1117_v22 = vpop.permute.xlu0 %1116  ;;  %2184 = vmatprep.subr.bf16.mxu0 %v2183_v13  ;;  %v2193_v23 = vpack.c.bf16 %v4719_v36, %v4718_v4  ;;  %v2269_v4 = vpack.c.bf16 %v3478_v28, %v3486_v10 }
 0x3eb   :  { %v2253_v45 = vpack.c.bf16 %v1108_v42, %v1104_v20  ;;  %v1115_v33 = vpop.permute.xlu1 %1114  ;;  %v2251_v29 = vpack.c.bf16 %v1109_v6, %v1105_v59  ;;  %v2191_v42 = vpack.c.bf16 %v4717_v14, %v4716_v18  ;;  %v4721_v20 = vld [vmem:[#allocation29_spill] sm:$0xff]  ;;  %v4722_v59 = vld [vmem:[#allocation28_spill] sm:$0xff]  ;;  %v2267_v14 = vpack.c.bf16 %v3466_v37, %v3474_v30 }
 0x3ed   :  { %2186 = vmatpush1.bf16.msra.mxu0 %v2185_v19  ;;  %2252 = vmatprep.subr.bf16.mxu1 %v2251_v29  ;;  %v2263_v19 = vpack.c.bf16 %v4722_v59, %v4721_v20 }
 0x3ee   :  { %v1125_v0 = vpop.permute.xlu0 %1124  ;;  %2254 = vmatpush1.bf16.msra.mxu1 %v2253_v45  ;;  %v4723_v45 = vld [vmem:[#allocation31_spill] sm:$0xff] }
 0x3ef   :  { %v1153_v63 = vsel %vm4704_vm6, %v1117_v22, %v1125_v0  ;;  %2256 = vmatprep.subr.bf16.mxu1 %v2255_v57  ;;  %v1123_v49 = vpop.permute.xlu1 %1122 }
 0x3f0   :  { %v1171_v35 = vmul.f32 %v2625_v41, %v1153_v63  ;;  %v1152_v61 = vsel %vm4705_vm14, %v1115_v33, %v1123_v49 }
 0x3f1   :  { %v1167_v9 = vmul.f32 %v2625_v41, %v1152_v61  ;;  %v2195_v61 = vpack.c.bf16 %v3449_v34, %v3462_v50  ;;  %v4729_v34 = vld [vmem:[#allocation11_spill] sm:$0xff] }
 0x3f2   :  { %v1141_v53 = vpop.permute.xlu0 %1140  ;;  %2258 = vmatpush1.bf16.msra.mxu1 %v2257_v60 }
 0x3f3   :  { %v1157_v43 = vsel %vm4706_vm11, %v1141_v53, %v1117_v22  ;;  %v1139_v48 = vpop.permute.xlu1 %1138  ;;  %v2187_v12 = vpack.c.bf16 %v1171_v35, %v1167_v9  ;;  %v4720_v22 = vld [vmem:[#allocation8_spill] sm:$0xff]  ;;  %v4727_v35 = vld [vmem:[#allocation41_spill] sm:$0xff]  ;;  %v2197_v9 = vpack.c.bf16 %v3424_v21, %v3441_v17  ;;  %v4730_v17 = vld [vmem:[#allocation14_spill] sm:$0xff] }
 0x3f4   :  { %v1170_v31 = vmul.f32 %v4695_v52, %v1157_v43  ;;  %v1156_v40 = vsel %vm4707_vm0, %v1139_v48, %v1115_v33  ;;  %v1227_v46 = vmul.f32 %v4720_v22, %v1211_v47  ;;  %v1223_v44 = vmul.f32 %v4720_v22, %v1210_v24  ;;  %v4724_v33 = vld [vmem:[#allocation30_spill] sm:$0xff]  ;;  %v4735_v24 = vld [vmem:[#allocation15_spill] sm:$0xff] }
 0x3f5   :  { %v1166_v2 = vmul.f32 %v4695_v52, %v1156_v40  ;;  %2188 = vmatprep.subr.bf16.mxu0 %v2187_v12  ;;  %v2265_v29 = vpack.c.bf16 %v4724_v33, %v4723_v45  ;;  %v1219_v60 = vsel %vm338_vm3, %v4727_v35, %v4725_v56  ;;  %v4728_v43 = vld [vmem:[#allocation42_spill] sm:$0xff] }
 0x3f6   :  { %v1133_v39 = vpop.permute.xlu0 %1132  ;;  %v2199_v21 = vpack.c.bf16 %v1227_v46, %v1223_v44  ;;  %v4738_v44 = vld [vmem:[#allocation48_spill] sm:$0xff] }
 0x3f7   :  { %v1145_v55 = vsel %vm4708_vm8, %v1133_v39, %v1141_v53  ;;  %v1149_v41 = vsel %vm4709_vm1, %v1125_v0, %v1133_v39  ;;  %v2189_v62 = vpack.c.bf16 %v1170_v31, %v1166_v2  ;;  %v1131_v54 = vpop.permute.xlu1 %1130  ;;  %v1206_v31 = vsel %vm338_vm3, %v4712_v27, %v4728_v43  ;;  %v4731_v2 = vld [vmem:[#allocation45_spill] sm:$0xff] }
 0x3f8   :  { %v1172_v52 = vmul.f32 %v4703_v38, %v1149_v41  ;;  %v1173_v32 = vmul.f32 %v4699_v7, %v1145_v55  ;;  %v1144_v58 = vsel %vm4714_vm2, %v1131_v54, %v1139_v48  ;;  %v1148_v13 = vsel %vm4715_vm9, %v1123_v49, %v1131_v54  ;;  %v4732_v55 = vld [vmem:[#allocation43_spill] sm:$0xff] }
 0x3f9   :  { %v1168_v16 = vmul.f32 %v4703_v38, %v1148_v13  ;;  %v1169_v1 = vmul.f32 %v4699_v7, %v1144_v58  ;;  %2190 = vmatpush1.bf16.msra.mxu0 %v2189_v62  ;;  %v1215_v7 = vsel %vm338_vm3, %v4725_v56, %v4711_v26  ;;  %v4726_v38 = vld [vmem:[#allocation40_spill] sm:$0xff]  ;;  %v1207_v49 = vsel %vm338_vm3, %v4710_v15, %v4727_v35  ;;  %v4733_v15 = vld [vmem:[#allocation46_spill] sm:$0xff] }
 0x3fa   :  { %v1189_v6 = vpop.permute.xlu0 %1188  ;;  %2192 = vmatprep.subr.bf16.mxu0 %v2191_v42  ;;  %v1214_v3 = vsel %vm338_vm3, %v4726_v38, %v4713_v25  ;;  %v1218_v48 = vsel %vm338_vm3, %v4728_v43, %v4726_v38  ;;  %v1226_v50 = vmul.f32 %v4729_v34, %v1215_v7  ;;  %v1228_v39 = vmul.f32 %v4730_v17, %v1207_v49  ;;  %v4734_v26 = vld [vmem:[#allocation44_spill] sm:$0xff]  ;;  %v4740_v7 = vld [vmem:[#allocation13_spill] sm:$0xff] }
 0x3fb   :  { %v2261_v0 = vpack.c.bf16 %v1172_v52, %v1168_v16  ;;  %v1187_v63 = vpop.permute.xlu1 %1186  ;;  %v2259_v57 = vpack.c.bf16 %v1173_v32, %v1169_v1  ;;  %v1222_v40 = vmul.f32 %v4729_v34, %v1214_v3  ;;  %v1275_v41 = vsel %vm355_vm4, %v4732_v55, %v4731_v2  ;;  %v4736_v42 = vld [vmem:[#allocation12_spill] sm:$0xff]  ;;  %v4741_v3 = vld [vmem:[#allocation50_spill] sm:$0xff] }
 0x3fc   :  { %v1274_v47 = vsel %vm355_vm4, %v4734_v26, %v4733_v15  ;;  %v1229_v62 = vmul.f32 %v4735_v24, %v1219_v60  ;;  %v1224_v52 = vmul.f32 %v4730_v17, %v1206_v31  ;;  %v1225_v32 = vmul.f32 %v4735_v24, %v1218_v48 }
 0x3fd   :  { %2194 = vmatpush1.bf16.msra.mxu0 %v2193_v23  ;;  %2260 = vmatprep.subr.bf16.mxu1 %v2259_v57  ;;  %v1291_v16 = vmul.f32 %v4736_v42, %v1275_v41  ;;  %v1287_v1 = vmul.f32 %v4736_v42, %v1274_v47  ;;  %v2201_v36 = vpack.c.bf16 %v1226_v50, %v1222_v40  ;;  %v4737_v23 = vld [vmem:[#allocation47_spill] sm:$0xff] }
 0x3fe   :  { %v1197_v53 = vpop.permute.xlu0 %1196  ;;  %2196 = vmatprep.subr.bf16.mxu0 %v2195_v61  ;;  %2262 = vmatpush1.bf16.msra.mxu1 %v2261_v0  ;;  %v2273_v30 = vpack.c.bf16 %v1228_v39, %v1224_v52  ;;  %v1278_v20 = vsel %vm355_vm4, %v4738_v44, %v4734_v26  ;;  %v2271_v59 = vpack.c.bf16 %v1229_v62, %v1225_v32  ;;  %v4743_v26 = vld [vmem:[#allocation16_spill] sm:$0xff] }
 0x3ff   :  { %v1213_v12 = vsel %vm338_vm3, %v1189_v6, %v1197_v53  ;;  %2264 = vmatprep.subr.bf16.mxu1 %v2263_v19  ;;  %v1195_v25 = vpop.permute.xlu1 %1194  ;;  %v4739_v19 = vld [vmem:[#allocation49_spill] sm:$0xff]  ;;  %v1282_v0 = vsel %vm355_vm4, %v4741_v3, %v4738_v44  ;;  %v1286_v57 = vmul.f32 %v4740_v7, %v1278_v20 }
 0x400   :  { %v1235_v27 = vmul.f32 %v4720_v22, %v1213_v12  ;;  %v1212_v54 = vsel %vm338_vm3, %v1187_v63, %v1195_v25  ;;  %v1283_v45 = vsel %vm355_vm4, %v4739_v19, %v4737_v23 }
 0x401   :  { %v1231_v13 = vmul.f32 %v4720_v22, %v1212_v54  ;;  %2198 = vmatpush1.bf16.msra.mxu0 %v2197_v9  ;;  %v1279_v22 = vsel %vm355_vm4, %v4737_v23, %v4732_v55  ;;  %v4742_v9 = vld [vmem:[#allocation19_spill] sm:$0xff] }
 0x402   :  { %v1181_v58 = vpop.permute.xlu0 %1180  ;;  %2200 = vmatprep.subr.bf16.mxu0 %v2199_v21  ;;  %2266 = vmatpush1.bf16.msra.mxu1 %v2265_v29  ;;  %v1290_v38 = vmul.f32 %v4740_v7, %v1279_v22  ;;  %v1293_v43 = vmul.f32 %v4742_v9, %v1283_v45  ;;  %v1289_v50 = vmul.f32 %v4742_v9, %v1282_v0  ;;  %v4748_v0 = vld [vmem:[#allocation9_spill] sm:$0xff] }
 0x403   :  { %v1217_v18 = vsel %vm338_vm3, %v1181_v58, %v1189_v6  ;;  %2268 = vmatprep.subr.bf16.mxu1 %v2267_v14  ;;  %v1179_v46 = vpop.permute.xlu1 %1178  ;;  %v2203_v37 = vpack.c.bf16 %v1235_v27, %v1231_v13 }
 0x404   :  { %v1234_v6 = vmul.f32 %v4729_v34, %v1217_v18  ;;  %v1216_v28 = vsel %vm338_vm3, %v1179_v46, %v1187_v63  ;;  %v2207_v63 = vpack.c.bf16 %v1291_v16, %v1287_v1  ;;  %v2209_v39 = vpack.c.bf16 %v1290_v38, %v1286_v57  ;;  %v4749_v57 = vld [vmem:[#allocation55_spill] sm:$0xff] }
 0x405   :  { %v1230_v33 = vmul.f32 %v4729_v34, %v1216_v28  ;;  %2202 = vmatpush1.bf16.msra.mxu0 %v2201_v36  ;;  %v1270_v34 = vsel %vm355_vm4, %v4733_v15, %v4741_v3  ;;  %v4747_v38 = vpack.c.bf16 %v3649_v51, %v3656_v8  ;;  %v4751_v51 = vld [vmem:[#allocation53_spill] sm:$0xff] }
 0x406   :  { %v1205_v10 = vpop.permute.xlu0 %1204  ;;  %2204 = vmatprep.subr.bf16.mxu0 %v2203_v37  ;;  %2270 = vmatpush1.bf16.msra.mxu1 %v2269_v4  ;;  %v1288_v27 = vmul.f32 %v4743_v26, %v1270_v34 }
 0x407   :  { %v1209_v29 = vsel %vm338_vm3, %v1197_v53, %v1205_v10  ;;  %v1221_v56 = vsel %vm338_vm3, %v1205_v10, %v1181_v58  ;;  %v2205_v35 = vpack.c.bf16 %v1234_v6, %v1230_v33  ;;  %2272 = vmatprep.subr.bf16.mxu1 %v2271_v59  ;;  %v1203_v61 = vpop.permute.xlu1 %1202  ;;  %v1271_v53 = vsel %vm355_vm4, %v4731_v2, %v4739_v19  ;;  %v4744_v59 = vld [vmem:[#allocation51_spill] sm:$0xff]  ;;  %v4745_v19 = vld [vmem:[#allocation52_spill] sm:$0xff] }
 0x408   :  { %v1236_v49 = vmul.f32 %v4730_v17, %v1209_v29  ;;  %v1237_v60 = vmul.f32 %v4735_v24, %v1221_v56  ;;  %v1208_v31 = vsel %vm338_vm3, %v1195_v25, %v1203_v61  ;;  %v1220_v48 = vsel %vm338_vm3, %v1203_v61, %v1179_v46 }
 0x409   :  { %v1232_v40 = vmul.f32 %v4730_v17, %v1208_v31  ;;  %v1233_v21 = vmul.f32 %v4735_v24, %v1220_v48  ;;  %2206 = vmatpush1.bf16.msra.mxu0 %v2205_v35  ;;  %v1292_v47 = vmul.f32 %v4743_v26, %v1271_v53  ;;  %v2279_v17 = vpack.c.bf16 %v1293_v43, %v1289_v50  ;;  %v4754_v31 = vld [vmem:[#allocation10_spill] sm:$0xff] }
 0x40a   :  { %v1253_v12 = vpop.permute.xlu0 %1252  ;;  %2208 = vmatprep.subr.bf16.mxu0 %v2207_v63  ;;  %2274 = vmatpush1.bf16.msra.mxu1 %v2273_v30  ;;  %v4746_v45 = vpack.c.bf16 %v4744_v59, %v4745_v19  ;;  %v4750_v35 = vpack.c.bf16 %v3672_v5, %v4749_v57  ;;  %v1440_v57 = vld [vmem:[%s4403_s5 + $0x50] sm:$0xff]  ;;  %vm1466_vm3 = vcmask 261120  }
 0x40b   :  { %v2277_v2 = vpack.c.bf16 %v1236_v49, %v1232_v40  ;;  %v1251_v55 = vpop.permute.xlu1 %1250  ;;  %v2275_v41 = vpack.c.bf16 %v1237_v60, %v1233_v21  ;;  %v2281_v52 = vpack.c.bf16 %v1292_v47, %v1288_v27 }
 0x40d   :  { %2210 = vmatpush1.bf16.msra.mxu0 %v2209_v39  ;;  %2276 = vmatprep.subr.bf16.mxu1 %v2275_v41 }
 0x40e   :  { %v1261_v25 = vpop.permute.xlu0 %1260  ;;  %2278 = vmatpush1.bf16.msra.mxu1 %v2277_v2 }
 0x40f   :  { %v1277_v15 = vsel %vm355_vm4, %v1253_v12, %v1261_v25  ;;  %2280 = vmatprep.subr.bf16.mxu1 %v2279_v17  ;;  %v1259_v62 = vpop.permute.xlu1 %1258 }
 0x410   :  { %v1299_v24 = vmul.f32 %v4736_v42, %v1277_v15  ;;  %v1276_v32 = vsel %vm355_vm4, %v1251_v55, %v1259_v62 }
 0x411   :  { %v1295_v58 = vmul.f32 %v4736_v42, %v1276_v32  ;;  %v4757_v32 = vld [vmem:[#allocation56_spill] sm:$0xff] }
 0x412   :  { %v1245_v54 = vpop.permute.xlu0 %1244  ;;  %2282 = vmatpush1.bf16.msra.mxu1 %v2281_v52  ;;  %v1430_v52 = vld [vmem:[%s4403_s5] sm:$0xff] }
 0x413   :  { %v1281_v13 = vsel %vm355_vm4, %v1245_v54, %v1253_v12  ;;  %v1243_v14 = vpop.permute.xlu1 %1242  ;;  %v2211_v16 = vpack.c.bf16 %v1299_v24, %v1295_v58 }
 0x414   :  { %v1298_v18 = vmul.f32 %v4740_v7, %v1281_v13  ;;  %v1280_v1 = vsel %vm355_vm4, %v1243_v14, %v1251_v55  ;;  %v4755_v55 = vld [vmem:[#allocation17_spill] sm:$0xff] }
 0x415   :  { %v1294_v36 = vmul.f32 %v4740_v7, %v1280_v1  ;;  %2212 = vmatprep.subr.bf16.mxu0 %v2211_v16  ;;  %v1434_v16 = vld [vmem:[%s4403_s5 + $0x20] sm:$0xff] }
 0x416   :  { %v1269_v4 = vpop.permute.xlu0 %1268 }
 0x417   :  { %v1273_v23 = vsel %vm355_vm4, %v1261_v25, %v1269_v4  ;;  %v1285_v42 = vsel %vm355_vm4, %v1269_v4, %v1245_v54  ;;  %v2213_v22 = vpack.c.bf16 %v1298_v18, %v1294_v36  ;;  %v1267_v37 = vpop.permute.xlu1 %1266  ;;  %v4758_v54 = vld [vmem:[#allocation57_spill] sm:$0xff]  ;;  %v4760_v4 = vld [vmem:[#allocation58_spill] sm:$0xff]  ;;  %v4761_v36 = vld [vmem:[#allocation59_spill] sm:$0xff] }
 0x418   :  { %v1300_v6 = vmul.f32 %v4743_v26, %v1273_v23  ;;  %v1301_v46 = vmul.f32 %v4742_v9, %v1285_v42  ;;  %v1272_v30 = vsel %vm355_vm4, %v1259_v62, %v1267_v37  ;;  %v1284_v44 = vsel %vm355_vm4, %v1267_v37, %v1243_v14 }
 0x419   :  { %v1296_v28 = vmul.f32 %v4743_v26, %v1272_v30  ;;  %v1297_v10 = vmul.f32 %v4742_v9, %v1284_v44  ;;  %2214 = vmatpush1.bf16.msra.mxu0 %v2213_v22  ;;  %v4752_v9 = vld [vmem:[#allocation54_spill] sm:$0xff]  ;;  %v4759_v58 = vpack.c.bf16 %v4757_v32, %v4758_v54  ;;  %v4762_v23 = vpack.c.bf16 %v4760_v4, %v4761_v36  ;;  %v1433_v22 = vld [vmem:[%s4403_s5 + $0x18] sm:$0xff]  ;;  %v4764_v30 = vld [vmem:[#allocation61_spill] sm:$0xff] }
 0x41a   :  { %v1317_v20 = vpop.permute.xlu0 %1316  ;;  %2216 = vmatprep.subr.bf16.mxu0 %v4746_v45  ;;  %v4753_v43 = vpack.c.bf16 %v4751_v51, %v4752_v9  ;;  %v4756_v26 = vld [vmem:[#allocation18_spill] sm:$0xff]  ;;  %v4765_v44 = vld [vmem:[#allocation63_spill] sm:$0xff] }
 0x41b   :  { %v2285_v33 = vpack.c.bf16 %v1300_v6, %v1296_v28  ;;  %v1315_v29 = vpop.permute.xlu1 %1314  ;;  %v2283_v56 = vpack.c.bf16 %v1301_v46, %v1297_v10  ;;  %v1437_v6 = vld [vmem:[%s4403_s5 + $0x38] sm:$0xff]  ;;  %v4771_v9 = vld [vmem:[#allocation23_spill] sm:$0xff] }
 0x41c   :  { %v4763_v46 = vld [vmem:[#allocation20_spill] sm:$0xff] }
 0x41d   :  { %2218 = vmatpush1.bf16.msra.mxu0 %v4747_v38  ;;  %2284 = vmatprep.subr.bf16.mxu1 %v2283_v56  ;;  %v4768_v56 = vld [vmem:[#allocation62_spill] sm:$0xff]  ;;  %v4770_v38 = vld [vmem:[#allocation21_spill] sm:$0xff] }
 0x41e   :  { %v1325_v7 = vpop.permute.xlu0 %1324  ;;  %2286 = vmatpush1.bf16.msra.mxu1 %v2285_v33  ;;  %v1436_v33 = vld [vmem:[%s4403_s5 + $0x30] sm:$0xff] }
 0x41f   :  { %v1341_v3 = vsel %vm372_vm7, %v1317_v20, %v1325_v7  ;;  %2288 = vmatprep.subr.bf16.mxu1 %v4750_v35  ;;  %v1323_v49 = vpop.permute.xlu1 %1322 }
 0x420   :  { %v1363_v63 = vmul.f32 %v4748_v0, %v1341_v3  ;;  %v1340_v60 = vsel %vm372_vm7, %v1315_v29, %v1323_v49 }
 0x421   :  { %v1359_v53 = vmul.f32 %v4748_v0, %v1340_v60 }
 0x422   :  { %v1309_v61 = vpop.permute.xlu0 %1308  ;;  %2290 = vmatpush1.bf16.msra.mxu1 %v4753_v43 }
 0x423   :  { %v1345_v8 = vsel %vm372_vm7, %v1309_v61, %v1317_v20  ;;  %v1307_v12 = vpop.permute.xlu1 %1306  ;;  %v2219_v34 = vpack.c.bf16 %v1363_v63, %v1359_v53  ;;  %v4766_v20 = vpack.c.bf16 %v4764_v30, %v4765_v44 }
 0x424   :  { %v1362_v48 = vmul.f32 %v4754_v31, %v1345_v8  ;;  %v1344_v5 = vsel %vm372_vm7, %v1307_v12, %v1315_v29  ;;  %v4767_v29 = vld [vmem:[#allocation60_spill] sm:$0xff]  ;;  %v1439_v8 = vld [vmem:[%s4403_s5 + $0x48] sm:$0xff] }
 0x425   :  { %v1358_v40 = vmul.f32 %v4754_v31, %v1344_v5  ;;  %2220 = vmatprep.subr.bf16.mxu0 %v2219_v34  ;;  %v4772_v31 = vld [vmem:[#allocation22_spill] sm:$0xff] }
 0x426   :  { %v1333_v50 = vpop.permute.xlu0 %1332 }
 0x427   :  { %v1337_v21 = vsel %vm372_vm7, %v1325_v7, %v1333_v50  ;;  %v1349_v39 = vsel %vm372_vm7, %v1333_v50, %v1309_v61  ;;  %v2221_v2 = vpack.c.bf16 %v1362_v48, %v1358_v40  ;;  %v1331_v27 = vpop.permute.xlu1 %1330  ;;  %v4769_v7 = vpack.c.bf16 %v4767_v29, %v4768_v56 }
 0x428   :  { %v1364_v41 = vmul.f32 %v4755_v55, %v1337_v21  ;;  %v1365_v47 = vmul.f32 %v4756_v26, %v1349_v39  ;;  %v1336_v25 = vsel %vm372_vm7, %v1323_v49, %v1331_v27  ;;  %v1348_v15 = vsel %vm372_vm7, %v1331_v27, %v1307_v12  ;;  %v1432_v21 = vld [vmem:[%s4403_s5 + $0x10] sm:$0xff] }
 0x429   :  { %v1360_v24 = vmul.f32 %v4755_v55, %v1336_v25  ;;  %v1361_v62 = vmul.f32 %v4756_v26, %v1348_v15  ;;  %2222 = vmatpush1.bf16.msra.mxu0 %v2221_v2  ;;  %v4773_v39 = vmov 0.0   ;;  %v1441_v26 = vld [vmem:[%s4403_s5 + $0x58] sm:$0xff] }
 0x42a   :  { %v1381_v17 = vpop.permute.xlu0 %1380  ;;  %2224 = vmatprep.subr.bf16.mxu0 %v4759_v58 }
 0x42b   :  { %v2293_v13 = vpack.c.bf16 %v1364_v41, %v1360_v24  ;;  %v1379_v18 = vpop.permute.xlu1 %1378  ;;  %v2291_v14 = vpack.c.bf16 %v1365_v47, %v1361_v62  ;;  %v1438_v41 = vld [vmem:[%s4403_s5 + $0x40] sm:$0xff] }
 0x42c   :  { %1544 = vmatmul.mubr.f32.vlgmr.msra.gmra.mrb[8].mxu0 %v1430_v52 }
 0x42d   :  { %2226 = vmatpush1.bf16.msra.mxu0 %v4762_v23  ;;  %2292 = vmatprep.subr.bf16.mxu1 %v2291_v14 }
 0x42e   :  { %v1389_v1 = vpop.permute.xlu0 %1388  ;;  %2294 = vmatpush1.bf16.msra.mxu1 %v2293_v13  ;;  %1549 = vmatprep.mubr.f32.mxu0 %v1434_v16 }
 0x42f   :  { %v1405_v42 = vsel %vm389_vm13, %v1381_v17, %v1389_v1  ;;  %2296 = vmatprep.subr.bf16.mxu1 %v4766_v20  ;;  %v1387_v28 = vpop.permute.xlu1 %1386 }
 0x430   :  { %v1427_v37 = vmul.f32 %v4763_v46, %v1405_v42  ;;  %v1404_v10 = vsel %vm389_vm13, %v1379_v18, %v1387_v28  ;;  %1550 = vmatmul.mubr.f32.gmra.mrb[10].mxu0 %v1433_v22 }
 0x431   :  { %v1423_v19 = vmul.f32 %v4763_v46, %v1404_v10  ;;  %1722 = vmatmul.mubr.f32.vlgmr.msra.gmra.mrb[8].mxu1 %v1430_v52  ;;  %1555 = vmatprep.mubr.f32.mxu0 %v1437_v6 }
 0x432   :  { %v1373_v59 = vpop.permute.xlu0 %1372  ;;  %2298 = vmatpush1.bf16.msra.mxu1 %v4769_v7  ;;  %1727 = vmatprep.mubr.f32.mxu1 %v1434_v16 }
 0x433   :  { %v1409_v45 = vsel %vm389_vm13, %v1373_v59, %v1381_v17  ;;  %v1371_v0 = vpop.permute.xlu1 %1370  ;;  %v2227_v63 = vpack.c.bf16 %v1427_v37, %v1423_v19 }
 0x434   :  { %v1426_v3 = vmul.f32 %v4770_v38, %v1409_v45  ;;  %v1408_v35 = vsel %vm389_vm13, %v1371_v0, %v1379_v18  ;;  %1556 = vmatmul.mubr.f32.gmra.mrb[12].mxu0 %v1436_v33 }
 0x435   :  { %v1422_v60 = vmul.f32 %v4770_v38, %v1408_v35  ;;  %2228 = vmatprep.subr.bf16.mxu0 %v2227_v63  ;;  %1728 = vmatmul.mubr.f32.gmra.mrb[10].mxu1 %v1433_v22 }
 0x436   :  { %v1397_v49 = vpop.permute.xlu0 %1396  ;;  %1561 = vmatprep.mubr.f32.mxu0 %v1440_v57  ;;  %1733 = vmatprep.mubr.f32.mxu1 %v1437_v6 }
 0x437   :  { %v1401_v61 = vsel %vm389_vm13, %v1389_v1, %v1397_v49  ;;  %v1413_v53 = vsel %vm389_vm13, %v1397_v49, %v1373_v59  ;;  %v2229_v51 = vpack.c.bf16 %v1426_v3, %v1422_v60  ;;  %v1395_v12 = vpop.permute.xlu1 %1394 }
 0x438   :  { %v1428_v43 = vmul.f32 %v4771_v9, %v1401_v61  ;;  %v1429_v48 = vmul.f32 %v4772_v31, %v1413_v53  ;;  %v1400_v34 = vsel %vm389_vm13, %v1387_v28, %v1395_v12  ;;  %v1412_v5 = vsel %vm389_vm13, %v1395_v12, %v1371_v0  ;;  %1562 = vmatmul.mubr.f32.gmra.mrb[14].mxu0 %v1439_v8 }
 0x439   :  { %v1424_v50 = vmul.f32 %v4771_v9, %v1400_v34  ;;  %v1425_v40 = vmul.f32 %v4772_v31, %v1412_v5  ;;  %2230 = vmatpush1.bf16.msra.mxu0 %v2229_v51  ;;  %1734 = vmatmul.mubr.f32.gmra.mrb[12].mxu1 %v1436_v33 }
 0x43a   :  { %1632 = vmatprep.mubr.f32.mxu0 %v4773_v39  ;;  %1739 = vmatprep.mubr.f32.mxu1 %v1440_v57 }
 0x43b   :  { %v2301_v2 = vpack.c.bf16 %v1428_v43, %v1424_v50  ;;  %v2299_v55 = vpack.c.bf16 %v1429_v48, %v1425_v40 }
 0x43c   :  { %2135 = vmatmul.mubr.msk.f32.vlgmr.msra.gmra.mrb[8].mxu0 %vm1466_vm3, %v1432_v21 }
 0x43d   :  { %1740 = vmatmul.mubr.f32.gmra.mrb[14].mxu1 %v1439_v8  ;;  %2300 = vmatprep.subr.bf16.mxu1 %v2299_v55 }
 0x43e   :  { %2302 = vmatpush1.bf16.msra.mxu1 %v2301_v2  ;;  %1638 = vmatprep.mubr.f32.mxu0 %v4773_v39 }
 0x43f   :  { %1810 = vmatprep.mubr.f32.mxu1 %v4773_v39 }
 0x440   :  { %2136 = vmatmul.mubr.msk.f32.gmra.mrb[10].mxu0 %vm1466_vm3, %v1435_v11 }
 0x441   :  { %2139 = vmatmul.mubr.msk.f32.vlgmr.msra.gmra.mrb[8].mxu1 %vm1466_vm3, %v1432_v21  ;;  %1644 = vmatprep.mubr.f32.mxu0 %v4773_v39 }
 0x442   :  { %1816 = vmatprep.mubr.f32.mxu1 %v4773_v39 }
 0x444   :  { %2137 = vmatmul.mubr.msk.f32.gmra.mrb[12].mxu0 %vm1466_vm3, %v1438_v41 }
 0x445   :  { %2140 = vmatmul.mubr.msk.f32.gmra.mrb[10].mxu1 %vm1466_vm3, %v1435_v11  ;;  %1650 = vmatprep.mubr.f32.mxu0 %v4773_v39 }
 0x446   :  { %1822 = vmatprep.mubr.f32.mxu1 %v4773_v39 }
 0x447   :  { %v1454_v24 = vpop.permute.xlu0 %1453 }
 0x448   :  { %2138 = vmatmul.mubr.msk.f32.gmra.mrb[14].mxu0 %vm1466_vm3, %v1441_v26  ;;  %v1449_v47 = vpop.permute.xlu1 %1448 }
 0x449   :  { %2141 = vmatmul.mubr.msk.f32.gmra.mrb[12].mxu1 %vm1466_vm3, %v1438_v41 }
 0x44a   :  { %1828 = vmatprep.mubr.f32.mxu1 %v4773_v39 }
 0x44b   :  { %v1464_v7 = vpop.permute.xlu0 %1463 }
 0x44c   :  { %v1459_v20 = vpop.permute.xlu1 %1458 }
 0x44d   :  { %2142 = vmatmul.mubr.msk.f32.gmra.mrb[14].mxu1 %vm1466_vm3, %v1441_v26 }
 0x50f   :  { %v1634_v27 = vpop.f32.mrb[8].mxu0 }
 0x510   :  { %v4262_v25 = vadd.f32 %v1634_v27, %v1449_v47  ;;  %v1636_v15 = vpop.f32.mrb[9].mxu0 }
 0x511   :  { %v4264_v17 = vadd.f32 %v1636_v15, %v1449_v47 }
 0x512   :  { %v1859_v52 = vmul.f32 %v4262_v25, %v4262_v25 }
 0x513   :  { %v1640_v62 = vpop.f32.mrb[10].mxu0  ;;  %v1860_v32 = vmul.f32 %v4264_v17, %v4264_v17  ;;  %v1835_v18 = vadd.f32 %v4264_v17, %v4262_v25 }
 0x514   :  { %v4270_v54 = vadd.f32 %v1640_v62, %v1454_v24  ;;  %v1642_v58 = vpop.f32.mrb[11].mxu0  ;;  %v1812_v13 = vpop.f32.mrb[8].mxu1 }
 0x515   :  { %v4274_v14 = vadd.f32 %v1642_v58, %v1454_v24  ;;  %v4276_v16 = vadd.f32 %v1812_v13, %v1449_v47  ;;  %v1814_v1 = vpop.f32.mrb[9].mxu1  ;;  %v1875_v22 = vadd.f32 %v1860_v32, %v1859_v52 }
 0x516   :  { %v4278_v4 = vadd.f32 %v1814_v1, %v1449_v47  ;;  %v1863_v6 = vmul.f32 %v4270_v54, %v4270_v54 }
 0x517   :  { %v1836_v36 = vadd.f32 %v4276_v16, %v1835_v18  ;;  %v1861_v23 = vmul.f32 %v4276_v16, %v4276_v16  ;;  %v1646_v42 = vpop.f32.mrb[12].mxu0  ;;  %v1864_v46 = vmul.f32 %v4274_v14, %v4274_v14  ;;  %v1840_v28 = vadd.f32 %v4274_v14, %v4270_v54 }
 0x518   :  { %v1862_v37 = vmul.f32 %v4278_v4, %v4278_v4  ;;  %v1648_v30 = vpop.f32.mrb[13].mxu0  ;;  %v1818_v44 = vpop.f32.mrb[10].mxu1  ;;  %v4294_v45 = vadd.f32 %v1646_v42, %v1459_v20 }
 0x519   :  { %v4291_v10 = vadd.f32 %v1818_v44, %v1454_v24  ;;  %v1820_v59 = vpop.f32.mrb[11].mxu1  ;;  %v1837_v19 = vadd.f32 %v4278_v4, %v1836_v36  ;;  %v4296_v33 = vadd.f32 %v1648_v30, %v1459_v20  ;;  %v1876_v56 = vadd.f32 %v1875_v22, %v1861_v23 }
 0x51a   :  { %v4298_v29 = vadd.f32 %v1820_v59, %v1454_v24  ;;  %v1880_v63 = vadd.f32 %v1864_v46, %v1863_v6  ;;  %v1867_v9 = vmul.f32 %v4294_v45, %v4294_v45 }
 0x51b   :  { %v1841_v38 = vadd.f32 %v4291_v10, %v1840_v28  ;;  %v1865_v3 = vmul.f32 %v4291_v10, %v4291_v10  ;;  %v1652_v0 = vpop.f32.mrb[14].mxu0  ;;  %1838 = vadd.xlane.f32.xlu1 %v1837_v19  ;;  %v1877_v61 = vadd.f32 %v1876_v56, %v1862_v37  ;;  %v1845_v43 = vadd.f32 %v4296_v33, %v4294_v45 }
 0x51c   :  { %v1866_v57 = vmul.f32 %v4298_v29, %v4298_v29  ;;  %v4305_v35 = vadd.f32 %v1652_v0, %v1464_v7  ;;  %v1654_v49 = vpop.f32.mrb[15].mxu0  ;;  %v1824_v60 = vpop.f32.mrb[12].mxu1  ;;  %v1868_v31 = vmul.f32 %v4296_v33, %v4296_v33 }
 0x51d   :  { %v4307_v53 = vadd.f32 %v1654_v49, %v1464_v7  ;;  %v4309_v8 = vadd.f32 %v1824_v60, %v1459_v20  ;;  %v1826_v51 = vpop.f32.mrb[13].mxu1  ;;  %1878 = vadd.xlane.f32.xlu0 %v1877_v61  ;;  %v1881_v48 = vadd.f32 %v1880_v63, %v1865_v3  ;;  %v1842_v5 = vadd.f32 %v4298_v29, %v1841_v38 }
 0x51e   :  { %v1871_v12 = vmul.f32 %v4305_v35, %v4305_v35  ;;  %v4325_v21 = vadd.f32 %v1826_v51, %v1459_v20  ;;  %v1885_v26 = vadd.f32 %v1868_v31, %v1867_v9 }
 0x51f   :  { %v1872_v34 = vmul.f32 %v4307_v53, %v4307_v53  ;;  %v1846_v50 = vadd.f32 %v4309_v8, %v1845_v43  ;;  %v1869_v40 = vmul.f32 %v4309_v8, %v4309_v8  ;;  %v1882_v2 = vadd.f32 %v1881_v48, %v1866_v57 }
 0x520   :  { %v1830_v39 = vpop.f32.mrb[14].mxu1  ;;  %v1850_v55 = vadd.f32 %v4307_v53, %v4305_v35  ;;  %v1870_v62 = vmul.f32 %v4325_v21, %v4325_v21 }
 0x521   :  { %v4329_v11 = vadd.f32 %v1830_v39, %v1464_v7  ;;  %v1832_v41 = vpop.f32.mrb[15].mxu1  ;;  %1843 = vadd.xlane.f32.xlu0 %v1842_v5  ;;  %1883 = vadd.xlane.f32.xlu1 %v1882_v2  ;;  %v1890_v27 = vadd.f32 %v1872_v34, %v1871_v12  ;;  %v1847_v52 = vadd.f32 %v4325_v21, %v1846_v50  ;;  %v1911_v5 = vld [vmem:[%s4405_s7] sm:$0xff] }
 0x522   :  { %v4331_v47 = vadd.f32 %v1832_v41, %v1464_v7  ;;  %v1886_v32 = vadd.f32 %v1885_v26, %v1869_v40  ;;  %v1912_v41 = vld [vmem:[%s4405_s7 + $0x8] sm:$0xff] }
 0x523   :  { %v1851_v15 = vadd.f32 %v4329_v11, %v1850_v55  ;;  %v1873_v24 = vmul.f32 %v4329_v11, %v4329_v11 }
 0x524   :  { %v1874_v58 = vmul.f32 %v4331_v47, %v4331_v47  ;;  %v1887_v1 = vadd.f32 %v1886_v32, %v1870_v62  ;;  %v1928_v62 = vld [vmem:[%s4406_s8 + $0x8] sm:$0xff]  ;;  %v1913_v32 = vld [vmem:[%s4405_s7 + $0x10] sm:$0xff] }
 0x525   :  { %v1852_v13 = vadd.f32 %v4331_v47, %v1851_v15  ;;  %v1891_v18 = vadd.f32 %v1890_v27, %v1873_v24  ;;  %1848 = vadd.xlane.f32.xlu0 %v1847_v52  ;;  %v1927_v24 = vld [vmem:[%s4406_s8] sm:$0xff] }
 0x527   :  { %1853 = vadd.xlane.f32.xlu1 %v1852_v13  ;;  %v1892_v36 = vadd.f32 %v1891_v18, %v1874_v58  ;;  %v1914_v18 = vld [vmem:[%s4405_s7 + $0x18] sm:$0xff]  ;;  %s2402_s7 = smov [#allocation2]  }
 0x529   :  { %1888 = vadd.xlane.f32.xlu0 %v1887_v1 }
 0x52b   :  { %1893 = vadd.xlane.f32.xlu1 %v1892_v36 }
 0x5a8   :  { %v1839_v23 = vpop.xlane.xlu1 %1838 }
 0x5a9   :  { %v1855_v42 = vmul.f32 0.001953125, %v1839_v23 }
 0x5aa   :  { %v1879_v6 = vpop.xlane.xlu0 %1878 }
 0x5ab   :  { %v1899_v22 = vmul.f32 %v1855_v42, %v1855_v42  ;;  %v1895_v46 = vmul.f32 0.001953125, %v1879_v6  ;;  %v1930_v6 = vld [vmem:[%s4406_s8 + $0x18] sm:$0xff] }
 0x5ad   :  { %v1903_v37 = vsub.f32 %v1895_v46, %v1899_v22  ;;  %v1929_v46 = vld [vmem:[%s4406_s8 + $0x10] sm:$0xff]  ;;  %s2080_s8 = sshll.u32 %s2402_s7, 4  ;;  %s2081_s8 = int_to_ptr.vmem [resolvable:$true] %s2080_s8 }
 0x5ae   :  { %v1844_v30 = vpop.xlane.xlu0 %1843  ;;  %v1884_v44 = vpop.xlane.xlu1 %1883  ;;  %s2368_s28 = scalar_lea.vmem %s2081_s8, 2048  ;;  %p2373_p1 = scmp.lt.s32.totalorder %s2081_s8, %s2081_s8 }
 0x5af   :  { %v1907_v20 = vmax.f32 %v1903_v37, 0.0  ;;  %v1856_v28 = vmul.f32 0.001953125, %v1844_v30  ;;  %v1896_v56 = vmul.f32 0.001953125, %v1884_v44  ;;  %p2369_p0 = scmp.ne.s32.totalorder %s2081_s8, %s2368_s28  ;;  %p2374_p2 = scmp.lt.s32.totalorder %s2368_s28, %s2368_s28 }
 0x5b1   :  { %v1915_v59 = vadd.f32 1e-05, %v1907_v20  ;;  %v1900_v19 = vmul.f32 %v1856_v28, %v1856_v28  ;;  %p2375_p3 = por %p2374_p2, %p2373_p1 }
 0x5b2   :  { %v1849_v7 = vpop.xlane.xlu0 %1848 }
 0x5b3   :  { %2360 = vrsqrt.f32 %v1915_v59  ;;  %v1904_v38 = vsub.f32 %v1896_v56, %v1900_v19  ;;  %v1857_v3 = vmul.f32 0.001953125, %v1849_v7  ;;  %p2376_p4 = pnand %p2375_p3, %p2369_p0 }
 0x5b4   :  { %v1854_v0 = vpop.xlane.xlu1 %1853 }
 0x5b5   :  { %v1858_v63 = vmul.f32 0.001953125, %v1854_v0  ;;  %v1908_v57 = vmax.f32 %v1904_v38, 0.0  ;;  %v1901_v61 = vmul.f32 %v1857_v3, %v1857_v3 }
 0x5b6   :  { %v1889_v49 = vpop.xlane.xlu0 %1888 }
 0x5b7   :  { %v1916_v60 = vadd.f32 1e-05, %v1908_v57  ;;  %v1897_v51 = vmul.f32 0.001953125, %v1889_v49  ;;  %v1902_v43 = vmul.f32 %v1858_v63, %v1858_v63 }
 0x5b8   :  { %v1894_v9 = vpop.xlane.xlu1 %1893 }
 0x5b9   :  { %v1898_v31 = vmul.f32 0.001953125, %v1894_v9  ;;  %2362 = vrsqrt.f32 %v1916_v60  ;;  %v1905_v48 = vsub.f32 %v1897_v51, %v1901_v61 }
 0x5bb   :  { %v1906_v12 = vsub.f32 %v1898_v31, %v1902_v43  ;;  %v1909_v34 = vmax.f32 %v1905_v48, 0.0 }
 0x5bd   :  { %v1910_v50 = vmax.f32 %v1906_v12, 0.0  ;;  %v2361_v40 = vpop.eup %2360  ;;  %v1917_v39 = vadd.f32 1e-05, %v1909_v34 }
 0x5be   :  { %v1923_v55 = vmul.f32 %v2361_v40, %v1911_v5 }
 0x5bf   :  { %v1918_v2 = vadd.f32 1e-05, %v1910_v50  ;;  %2364 = vrsqrt.f32 %v1917_v39 }
 0x5c0   :  { %1941 = vperm.xlu0 %2348, %v1923_v55   ;;  %v1931_v15 = vmul.f32 %v1923_v55, %v1855_v42 }
 0x5c1   :  { %2366 = vrsqrt.f32 %v1918_v2 }
 0x5c2   :  { %v1935_v58 = vsub.f32 %v1927_v24, %v1931_v15 }
 0x5c3   :  { %v2363_v26 = vpop.eup %2362 }
 0x5c4   :  { %v1924_v27 = vmul.f32 %v2363_v26, %v1912_v41 }
 0x5c6   :  { %1946 = vperm.xlu1 %2349, %v1924_v27   ;;  %v1932_v52 = vmul.f32 %v1924_v27, %v1856_v28 }
 0x5c8   :  { %v1936_v13 = vsub.f32 %v1928_v62, %v1932_v52 }
 0x5c9   :  { %v2365_v1 = vpop.eup %2364 }
 0x5ca   :  { %1977 = vperm.xlu1 %2349, %v1935_v58   ;;  %1982 = vperm.xlu0 %2348, %v1936_v13   ;;  %v1925_v23 = vmul.f32 %v2365_v1, %v1913_v32 }
 0x5cb   :  { %v2367_v36 = vpop.eup %2366 }
 0x5cc   :  { %v1926_v42 = vmul.f32 %v2367_v36, %v1914_v18  ;;  %v1933_v22 = vmul.f32 %v1925_v23, %v1857_v3 }
 0x5ce   :  { %v1934_v37 = vmul.f32 %v1926_v42, %v1858_v63  ;;  %1951 = vperm.xlu1 %2349, %v1925_v23   ;;  %1956 = vperm.xlu0 %2348, %v1926_v42   ;;  %v1937_v44 = vsub.f32 %v1929_v46, %v1933_v22 }
 0x5d0   :  { %v1938_v30 = vsub.f32 %v1930_v6, %v1934_v37 }
 0x5d2   :  { %1987 = vperm.xlu1 %2349, %v1937_v44   ;;  %1992 = vperm.xlu0 %2348, %v1938_v30  }
 0x63f   :  { %v1942_v20 = vpop.permute.xlu0 %1941 }
 0x640   :  { %v1959_v38 = vmul.f32 %v4262_v25, %v1942_v20  ;;  %v1960_v3 = vmul.f32 %v4264_v17, %v1942_v20  ;;  %v1961_v0 = vmul.f32 %v4276_v16, %v1942_v20  ;;  %v1962_v63 = vmul.f32 %v4278_v4, %v1942_v20 }
 0x645   :  { %v1947_v28 = vpop.permute.xlu1 %1946 }
 0x646   :  { %v1963_v59 = vmul.f32 %v4270_v54, %v1947_v28  ;;  %v1964_v19 = vmul.f32 %v4274_v14, %v1947_v28  ;;  %v1965_v56 = vmul.f32 %v4291_v10, %v1947_v28  ;;  %v1966_v7 = vmul.f32 %v4298_v29, %v1947_v28 }
 0x649   :  { %v1983_v57 = vpop.permute.xlu0 %1982  ;;  %v1978_v49 = vpop.permute.xlu1 %1977 }
 0x64a   :  { %v1999_v60 = vadd.f32 %v1983_v57, %v1963_v59  ;;  %v2000_v61 = vadd.f32 %v1983_v57, %v1964_v19  ;;  %v2001_v51 = vadd.f32 %v1983_v57, %v1965_v56  ;;  %v2002_v54 = vadd.f32 %v1983_v57, %v1966_v7 }
 0x64b   :  { %v1995_v9 = vadd.f32 %v1978_v49, %v1959_v38  ;;  %v1996_v14 = vadd.f32 %v1978_v49, %v1960_v3  ;;  %v1997_v43 = vadd.f32 %v1978_v49, %v1961_v0  ;;  %v1998_v10 = vadd.f32 %v1978_v49, %v1962_v63 }
 0x64c   :  { %vm2015_vm7 = vcmp.ge.f32.partialorder %v1999_v60, 0.0  ;;  %vm2016_vm4 = vcmp.ge.f32.partialorder %v2000_v61, 0.0  ;;  %vm2017_vm13 = vcmp.ge.f32.partialorder %v2001_v51, 0.0  ;;  %vm2018_vm5 = vcmp.ge.f32.partialorder %v2002_v54, 0.0 }
 0x64d   :  { %v2031_v25 = vmul.f32 0.2, %v1999_v60  ;;  %v2032_v17 = vmul.f32 0.2, %v2000_v61  ;;  %v2033_v29 = vmul.f32 0.2, %v2001_v51  ;;  %v1957_v16 = vpop.permute.xlu0 %1956  ;;  %v1952_v4 = vpop.permute.xlu1 %1951 }
 0x64e   :  { %v2034_v31 = vmul.f32 0.2, %v2002_v54  ;;  %vm2011_vm10 = vcmp.ge.f32.partialorder %v1995_v9, 0.0  ;;  %vm2012_vm12 = vcmp.ge.f32.partialorder %v1996_v14, 0.0  ;;  %vm2013_vm15 = vcmp.ge.f32.partialorder %v1997_v43, 0.0 }
 0x64f   :  { %v2047_v48 = vsel %vm2015_vm7, %v1999_v60, %v2031_v25  ;;  %v2048_v12 = vsel %vm2016_vm4, %v2000_v61, %v2032_v17  ;;  %v2049_v34 = vsel %vm2017_vm13, %v2001_v51, %v2033_v29  ;;  %vm2014_vm6 = vcmp.ge.f32.partialorder %v1998_v10, 0.0 }
 0x650   :  { %v2050_v5 = vsel %vm2018_vm5, %v2002_v54, %v2034_v31  ;;  %2063 = vst [vmem:[#allocation2 + $0x20] sm:$0xff] %v2047_v48  ;;  %2064 = vst [vmem:[#allocation2 + $0x28] sm:$0xff] %v2048_v12  ;;  %v2027_v50 = vmul.f32 0.2, %v1995_v9  ;;  %v2028_v40 = vmul.f32 0.2, %v1996_v14  ;;  %v1971_v55 = vmul.f32 %v4305_v35, %v1957_v16 }
 0x651   :  { %2065 = vst [vmem:[#allocation2 + $0x30] sm:$0xff] %v2049_v34  ;;  %v2029_v39 = vmul.f32 0.2, %v1997_v43  ;;  %2066 = vst [vmem:[#allocation2 + $0x38] sm:$0xff] %v2050_v5  ;;  %v2030_v2 = vmul.f32 0.2, %v1998_v10  ;;  %v1972_v41 = vmul.f32 %v4307_v53, %v1957_v16  ;;  %v1973_v26 = vmul.f32 %v4329_v11, %v1957_v16  ;;  %v1993_v27 = vpop.permute.xlu0 %1992  ;;  %v1988_v36 = vpop.permute.xlu1 %1987 }
 0x652   :  { %v2043_v15 = vsel %vm2011_vm10, %v1995_v9, %v2027_v50  ;;  %v2044_v24 = vsel %vm2012_vm12, %v1996_v14, %v2028_v40  ;;  %v1974_v52 = vmul.f32 %v4331_v47, %v1957_v16  ;;  %v2007_v58 = vadd.f32 %v1993_v27, %v1971_v55 }
 0x653   :  { %v2045_v62 = vsel %vm2013_vm15, %v1997_v43, %v2029_v39  ;;  %v2046_v32 = vsel %vm2014_vm6, %v1998_v10, %v2030_v2  ;;  %2059 = vst [vmem:[#allocation2] sm:$0xff] %v2043_v15  ;;  %2060 = vst [vmem:[#allocation2 + $0x8] sm:$0xff] %v2044_v24  ;;  %v2008_v35 = vadd.f32 %v1993_v27, %v1972_v41 }
 0x654   :  { %2061 = vst [vmem:[#allocation2 + $0x10] sm:$0xff] %v2045_v62  ;;  %v2009_v13 = vadd.f32 %v1993_v27, %v1973_v26  ;;  %2062 = vst [vmem:[#allocation2 + $0x18] sm:$0xff] %v2046_v32  ;;  %v2010_v53 = vadd.f32 %v1993_v27, %v1974_v52  ;;  %v1967_v11 = vmul.f32 %v4294_v45, %v1952_v4  ;;  %vm2023_vm14 = vcmp.ge.f32.partialorder %v2007_v58, 0.0 }
 0x655   :  { %v1968_v18 = vmul.f32 %v4296_v33, %v1952_v4  ;;  %v1969_v1 = vmul.f32 %v4309_v8, %v1952_v4  ;;  %vm2024_vm11 = vcmp.ge.f32.partialorder %v2008_v35, 0.0  ;;  %v2039_v47 = vmul.f32 0.2, %v2007_v58 }
 0x656   :  { %vm2025_vm0 = vcmp.ge.f32.partialorder %v2009_v13, 0.0  ;;  %vm2026_vm8 = vcmp.ge.f32.partialorder %v2010_v53, 0.0  ;;  %v2040_v23 = vmul.f32 0.2, %v2008_v35  ;;  %v2041_v42 = vmul.f32 0.2, %v2009_v13 }
 0x657   :  { %v1970_v22 = vmul.f32 %v4325_v21, %v1952_v4  ;;  %v2042_v6 = vmul.f32 0.2, %v2010_v53  ;;  %v2055_v46 = vsel %vm2023_vm14, %v2007_v58, %v2039_v47  ;;  %v2003_v37 = vadd.f32 %v1988_v36, %v1967_v11 }
 0x658   :  { %v2004_v30 = vadd.f32 %v1988_v36, %v1968_v18  ;;  %v2056_v44 = vsel %vm2024_vm11, %v2008_v35, %v2040_v23  ;;  %v2057_v45 = vsel %vm2025_vm0, %v2009_v13, %v2041_v42  ;;  %2071 = vst [vmem:[#allocation2 + $0x60] sm:$0xff] %v2055_v46  ;;  %v2005_v33 = vadd.f32 %v1988_v36, %v1969_v1 }
 0x659   :  { %v2006_v20 = vadd.f32 %v1988_v36, %v1970_v22  ;;  %v2058_v8 = vsel %vm2026_vm8, %v2010_v53, %v2042_v6  ;;  %2072 = vst [vmem:[#allocation2 + $0x68] sm:$0xff] %v2056_v44  ;;  %2073 = vst [vmem:[#allocation2 + $0x70] sm:$0xff] %v2057_v45  ;;  %vm2019_vm1 = vcmp.ge.f32.partialorder %v2003_v37, 0.0  ;;  %v2035_v28 = vmul.f32 0.2, %v2003_v37 }
 0x65a   :  { %vm2020_vm2 = vcmp.ge.f32.partialorder %v2004_v30, 0.0  ;;  %2074 = vst [vmem:[#allocation2 + $0x78] sm:$0xff] %v2058_v8  ;;  %vm2021_vm9 = vcmp.ge.f32.partialorder %v2005_v33, 0.0  ;;  %v2036_v21 = vmul.f32 0.2, %v2004_v30 }
 0x65b   :  { %vm2022_vm3 = vcmp.ge.f32.partialorder %v2006_v20, 0.0  ;;  %v2037_v59 = vmul.f32 0.2, %v2005_v33  ;;  %v2038_v19 = vmul.f32 0.2, %v2006_v20  ;;  %v2051_v56 = vsel %vm2019_vm1, %v2003_v37, %v2035_v28 }
 0x65c   :  { %v2052_v7 = vsel %vm2020_vm2, %v2004_v30, %v2036_v21  ;;  %2067 = vst [vmem:[#allocation2 + $0x40] sm:$0xff] %v2051_v56 }
 0x65d   :  { %v2053_v38 = vsel %vm2021_vm9, %v2005_v33, %v2037_v59  ;;  %v2054_v3 = vsel %vm2022_vm3, %v2006_v20, %v2038_v19  ;;  %2068 = vst [vmem:[#allocation2 + $0x48] sm:$0xff] %v2052_v7 }
 0x65e   :  { %2069 = vst [vmem:[#allocation2 + $0x50] sm:$0xff] %v2053_v38  ;;  %2070 = vst [vmem:[#allocation2 + $0x58] sm:$0xff] %v2054_v3 }
 0x65f   :  { %2379 = shalt.err (!%p2376_p4)
}
 0x660   :  { %s2380_s10 = scalar_lea.hbm %s4407_s9, 2048 }
 0x661   :  { %p2381_p5 = scmp.ne.s32.totalorder %s4407_s9, %s2380_s10  ;;  %p2384_p6 = scmp.lt.u32.totalorder %s2380_s10, %s4407_s9 }
 0x663   :  { %p2386_p7 = pnand %p2384_p6, %p2381_p5 }
 0x665   :  { %2389 = shalt.err (!%p2386_p7)
}
 0x666   :  { %s2403_s4 = smov 512   ;;  %s2404_s11 = smov 32  }
 0x667   :  { %2086 = dma.vmem_to_hbm [thread:$0]  %s2081_s8, 2048, %s4407_s9, [#allocation3], %s2403_s4, %s2403_s4, %s2404_s11  }
 0x668   :  { %2390 = dma.done.wait [#allocation3], 2048  }
 0x669   :  { %2391 = vsyncadd [#allocation3], 4294965248 }
 0x66a   :  { %2090 = vsyncpa [#allocation3], 1 }

</bundles_post_ra>
